<compile_context>
chip_gen: v5e
topology: v5e:2x2
jax: 0.10.0
libtpu: 0.0.40
codegen_flags: <defaults>
</compile_context>

<pallas_src>
import jax
import jax.numpy as jnp
from jax.experimental import pallas as pl
from jax.experimental.pallas import tpu as pltpu


def _decoder_kernel(emb_ref, enc_ref, h_in_ref, c_in_ref,
                    wq_ref, bq_ref, wk_ref, bk_ref, wv_ref, bv_ref, wo_ref, bo_ref,
                    wih0_ref, whh0_ref, b0_ref,
                    wih1_ref, whh1_ref, b1_ref,
                    wout_ref, bout_ref,
                    logits_ref, hn_ref, cn_ref,
                    dec_sc):
    Bb, T, Ein = emb_ref.shape
    S = enc_ref.shape[1]
    E = h_in_ref.shape[-1]
    scale = 1.0 / (float(E) ** 0.5)   # single-head attention: head_dim == embed_dim == E

    # ---- hoist every weight / bias load out of the unrolled time loop ----
    wq = wq_ref[...]; bq = bq_ref[...]
    wk = wk_ref[...]; bk = bk_ref[...]
    wv = wv_ref[...]; bv = bv_ref[...]
    wo = wo_ref[...]; bo = bo_ref[...]
    wih0 = wih0_ref[...]
    wih0_emb = wih0[:Ein, :]          # (Ein, 4E): step-invariant embedding part
    wih0_ctx = wih0[Ein:, :]          # (E,   4E): per-step context part
    whh0 = whh0_ref[...]; b0 = b0_ref[...]
    wih1 = wih1_ref[...]; whh1 = whh1_ref[...]; b1 = b1_ref[...]
    wout = wout_ref[...]; bout = bout_ref[...]

    # ---- step-invariant projections, hoisted: K/V of encoder_output and the
    #      embedding contribution to the layer-0 LSTM gates (one big matmul each) ----
    enc = enc_ref[...].reshape(Bb * S, E)
    kp = (jnp.dot(enc, wk, preferred_element_type=jnp.float32) + bk).reshape(Bb, S, E)
    vp = (jnp.dot(enc, wv, preferred_element_type=jnp.float32) + bv).reshape(Bb, S, E)

    emb = emb_ref[...].reshape(Bb * T, Ein)
    gates0_emb = (jnp.dot(emb, wih0_emb, preferred_element_type=jnp.float32)
                  + b0).reshape(Bb, T, 4 * E)

    # ---- LSTM state lives in vregs for the whole unrolled loop ----
    h_in = h_in_ref[...]
    c_in = c_in_ref[...]
    h0, h1 = h_in[:, 0, :], h_in[:, 1, :]
    c0, c1 = c_in[:, 0, :], c_in[:, 1, :]

    def gates_to_hc(gates, c_prev):
        # PyTorch gate order: i, f, g, o ; biases pre-summed (b_ih + b_hh)
        i = jax.nn.sigmoid(gates[:, 0 * E:1 * E])
        f = jax.nn.sigmoid(gates[:, 1 * E:2 * E])
        g = jnp.tanh(gates[:, 2 * E:3 * E])
        o = jax.nn.sigmoid(gates[:, 3 * E:4 * E])
        c_new = f * c_prev + i * g
        return o * jnp.tanh(c_new), c_new

    # TODO(synk): for large T switch this static unroll to lax.fori_loop with state in
    # scratch (keeps LLO scheduling visibility without bundle-stream blowup).
    for t in range(T):
        # -- single-head attention; query = last-layer hidden from the previous step --
        q = (jnp.dot(h1, wq, preferred_element_type=jnp.float32) + bq)[:, None, :]    # (Bb,1,E)
        scores = jnp.einsum('bqe,bse->bqs', q, kp,
                            preferred_element_type=jnp.float32) * scale               # MXU
        scores = scores - jnp.max(scores, axis=-1, keepdims=True)
        p = jnp.exp(scores)
        attn = p * pl.reciprocal(jnp.sum(p, axis=-1, keepdims=True), approx=True)     # EUP
        ctx = jnp.einsum('bqs,bse->bqe', attn, vp,
                         preferred_element_type=jnp.float32)[:, 0, :]                 # (Bb,E)
        ctx = jnp.dot(ctx, wo, preferred_element_type=jnp.float32) + bo

        # -- 2-layer LSTM, one time step (embedding part of the layer-0 gates hoisted) --
        gates0 = (gates0_emb[:, t, :]
                  + jnp.dot(ctx, wih0_ctx, preferred_element_type=jnp.float32)
                  + jnp.dot(h0, whh0, preferred_element_type=jnp.float32))
        h0, c0 = gates_to_hc(gates0, c0)
        # TODO(synk): nn.LSTM inter-layer dropout (p=0.3) is training-only; eval semantics here.
        gates1 = (jnp.dot(h0, wih1, preferred_element_type=jnp.float32)
                  + jnp.dot(h1, whh1, preferred_element_type=jnp.float32) + b1)
        h1, c1 = gates_to_hc(gates1, c1)

        dec_sc[:, t, :] = h1          # stash last-layer hidden; project after the loop

    # ---- one lane-dense output projection for all T steps: (Bb*T, E) @ (E, Vpad) ----
    dec = dec_sc[...].reshape(Bb * T, E)
    logits = jnp.dot(dec, wout, preferred_element_type=jnp.float32) + bout    # (Bb*T, Vpad)
    logits_ref[...] = logits.reshape(Bb, T, -1)

    # write final LSTM state once
    hn_ref[:, 0, :] = h0
    hn_ref[:, 1, :] = h1
    cn_ref[:, 0, :] = c0
    cn_ref[:, 1, :] = c1


def decoder_forward(params, decoder_input, encoder_output, h_n, c_n, *, batch_block=None):
    B, T = decoder_input.shape
    S, _, E = encoder_output.shape
    L = h_n.shape[0]
    V = params["wout"].shape[-1]
    Vp = ((V + 127) // 128) * 128          # lane-dense (multiple-of-128) vocab width
    assert L == 2, "kernel is specialized to num_layers=2 (as in the PyTorch module)"

    Bb = B if batch_block is None else batch_block
    assert B % Bb == 0
    grid = (B // Bb,)

    # glue: embedding gather + batch-first layout so the grid can block over batch
    emb = jnp.take(params["embedding"], decoder_input, axis=0).astype(jnp.float32)  # (B,T,Ein)
    enc = jnp.transpose(encoder_output, (1, 0, 2)).astype(jnp.float32)              # (B,S,E)
    h_b = jnp.transpose(h_n, (1, 0, 2)).astype(jnp.float32)                         # (B,L,E)
    c_b = jnp.transpose(c_n, (1, 0, 2)).astype(jnp.float32)

    # pad output projection to a lane-dense width (unmasked vst on the logits slab)
    wout_p = jnp.pad(params["wout"], ((0, 0), (0, Vp - V)))
    bout_p = jnp.pad(params["bout"], ((0, 0), (0, Vp - V)))

    weights = (params["wq"], params["bq"], params["wk"], params["bk"],
               params["wv"], params["bv"], params["wo"], params["bo"],
               params["wih0"], params["whh0"], params["b0"],
               params["wih1"], params["whh1"], params["b1"],
               wout_p, bout_p)

    def batch_spec(x):      # block over the leading batch dim only
        return pl.BlockSpec((Bb,) + x.shape[1:], lambda b: (b, 0, 0))

    def full_spec(w):       # 2-D weight, fully resident, same block for every grid step
        return pl.BlockSpec(w.shape, lambda b: (0, 0))

    in_specs = ([batch_spec(emb), batch_spec(enc), batch_spec(h_b), batch_spec(c_b)]
                + [full_spec(w) for w in weights])
    out_specs = (pl.BlockSpec((Bb, T, Vp), lambda b: (b, 0, 0)),
                 pl.BlockSpec((Bb, L, E), lambda b: (b, 0, 0)),
                 pl.BlockSpec((Bb, L, E), lambda b: (b, 0, 0)))

    # TODO(synk): at production sizes (E~1024, V~32K) tile wout/logits over V and set
    # pltpu.CompilerParams(vmem_limit_bytes=...) — they would not fit resident in VMEM.
    logits_p, hn_b, cn_b = pl.pallas_call(
        _decoder_kernel,
        grid=grid,
        out_shape=(jax.ShapeDtypeStruct((B, T, Vp), jnp.float32),
                   jax.ShapeDtypeStruct((B, L, E), jnp.float32),
                   jax.ShapeDtypeStruct((B, L, E), jnp.float32)),
        in_specs=in_specs,
        out_specs=out_specs,
        scratch_shapes=[pltpu.VMEM((Bb, T, E), jnp.float32)],
        compiler_params=pltpu.CompilerParams(
            dimension_semantics=("parallel",)),   # batch blocks shard across TCs on v7x
    )(emb, enc, h_b, c_b, *weights)

    logits = jnp.transpose(logits_p[:, :, :V], (1, 0, 2))   # (T, B, V)
    hn = jnp.transpose(hn_b, (1, 0, 2))                     # (L, B, E)
    cn = jnp.transpose(cn_b, (1, 0, 2))
    return logits, (hn, cn)


def decoder_reference(params, decoder_input, encoder_output, h_n, c_n):
    """Pure-JAX (f32, exact softmax) reference reproducing the PyTorch forward semantics."""
    B, T = decoder_input.shape
    E = h_n.shape[-1]
    emb = jnp.take(params["embedding"], decoder_input, axis=0)
    emb = jnp.transpose(emb, (1, 0, 2))                                  # (T, B, Ein)
    kp = encoder_output @ params["wk"] + params["bk"]                    # (S, B, E)
    vp = encoder_output @ params["wv"] + params["bv"]
    scale = 1.0 / (float(E) ** 0.5)

    def lstm(x, hp, cp, wih, whh, b):
        g = x @ wih + hp @ whh + b
        i = jax.nn.sigmoid(g[:, :E]); f = jax.nn.sigmoid(g[:, E:2 * E])
        gg = jnp.tanh(g[:, 2 * E:3 * E]); o = jax.nn.sigmoid(g[:, 3 * E:])
        c_new = f * cp + i * gg
        return o * jnp.tanh(c_new), c_new

    h, c = h_n, c_n
    outs = []
    for t in range(T):
        q = h[1] @ params["wq"] + params["bq"]
        scores = jnp.einsum("be,sbe->bs", q, kp) * scale
        attn = jax.nn.softmax(scores, axis=-1)
        ctx = jnp.einsum("bs,sbe->be", attn, vp) @ params["wo"] + params["bo"]
        x0 = jnp.concatenate([emb[t], ctx], axis=-1)
        h0, c0 = lstm(x0, h[0], c[0], params["wih0"], params["whh0"], params["b0"])
        h1, c1 = lstm(h0, h[1], c[1], params["wih1"], params["whh1"], params["b1"])
        h = jnp.stack([h0, h1]); c = jnp.stack([c0, c1])
        outs.append(h1)
    dec = jnp.stack(outs)                                                # (T, B, E)
    logits = dec @ params["wout"] + params["bout"]
    return logits, (h, c)


def init_params(key, vocab_size, embed_size, hidden_size, pad_idx=0):
    """Deterministic synthetic parameters (kernel-friendly layout: x @ W)."""
    E = 2 * hidden_size
    ks = jax.random.split(key, 17)

    def w(k, shape, s=0.1):
        return jax.random.normal(k, shape, jnp.float32) * s

    embedding = w(ks[0], (vocab_size, embed_size)).at[pad_idx].set(0.0)  # padding_idx row = 0
    return dict(
        embedding=embedding,
        # MultiHeadAttention (num_heads=1), stored as (in, out) so kernel does x @ W
        wq=w(ks[1], (E, E)), bq=w(ks[2], (1, E)),
        wk=w(ks[3], (E, E)), bk=w(ks[4], (1, E)),
        wv=w(ks[5], (E, E)), bv=w(ks[6], (1, E)),
        wo=w(ks[7], (E, E)), bo=w(ks[8], (1, E)),
        # LSTM layer 0: in = embed + E ; LSTM layer 1: in = E ; hidden = E ; gates i,f,g,o
        wih0=w(ks[9], (embed_size + E, 4 * E)), whh0=w(ks[10], (E, 4 * E)),
        b0=w(ks[11], (1, 4 * E)),   # b_ih_l0 + b_hh_l0 pre-summed
        wih1=w(ks[12], (E, 4 * E)), whh1=w(ks[13], (E, 4 * E)),
        b1=w(ks[14], (1, 4 * E)),   # b_ih_l1 + b_hh_l1 pre-summed
        # output projection Linear(E, vocab)
        wout=w(ks[15], (E, vocab_size)), bout=w(ks[16], (1, vocab_size)),
    )


if __name__ == "__main__":
    VOCAB, EMBED, HIDDEN, LAYERS = 64, 32, 16, 2
    B, T, S = 4, 8, 8
    E = 2 * HIDDEN

    key = jax.random.PRNGKey(0)
    kparam, kdec, kenc, kh, kc = jax.random.split(key, 5)
    params = init_params(kparam, VOCAB, EMBED, HIDDEN)

    decoder_input = jax.random.randint(kdec, (B, T), 0, VOCAB, jnp.int32)
    encoder_output = jax.random.normal(kenc, (S, B, E), jnp.float32)
    h_n = jax.random.normal(kh, (LAYERS, B, E), jnp.float32)
    c_n = jax.random.normal(kc, (LAYERS, B, E), jnp.float32)

    fwd = jax.jit(decoder_forward, static_argnames=("batch_block",))
    # batch_block=2 -> grid=(2,), "parallel": the two batch halves run on the two
    # TensorCores on v7x; on v5e/v6e it is a cheap 2-step sequential grid.
    logits, (hn, cn) = fwd(params, decoder_input, encoder_output, h_n, c_n, batch_block=2)
    jax.block_until_ready((logits, hn, cn))

    ref_logits, (ref_hn, ref_cn) = decoder_reference(params, decoder_input, encoder_output, h_n, c_n)
    assert logits.shape == (T, B, VOCAB) and hn.shape == h_n.shape and cn.shape == c_n.shape
    # tolerance loosened from 1e-4 to 1e-3: the softmax normalization now uses the EUP
    # approximate reciprocal (rel. error ~2^-12); all matmuls remain f32-accumulated.
    assert jnp.allclose(logits, ref_logits, atol=1e-3, rtol=1e-3)
    assert jnp.allclose(hn, ref_hn, atol=1e-3, rtol=1e-3)
    assert jnp.allclose(cn, ref_cn, atol=1e-3, rtol=1e-3)
    print("KERNEL_OK")
</pallas_src>

<mosaic_0001>
module attributes {stable_mosaic.version = 11 : i64} {
  func.func @_decoder_kernel(%arg0: i32, %arg1: memref<2x8x32xf32, #tpu.memory_space<vmem>>, %arg2: memref<2x8x32xf32, #tpu.memory_space<vmem>>, %arg3: memref<2x2x32xf32, #tpu.memory_space<vmem>>, %arg4: memref<2x2x32xf32, #tpu.memory_space<vmem>>, %arg5: memref<32x32xf32, #tpu.memory_space<vmem>>, %arg6: memref<1x32xf32, #tpu.memory_space<vmem>>, %arg7: memref<32x32xf32, #tpu.memory_space<vmem>>, %arg8: memref<1x32xf32, #tpu.memory_space<vmem>>, %arg9: memref<32x32xf32, #tpu.memory_space<vmem>>, %arg10: memref<1x32xf32, #tpu.memory_space<vmem>>, %arg11: memref<32x32xf32, #tpu.memory_space<vmem>>, %arg12: memref<1x32xf32, #tpu.memory_space<vmem>>, %arg13: memref<64x128xf32, #tpu.memory_space<vmem>>, %arg14: memref<32x128xf32, #tpu.memory_space<vmem>>, %arg15: memref<1x128xf32, #tpu.memory_space<vmem>>, %arg16: memref<32x128xf32, #tpu.memory_space<vmem>>, %arg17: memref<32x128xf32, #tpu.memory_space<vmem>>, %arg18: memref<1x128xf32, #tpu.memory_space<vmem>>, %arg19: memref<32x128xf32, #tpu.memory_space<vmem>>, %arg20: memref<1x128xf32, #tpu.memory_space<vmem>>, %arg21: memref<2x8x128xf32, #tpu.memory_space<vmem>>, %arg22: memref<2x2x32xf32, #tpu.memory_space<vmem>>, %arg23: memref<2x2x32xf32, #tpu.memory_space<vmem>>, %arg24: memref<2x8x32xf32, #tpu.memory_space<vmem>>) attributes {dimension_semantics = [#tpu.dimension_semantics<parallel>], iteration_bounds = array<i64: 2>, scalar_prefetch = 0 : i64, scratch_operands = 1 : i64, tpu.core_type = #tpu.core_type<tc>, window_params = [{transform_indices = @transform_0, window_bounds = array<i64: 2, 8, 32>}, {transform_indices = @transform_1, window_bounds = array<i64: 2, 8, 32>}, {transform_indices = @transform_2, window_bounds = array<i64: 2, 2, 32>}, {transform_indices = @transform_3, window_bounds = array<i64: 2, 2, 32>}, {pipeline_mode = #tpu.pipeline_mode<synchronous>, transform_indices = @transform_4, window_bounds = array<i64: 32, 32>}, {pipeline_mode = #tpu.pipeline_mode<synchronous>, transform_indices = @transform_5, window_bounds = array<i64: 1, 32>}, {pipeline_mode = #tpu.pipeline_mode<synchronous>, transform_indices = @transform_6, window_bounds = array<i64: 32, 32>}, {pipeline_mode = #tpu.pipeline_mode<synchronous>, transform_indices = @transform_7, window_bounds = array<i64: 1, 32>}, {pipeline_mode = #tpu.pipeline_mode<synchronous>, transform_indices = @transform_8, window_bounds = array<i64: 32, 32>}, {pipeline_mode = #tpu.pipeline_mode<synchronous>, transform_indices = @transform_9, window_bounds = array<i64: 1, 32>}, {pipeline_mode = #tpu.pipeline_mode<synchronous>, transform_indices = @transform_10, window_bounds = array<i64: 32, 32>}, {pipeline_mode = #tpu.pipeline_mode<synchronous>, transform_indices = @transform_11, window_bounds = array<i64: 1, 32>}, {pipeline_mode = #tpu.pipeline_mode<synchronous>, transform_indices = @transform_12, window_bounds = array<i64: 64, 128>}, {pipeline_mode = #tpu.pipeline_mode<synchronous>, transform_indices = @transform_13, window_bounds = array<i64: 32, 128>}, {pipeline_mode = #tpu.pipeline_mode<synchronous>, transform_indices = @transform_14, window_bounds = array<i64: 1, 128>}, {pipeline_mode = #tpu.pipeline_mode<synchronous>, transform_indices = @transform_15, window_bounds = array<i64: 32, 128>}, {pipeline_mode = #tpu.pipeline_mode<synchronous>, transform_indices = @transform_16, window_bounds = array<i64: 32, 128>}, {pipeline_mode = #tpu.pipeline_mode<synchronous>, transform_indices = @transform_17, window_bounds = array<i64: 1, 128>}, {pipeline_mode = #tpu.pipeline_mode<synchronous>, transform_indices = @transform_18, window_bounds = array<i64: 32, 128>}, {pipeline_mode = #tpu.pipeline_mode<synchronous>, transform_indices = @transform_19, window_bounds = array<i64: 1, 128>}, {transform_indices = @transform_20, window_bounds = array<i64: 2, 8, 128>}, {transform_indices = @transform_21, window_bounds = array<i64: 2, 2, 32>}, {transform_indices = @transform_22, window_bounds = array<i64: 2, 2, 32>}]} {
    %c0 = arith.constant 0 : index
    %c0_0 = arith.constant 0 : index
    %0 = vector.load %arg5[%c0, %c0_0] : memref<32x32xf32, #tpu.memory_space<vmem>>, vector<32x32xf32>
    %c0_1 = arith.constant 0 : index
    %c0_2 = arith.constant 0 : index
    %1 = vector.load %arg6[%c0_1, %c0_2] : memref<1x32xf32, #tpu.memory_space<vmem>>, vector<1x32xf32>
    %c0_3 = arith.constant 0 : index
    %c0_4 = arith.constant 0 : index
    %2 = vector.load %arg7[%c0_3, %c0_4] : memref<32x32xf32, #tpu.memory_space<vmem>>, vector<32x32xf32>
    %c0_5 = arith.constant 0 : index
    %c0_6 = arith.constant 0 : index
    %3 = vector.load %arg8[%c0_5, %c0_6] : memref<1x32xf32, #tpu.memory_space<vmem>>, vector<1x32xf32>
    %c0_7 = arith.constant 0 : index
    %c0_8 = arith.constant 0 : index
    %4 = vector.load %arg9[%c0_7, %c0_8] : memref<32x32xf32, #tpu.memory_space<vmem>>, vector<32x32xf32>
    %c0_9 = arith.constant 0 : index
    %c0_10 = arith.constant 0 : index
    %5 = vector.load %arg10[%c0_9, %c0_10] : memref<1x32xf32, #tpu.memory_space<vmem>>, vector<1x32xf32>
    %c0_11 = arith.constant 0 : index
    %c0_12 = arith.constant 0 : index
    %6 = vector.load %arg11[%c0_11, %c0_12] : memref<32x32xf32, #tpu.memory_space<vmem>>, vector<32x32xf32>
    %c0_13 = arith.constant 0 : index
    %c0_14 = arith.constant 0 : index
    %7 = vector.load %arg12[%c0_13, %c0_14] : memref<1x32xf32, #tpu.memory_space<vmem>>, vector<1x32xf32>
    %c0_15 = arith.constant 0 : index
    %c0_16 = arith.constant 0 : index
    %8 = vector.load %arg13[%c0_15, %c0_16] : memref<64x128xf32, #tpu.memory_space<vmem>>, vector<64x128xf32>
    %9 = vector.extract_strided_slice %8 {offsets = [0, 0], sizes = [32, 128], strides = [1, 1]} : vector<64x128xf32> to vector<32x128xf32>
    %10 = vector.extract_strided_slice %8 {offsets = [32, 0], sizes = [32, 128], strides = [1, 1]} : vector<64x128xf32> to vector<32x128xf32>
    %c0_17 = arith.constant 0 : index
    %c0_18 = arith.constant 0 : index
    %11 = vector.load %arg14[%c0_17, %c0_18] : memref<32x128xf32, #tpu.memory_space<vmem>>, vector<32x128xf32>
    %c0_19 = arith.constant 0 : index
    %c0_20 = arith.constant 0 : index
    %12 = vector.load %arg15[%c0_19, %c0_20] : memref<1x128xf32, #tpu.memory_space<vmem>>, vector<1x128xf32>
    %c0_21 = arith.constant 0 : index
    %c0_22 = arith.constant 0 : index
    %13 = vector.load %arg16[%c0_21, %c0_22] : memref<32x128xf32, #tpu.memory_space<vmem>>, vector<32x128xf32>
    %c0_23 = arith.constant 0 : index
    %c0_24 = arith.constant 0 : index
    %14 = vector.load %arg17[%c0_23, %c0_24] : memref<32x128xf32, #tpu.memory_space<vmem>>, vector<32x128xf32>
    %c0_25 = arith.constant 0 : index
    %c0_26 = arith.constant 0 : index
    %15 = vector.load %arg18[%c0_25, %c0_26] : memref<1x128xf32, #tpu.memory_space<vmem>>, vector<1x128xf32>
    %c0_27 = arith.constant 0 : index
    %c0_28 = arith.constant 0 : index
    %16 = vector.load %arg19[%c0_27, %c0_28] : memref<32x128xf32, #tpu.memory_space<vmem>>, vector<32x128xf32>
    %c0_29 = arith.constant 0 : index
    %c0_30 = arith.constant 0 : index
    %17 = vector.load %arg20[%c0_29, %c0_30] : memref<1x128xf32, #tpu.memory_space<vmem>>, vector<1x128xf32>
    %c0_31 = arith.constant 0 : index
    %c0_32 = arith.constant 0 : index
    %c0_33 = arith.constant 0 : index
    %18 = vector.load %arg2[%c0_31, %c0_32, %c0_33] : memref<2x8x32xf32, #tpu.memory_space<vmem>>, vector<2x8x32xf32>
    %19 = vector.shape_cast %18 : vector<2x8x32xf32> to vector<16x32xf32>
    %cst = arith.constant dense<0.000000e+00> : vector<16x32xf32>
    %20 = tpu.matmul %19, %2, %cst {dimension_numbers = #tpu.dot_dimension_numbers<[1], [0], [0], [1], [0, 0, 1, 1], [], []>} : vector<16x32xf32>, vector<32x32xf32>, vector<16x32xf32> -> vector<16x32xf32>
    %21 = vector.broadcast %3 : vector<1x32xf32> to vector<16x32xf32>
    %22 = arith.addf %20, %21 : vector<16x32xf32>
    %23 = vector.shape_cast %22 : vector<16x32xf32> to vector<2x8x32xf32>
    %cst_34 = arith.constant dense<0.000000e+00> : vector<16x32xf32>
    %24 = tpu.matmul %19, %4, %cst_34 {dimension_numbers = #tpu.dot_dimension_numbers<[1], [0], [0], [1], [0, 0, 1, 1], [], []>} : vector<16x32xf32>, vector<32x32xf32>, vector<16x32xf32> -> vector<16x32xf32>
    %25 = vector.broadcast %5 : vector<1x32xf32> to vector<16x32xf32>
    %26 = arith.addf %24, %25 : vector<16x32xf32>
    %27 = vector.shape_cast %26 : vector<16x32xf32> to vector<2x8x32xf32>
    %c0_35 = arith.constant 0 : index
    %c0_36 = arith.constant 0 : index
    %c0_37 = arith.constant 0 : index
    %28 = vector.load %arg1[%c0_35, %c0_36, %c0_37] : memref<2x8x32xf32, #tpu.memory_space<vmem>>, vector<2x8x32xf32>
    %29 = vector.shape_cast %28 : vector<2x8x32xf32> to vector<16x32xf32>
    %cst_38 = arith.constant dense<0.000000e+00> : vector<16x128xf32>
    %30 = tpu.matmul %29, %9, %cst_38 {dimension_numbers = #tpu.dot_dimension_numbers<[1], [0], [0], [1], [0, 0, 1, 1], [], []>} : vector<16x32xf32>, vector<32x128xf32>, vector<16x128xf32> -> vector<16x128xf32>
    %31 = vector.broadcast %12 : vector<1x128xf32> to vector<16x128xf32>
    %32 = arith.addf %30, %31 : vector<16x128xf32>
    %33 = vector.shape_cast %32 : vector<16x128xf32> to vector<2x8x128xf32>
    %c0_39 = arith.constant 0 : index
    %c0_40 = arith.constant 0 : index
    %c0_41 = arith.constant 0 : index
    %34 = vector.load %arg3[%c0_39, %c0_40, %c0_41] : memref<2x2x32xf32, #tpu.memory_space<vmem>>, vector<2x2x32xf32>
    %c0_42 = arith.constant 0 : index
    %c0_43 = arith.constant 0 : index
    %c0_44 = arith.constant 0 : index
    %35 = vector.load %arg4[%c0_42, %c0_43, %c0_44] : memref<2x2x32xf32, #tpu.memory_space<vmem>>, vector<2x2x32xf32>
    %36 = vector.extract_strided_slice %34 {offsets = [0, 0, 0], sizes = [2, 1, 32], strides = [1, 1, 1]} : vector<2x2x32xf32> to vector<2x1x32xf32>
    %37 = vector.shape_cast %36 : vector<2x1x32xf32> to vector<2x32xf32>
    %38 = vector.extract_strided_slice %34 {offsets = [0, 1, 0], sizes = [2, 1, 32], strides = [1, 1, 1]} : vector<2x2x32xf32> to vector<2x1x32xf32>
    %39 = vector.shape_cast %38 : vector<2x1x32xf32> to vector<2x32xf32>
    %40 = vector.extract_strided_slice %35 {offsets = [0, 0, 0], sizes = [2, 1, 32], strides = [1, 1, 1]} : vector<2x2x32xf32> to vector<2x1x32xf32>
    %41 = vector.shape_cast %40 : vector<2x1x32xf32> to vector<2x32xf32>
    %42 = vector.extract_strided_slice %35 {offsets = [0, 1, 0], sizes = [2, 1, 32], strides = [1, 1, 1]} : vector<2x2x32xf32> to vector<2x1x32xf32>
    %43 = vector.shape_cast %42 : vector<2x1x32xf32> to vector<2x32xf32>
    %cst_45 = arith.constant dense<0.000000e+00> : vector<2x32xf32>
    %44 = tpu.matmul %39, %0, %cst_45 {dimension_numbers = #tpu.dot_dimension_numbers<[1], [0], [0], [1], [0, 0, 1, 1], [], []>} : vector<2x32xf32>, vector<32x32xf32>, vector<2x32xf32> -> vector<2x32xf32>
    %45 = vector.broadcast %1 : vector<1x32xf32> to vector<2x32xf32>
    %46 = arith.addf %44, %45 : vector<2x32xf32>
    %47 = vector.shape_cast %46 : vector<2x32xf32> to vector<2x1x32xf32>
    "tpu.trace_start"() <{level = 10 : i32, message = "bqe,bse->bqs"}> : () -> ()
    %cst_46 = arith.constant dense<0.000000e+00> : vector<2x1x8xf32>
    %48 = tpu.matmul %47, %23, %cst_46 {dimension_numbers = #tpu.dot_dimension_numbers<[2], [2], [1], [1], [0, 0, 0, 1, 1, 1], [0], [0]>} : vector<2x1x32xf32>, vector<2x8x32xf32>, vector<2x1x8xf32> -> vector<2x1x8xf32>
    "tpu.trace_stop"() : () -> ()
    %cst_47 = arith.constant 0.176776692 : f32
    %49 = vector.broadcast %cst_47 : f32 to vector<2x1x8xf32>
    %50 = arith.mulf %48, %49 : vector<2x1x8xf32>
    %cst_48 = arith.constant dense<0xFF800000> : vector<2x1xf32>
    %51 = vector.multi_reduction <maximumf>, %50, %cst_48 [2] : vector<2x1x8xf32> to vector<2x1xf32>
    %52 = vector.shape_cast %51 : vector<2x1xf32> to vector<2x1x1xf32>
    %53 = vector.broadcast %52 : vector<2x1x1xf32> to vector<2x1x8xf32>
    %54 = arith.subf %50, %53 : vector<2x1x8xf32>
    %55 = math.exp %54 : vector<2x1x8xf32>
    %cst_49 = arith.constant dense<0.000000e+00> : vector<2x1xf32>
    %56 = vector.multi_reduction <add>, %55, %cst_49 [2] : vector<2x1x8xf32> to vector<2x1xf32>
    %57 = vector.shape_cast %56 : vector<2x1xf32> to vector<2x1x1xf32>
    %58 = tpu.reciprocal %57 {approx = true} : vector<2x1x1xf32> -> vector<2x1x1xf32>
    %59 = vector.broadcast %58 : vector<2x1x1xf32> to vector<2x1x8xf32>
    %60 = arith.mulf %55, %59 : vector<2x1x8xf32>
    "tpu.trace_start"() <{level = 10 : i32, message = "bqs,bse->bqe"}> : () -> ()
    %cst_50 = arith.constant dense<0.000000e+00> : vector<2x1x32xf32>
    %61 = tpu.matmul %60, %27, %cst_50 {dimension_numbers = #tpu.dot_dimension_numbers<[2], [1], [1], [2], [0, 0, 0, 1, 1, 2], [0], [0]>} : vector<2x1x8xf32>, vector<2x8x32xf32>, vector<2x1x32xf32> -> vector<2x1x32xf32>
    "tpu.trace_stop"() : () -> ()
    %62 = vector.shape_cast %61 : vector<2x1x32xf32> to vector<2x32xf32>
    %cst_51 = arith.constant dense<0.000000e+00> : vector<2x32xf32>
    %63 = tpu.matmul %62, %6, %cst_51 {dimension_numbers = #tpu.dot_dimension_numbers<[1], [0], [0], [1], [0, 0, 1, 1], [], []>} : vector<2x32xf32>, vector<32x32xf32>, vector<2x32xf32> -> vector<2x32xf32>
    %64 = vector.broadcast %7 : vector<1x32xf32> to vector<2x32xf32>
    %65 = arith.addf %63, %64 : vector<2x32xf32>
    %66 = vector.extract_strided_slice %33 {offsets = [0, 0, 0], sizes = [2, 1, 128], strides = [1, 1, 1]} : vector<2x8x128xf32> to vector<2x1x128xf32>
    %67 = vector.shape_cast %66 : vector<2x1x128xf32> to vector<2x128xf32>
    %cst_52 = arith.constant dense<0.000000e+00> : vector<2x128xf32>
    %68 = tpu.matmul %65, %10, %cst_52 {dimension_numbers = #tpu.dot_dimension_numbers<[1], [0], [0], [1], [0, 0, 1, 1], [], []>} : vector<2x32xf32>, vector<32x128xf32>, vector<2x128xf32> -> vector<2x128xf32>
    %69 = arith.addf %67, %68 : vector<2x128xf32>
    %cst_53 = arith.constant dense<0.000000e+00> : vector<2x128xf32>
    %70 = tpu.matmul %37, %11, %cst_53 {dimension_numbers = #tpu.dot_dimension_numbers<[1], [0], [0], [1], [0, 0, 1, 1], [], []>} : vector<2x32xf32>, vector<32x128xf32>, vector<2x128xf32> -> vector<2x128xf32>
    %71 = arith.addf %69, %70 : vector<2x128xf32>
    %72 = vector.extract_strided_slice %71 {offsets = [0, 0], sizes = [2, 32], strides = [1, 1]} : vector<2x128xf32> to vector<2x32xf32>
    %73 = arith.negf %72 : vector<2x32xf32>
    %74 = math.exp %73 : vector<2x32xf32>
    %cst_54 = arith.constant 1.000000e+00 : f32
    %75 = vector.broadcast %cst_54 : f32 to vector<2x32xf32>
    %76 = arith.addf %75, %74 : vector<2x32xf32>
    %77 = arith.divf %75, %76 : vector<2x32xf32>
    %78 = vector.extract_strided_slice %71 {offsets = [0, 32], sizes = [2, 32], strides = [1, 1]} : vector<2x128xf32> to vector<2x32xf32>
    %79 = arith.negf %78 : vector<2x32xf32>
    %80 = math.exp %79 : vector<2x32xf32>
    %cst_55 = arith.constant 1.000000e+00 : f32
    %81 = vector.broadcast %cst_55 : f32 to vector<2x32xf32>
    %82 = arith.addf %81, %80 : vector<2x32xf32>
    %83 = arith.divf %81, %82 : vector<2x32xf32>
    %84 = vector.extract_strided_slice %71 {offsets = [0, 64], sizes = [2, 32], strides = [1, 1]} : vector<2x128xf32> to vector<2x32xf32>
    %85 = math.tanh %84 : vector<2x32xf32>
    %86 = vector.extract_strided_slice %71 {offsets = [0, 96], sizes = [2, 32], strides = [1, 1]} : vector<2x128xf32> to vector<2x32xf32>
    %87 = arith.negf %86 : vector<2x32xf32>
    %88 = math.exp %87 : vector<2x32xf32>
    %cst_56 = arith.constant 1.000000e+00 : f32
    %89 = vector.broadcast %cst_56 : f32 to vector<2x32xf32>
    %90 = arith.addf %89, %88 : vector<2x32xf32>
    %91 = arith.divf %89, %90 : vector<2x32xf32>
    %92 = arith.mulf %83, %41 : vector<2x32xf32>
    %93 = arith.mulf %77, %85 : vector<2x32xf32>
    %94 = arith.addf %92, %93 : vector<2x32xf32>
    %95 = math.tanh %94 : vector<2x32xf32>
    %96 = arith.mulf %91, %95 : vector<2x32xf32>
    %cst_57 = arith.constant dense<0.000000e+00> : vector<2x128xf32>
    %97 = tpu.matmul %96, %13, %cst_57 {dimension_numbers = #tpu.dot_dimension_numbers<[1], [0], [0], [1], [0, 0, 1, 1], [], []>} : vector<2x32xf32>, vector<32x128xf32>, vector<2x128xf32> -> vector<2x128xf32>
    %cst_58 = arith.constant dense<0.000000e+00> : vector<2x128xf32>
    %98 = tpu.matmul %39, %14, %cst_58 {dimension_numbers = #tpu.dot_dimension_numbers<[1], [0], [0], [1], [0, 0, 1, 1], [], []>} : vector<2x32xf32>, vector<32x128xf32>, vector<2x128xf32> -> vector<2x128xf32>
    %99 = arith.addf %97, %98 : vector<2x128xf32>
    %100 = vector.broadcast %15 : vector<1x128xf32> to vector<2x128xf32>
    %101 = arith.addf %99, %100 : vector<2x128xf32>
    %102 = vector.extract_strided_slice %101 {offsets = [0, 0], sizes = [2, 32], strides = [1, 1]} : vector<2x128xf32> to vector<2x32xf32>
    %103 = arith.negf %102 : vector<2x32xf32>
    %104 = math.exp %103 : vector<2x32xf32>
    %cst_59 = arith.constant 1.000000e+00 : f32
    %105 = vector.broadcast %cst_59 : f32 to vector<2x32xf32>
    %106 = arith.addf %105, %104 : vector<2x32xf32>
    %107 = arith.divf %105, %106 : vector<2x32xf32>
    %108 = vector.extract_strided_slice %101 {offsets = [0, 32], sizes = [2, 32], strides = [1, 1]} : vector<2x128xf32> to vector<2x32xf32>
    %109 = arith.negf %108 : vector<2x32xf32>
    %110 = math.exp %109 : vector<2x32xf32>
    %cst_60 = arith.constant 1.000000e+00 : f32
    %111 = vector.broadcast %cst_60 : f32 to vector<2x32xf32>
    %112 = arith.addf %111, %110 : vector<2x32xf32>
    %113 = arith.divf %111, %112 : vector<2x32xf32>
    %114 = vector.extract_strided_slice %101 {offsets = [0, 64], sizes = [2, 32], strides = [1, 1]} : vector<2x128xf32> to vector<2x32xf32>
    %115 = math.tanh %114 : vector<2x32xf32>
    %116 = vector.extract_strided_slice %101 {offsets = [0, 96], sizes = [2, 32], strides = [1, 1]} : vector<2x128xf32> to vector<2x32xf32>
    %117 = arith.negf %116 : vector<2x32xf32>
    %118 = math.exp %117 : vector<2x32xf32>
    %cst_61 = arith.constant 1.000000e+00 : f32
    %119 = vector.broadcast %cst_61 : f32 to vector<2x32xf32>
    %120 = arith.addf %119, %118 : vector<2x32xf32>
    %121 = arith.divf %119, %120 : vector<2x32xf32>
    %122 = arith.mulf %113, %43 : vector<2x32xf32>
    %123 = arith.mulf %107, %115 : vector<2x32xf32>
    %124 = arith.addf %122, %123 : vector<2x32xf32>
    %125 = math.tanh %124 : vector<2x32xf32>
    %126 = arith.mulf %121, %125 : vector<2x32xf32>
    %c0_62 = arith.constant 0 : index
    %c0_63 = arith.constant 0 : index
    %c0_64 = arith.constant 0 : index
    %127 = vector.load %arg24[%c0_62, %c0_63, %c0_64] : memref<2x8x32xf32, #tpu.memory_space<vmem>>, vector<2x1x32xf32>
    %128 = vector.shape_cast %127 : vector<2x1x32xf32> to vector<2x32xf32>
    %129 = vector.shape_cast %126 : vector<2x32xf32> to vector<2x1x32xf32>
    tpu.vector_store %arg24[%c0_62, %c0_63, %c0_64], %129 {strides = array<i32>} : memref<2x8x32xf32, #tpu.memory_space<vmem>>, vector<2x1x32xf32>,
    %cst_65 = arith.constant dense<0.000000e+00> : vector<2x32xf32>
    %130 = tpu.matmul %126, %0, %cst_65 {dimension_numbers = #tpu.dot_dimension_numbers<[1], [0], [0], [1], [0, 0, 1, 1], [], []>} : vector<2x32xf32>, vector<32x32xf32>, vector<2x32xf32> -> vector<2x32xf32>
    %131 = vector.broadcast %1 : vector<1x32xf32> to vector<2x32xf32>
    %132 = arith.addf %130, %131 : vector<2x32xf32>
    %133 = vector.shape_cast %132 : vector<2x32xf32> to vector<2x1x32xf32>
    "tpu.trace_start"() <{level = 10 : i32, message = "bqe,bse->bqs"}> : () -> ()
    %cst_66 = arith.constant dense<0.000000e+00> : vector<2x1x8xf32>
    %134 = tpu.matmul %133, %23, %cst_66 {dimension_numbers = #tpu.dot_dimension_numbers<[2], [2], [1], [1], [0, 0, 0, 1, 1, 1], [0], [0]>} : vector<2x1x32xf32>, vector<2x8x32xf32>, vector<2x1x8xf32> -> vector<2x1x8xf32>
    "tpu.trace_stop"() : () -> ()
    %cst_67 = arith.constant 0.176776692 : f32
    %135 = vector.broadcast %cst_67 : f32 to vector<2x1x8xf32>
    %136 = arith.mulf %134, %135 : vector<2x1x8xf32>
    %cst_68 = arith.constant dense<0xFF800000> : vector<2x1xf32>
    %137 = vector.multi_reduction <maximumf>, %136, %cst_68 [2] : vector<2x1x8xf32> to vector<2x1xf32>
    %138 = vector.shape_cast %137 : vector<2x1xf32> to vector<2x1x1xf32>
    %139 = vector.broadcast %138 : vector<2x1x1xf32> to vector<2x1x8xf32>
    %140 = arith.subf %136, %139 : vector<2x1x8xf32>
    %141 = math.exp %140 : vector<2x1x8xf32>
    %cst_69 = arith.constant dense<0.000000e+00> : vector<2x1xf32>
    %142 = vector.multi_reduction <add>, %141, %cst_69 [2] : vector<2x1x8xf32> to vector<2x1xf32>
    %143 = vector.shape_cast %142 : vector<2x1xf32> to vector<2x1x1xf32>
    %144 = tpu.reciprocal %143 {approx = true} : vector<2x1x1xf32> -> vector<2x1x1xf32>
    %145 = vector.broadcast %144 : vector<2x1x1xf32> to vector<2x1x8xf32>
    %146 = arith.mulf %141, %145 : vector<2x1x8xf32>
    "tpu.trace_start"() <{level = 10 : i32, message = "bqs,bse->bqe"}> : () -> ()
    %cst_70 = arith.constant dense<0.000000e+00> : vector<2x1x32xf32>
    %147 = tpu.matmul %146, %27, %cst_70 {dimension_numbers = #tpu.dot_dimension_numbers<[2], [1], [1], [2], [0, 0, 0, 1, 1, 2], [0], [0]>} : vector<2x1x8xf32>, vector<2x8x32xf32>, vector<2x1x32xf32> -> vector<2x1x32xf32>
    "tpu.trace_stop"() : () -> ()
    %148 = vector.shape_cast %147 : vector<2x1x32xf32> to vector<2x32xf32>
    %cst_71 = arith.constant dense<0.000000e+00> : vector<2x32xf32>
    %149 = tpu.matmul %148, %6, %cst_71 {dimension_numbers = #tpu.dot_dimension_numbers<[1], [0], [0], [1], [0, 0, 1, 1], [], []>} : vector<2x32xf32>, vector<32x32xf32>, vector<2x32xf32> -> vector<2x32xf32>
    %150 = vector.broadcast %7 : vector<1x32xf32> to vector<2x32xf32>
    %151 = arith.addf %149, %150 : vector<2x32xf32>
    %152 = vector.extract_strided_slice %33 {offsets = [0, 1, 0], sizes = [2, 1, 128], strides = [1, 1, 1]} : vector<2x8x128xf32> to vector<2x1x128xf32>
    %153 = vector.shape_cast %152 : vector<2x1x128xf32> to vector<2x128xf32>
    %cst_72 = arith.constant dense<0.000000e+00> : vector<2x128xf32>
    %154 = tpu.matmul %151, %10, %cst_72 {dimension_numbers = #tpu.dot_dimension_numbers<[1], [0], [0], [1], [0, 0, 1, 1], [], []>} : vector<2x32xf32>, vector<32x128xf32>, vector<2x128xf32> -> vector<2x128xf32>
    %155 = arith.addf %153, %154 : vector<2x128xf32>
    %cst_73 = arith.constant dense<0.000000e+00> : vector<2x128xf32>
    %156 = tpu.matmul %96, %11, %cst_73 {dimension_numbers = #tpu.dot_dimension_numbers<[1], [0], [0], [1], [0, 0, 1, 1], [], []>} : vector<2x32xf32>, vector<32x128xf32>, vector<2x128xf32> -> vector<2x128xf32>
    %157 = arith.addf %155, %156 : vector<2x128xf32>
    %158 = vector.extract_strided_slice %157 {offsets = [0, 0], sizes = [2, 32], strides = [1, 1]} : vector<2x128xf32> to vector<2x32xf32>
    %159 = arith.negf %158 : vector<2x32xf32>
    %160 = math.exp %159 : vector<2x32xf32>
    %cst_74 = arith.constant 1.000000e+00 : f32
    %161 = vector.broadcast %cst_74 : f32 to vector<2x32xf32>
    %162 = arith.addf %161, %160 : vector<2x32xf32>
    %163 = arith.divf %161, %162 : vector<2x32xf32>
    %164 = vector.extract_strided_slice %157 {offsets = [0, 32], sizes = [2, 32], strides = [1, 1]} : vector<2x128xf32> to vector<2x32xf32>
    %165 = arith.negf %164 : vector<2x32xf32>
    %166 = math.exp %165 : vector<2x32xf32>
    %cst_75 = arith.constant 1.000000e+00 : f32
    %167 = vector.broadcast %cst_75 : f32 to vector<2x32xf32>
    %168 = arith.addf %167, %166 : vector<2x32xf32>
    %169 = arith.divf %167, %168 : vector<2x32xf32>
    %170 = vector.extract_strided_slice %157 {offsets = [0, 64], sizes = [2, 32], strides = [1, 1]} : vector<2x128xf32> to vector<2x32xf32>
    %171 = math.tanh %170 : vector<2x32xf32>
    %172 = vector.extract_strided_slice %157 {offsets = [0, 96], sizes = [2, 32], strides = [1, 1]} : vector<2x128xf32> to vector<2x32xf32>
    %173 = arith.negf %172 : vector<2x32xf32>
    %174 = math.exp %173 : vector<2x32xf32>
    %cst_76 = arith.constant 1.000000e+00 : f32
    %175 = vector.broadcast %cst_76 : f32 to vector<2x32xf32>
    %176 = arith.addf %175, %174 : vector<2x32xf32>
    %177 = arith.divf %175, %176 : vector<2x32xf32>
    %178 = arith.mulf %169, %94 : vector<2x32xf32>
    %179 = arith.mulf %163, %171 : vector<2x32xf32>
    %180 = arith.addf %178, %179 : vector<2x32xf32>
    %181 = math.tanh %180 : vector<2x32xf32>
    %182 = arith.mulf %177, %181 : vector<2x32xf32>
    %cst_77 = arith.constant dense<0.000000e+00> : vector<2x128xf32>
    %183 = tpu.matmul %182, %13, %cst_77 {dimension_numbers = #tpu.dot_dimension_numbers<[1], [0], [0], [1], [0, 0, 1, 1], [], []>} : vector<2x32xf32>, vector<32x128xf32>, vector<2x128xf32> -> vector<2x128xf32>
    %cst_78 = arith.constant dense<0.000000e+00> : vector<2x128xf32>
    %184 = tpu.matmul %126, %14, %cst_78 {dimension_numbers = #tpu.dot_dimension_numbers<[1], [0], [0], [1], [0, 0, 1, 1], [], []>} : vector<2x32xf32>, vector<32x128xf32>, vector<2x128xf32> -> vector<2x128xf32>
    %185 = arith.addf %183, %184 : vector<2x128xf32>
    %186 = vector.broadcast %15 : vector<1x128xf32> to vector<2x128xf32>
    %187 = arith.addf %185, %186 : vector<2x128xf32>
    %188 = vector.extract_strided_slice %187 {offsets = [0, 0], sizes = [2, 32], strides = [1, 1]} : vector<2x128xf32> to vector<2x32xf32>
    %189 = arith.negf %188 : vector<2x32xf32>
    %190 = math.exp %189 : vector<2x32xf32>
    %cst_79 = arith.constant 1.000000e+00 : f32
    %191 = vector.broadcast %cst_79 : f32 to vector<2x32xf32>
    %192 = arith.addf %191, %190 : vector<2x32xf32>
    %193 = arith.divf %191, %192 : vector<2x32xf32>
    %194 = vector.extract_strided_slice %187 {offsets = [0, 32], sizes = [2, 32], strides = [1, 1]} : vector<2x128xf32> to vector<2x32xf32>
    %195 = arith.negf %194 : vector<2x32xf32>
    %196 = math.exp %195 : vector<2x32xf32>
    %cst_80 = arith.constant 1.000000e+00 : f32
    %197 = vector.broadcast %cst_80 : f32 to vector<2x32xf32>
    %198 = arith.addf %197, %196 : vector<2x32xf32>
    %199 = arith.divf %197, %198 : vector<2x32xf32>
    %200 = vector.extract_strided_slice %187 {offsets = [0, 64], sizes = [2, 32], strides = [1, 1]} : vector<2x128xf32> to vector<2x32xf32>
    %201 = math.tanh %200 : vector<2x32xf32>
    %202 = vector.extract_strided_slice %187 {offsets = [0, 96], sizes = [2, 32], strides = [1, 1]} : vector<2x128xf32> to vector<2x32xf32>
    %203 = arith.negf %202 : vector<2x32xf32>
    %204 = math.exp %203 : vector<2x32xf32>
    %cst_81 = arith.constant 1.000000e+00 : f32
    %205 = vector.broadcast %cst_81 : f32 to vector<2x32xf32>
    %206 = arith.addf %205, %204 : vector<2x32xf32>
    %207 = arith.divf %205, %206 : vector<2x32xf32>
    %208 = arith.mulf %199, %124 : vector<2x32xf32>
    %209 = arith.mulf %193, %201 : vector<2x32xf32>
    %210 = arith.addf %208, %209 : vector<2x32xf32>
    %211 = math.tanh %210 : vector<2x32xf32>
    %212 = arith.mulf %207, %211 : vector<2x32xf32>
    %c0_82 = arith.constant 0 : index
    %c1 = arith.constant 1 : index
    %c0_83 = arith.constant 0 : index
    %213 = vector.load %arg24[%c0_82, %c1, %c0_83] : memref<2x8x32xf32, #tpu.memory_space<vmem>>, vector<2x1x32xf32>
    %214 = vector.shape_cast %213 : vector<2x1x32xf32> to vector<2x32xf32>
    %215 = vector.shape_cast %212 : vector<2x32xf32> to vector<2x1x32xf32>
    tpu.vector_store %arg24[%c0_82, %c1, %c0_83], %215 {strides = array<i32>} : memref<2x8x32xf32, #tpu.memory_space<vmem>>, vector<2x1x32xf32>,
    %cst_84 = arith.constant dense<0.000000e+00> : vector<2x32xf32>
    %216 = tpu.matmul %212, %0, %cst_84 {dimension_numbers = #tpu.dot_dimension_numbers<[1], [0], [0], [1], [0, 0, 1, 1], [], []>} : vector<2x32xf32>, vector<32x32xf32>, vector<2x32xf32> -> vector<2x32xf32>
    %217 = vector.broadcast %1 : vector<1x32xf32> to vector<2x32xf32>
    %218 = arith.addf %216, %217 : vector<2x32xf32>
    %219 = vector.shape_cast %218 : vector<2x32xf32> to vector<2x1x32xf32>
    "tpu.trace_start"() <{level = 10 : i32, message = "bqe,bse->bqs"}> : () -> ()
    %cst_85 = arith.constant dense<0.000000e+00> : vector<2x1x8xf32>
    %220 = tpu.matmul %219, %23, %cst_85 {dimension_numbers = #tpu.dot_dimension_numbers<[2], [2], [1], [1], [0, 0, 0, 1, 1, 1], [0], [0]>} : vector<2x1x32xf32>, vector<2x8x32xf32>, vector<2x1x8xf32> -> vector<2x1x8xf32>
    "tpu.trace_stop"() : () -> ()
    %cst_86 = arith.constant 0.176776692 : f32
    %221 = vector.broadcast %cst_86 : f32 to vector<2x1x8xf32>
    %222 = arith.mulf %220, %221 : vector<2x1x8xf32>
    %cst_87 = arith.constant dense<0xFF800000> : vector<2x1xf32>
    %223 = vector.multi_reduction <maximumf>, %222, %cst_87 [2] : vector<2x1x8xf32> to vector<2x1xf32>
    %224 = vector.shape_cast %223 : vector<2x1xf32> to vector<2x1x1xf32>
    %225 = vector.broadcast %224 : vector<2x1x1xf32> to vector<2x1x8xf32>
    %226 = arith.subf %222, %225 : vector<2x1x8xf32>
    %227 = math.exp %226 : vector<2x1x8xf32>
    %cst_88 = arith.constant dense<0.000000e+00> : vector<2x1xf32>
    %228 = vector.multi_reduction <add>, %227, %cst_88 [2] : vector<2x1x8xf32> to vector<2x1xf32>
    %229 = vector.shape_cast %228 : vector<2x1xf32> to vector<2x1x1xf32>
    %230 = tpu.reciprocal %229 {approx = true} : vector<2x1x1xf32> -> vector<2x1x1xf32>
    %231 = vector.broadcast %230 : vector<2x1x1xf32> to vector<2x1x8xf32>
    %232 = arith.mulf %227, %231 : vector<2x1x8xf32>
    "tpu.trace_start"() <{level = 10 : i32, message = "bqs,bse->bqe"}> : () -> ()
    %cst_89 = arith.constant dense<0.000000e+00> : vector<2x1x32xf32>
    %233 = tpu.matmul %232, %27, %cst_89 {dimension_numbers = #tpu.dot_dimension_numbers<[2], [1], [1], [2], [0, 0, 0, 1, 1, 2], [0], [0]>} : vector<2x1x8xf32>, vector<2x8x32xf32>, vector<2x1x32xf32> -> vector<2x1x32xf32>
    "tpu.trace_stop"() : () -> ()
    %234 = vector.shape_cast %233 : vector<2x1x32xf32> to vector<2x32xf32>
    %cst_90 = arith.constant dense<0.000000e+00> : vector<2x32xf32>
    %235 = tpu.matmul %234, %6, %cst_90 {dimension_numbers = #tpu.dot_dimension_numbers<[1], [0], [0], [1], [0, 0, 1, 1], [], []>} : vector<2x32xf32>, vector<32x32xf32>, vector<2x32xf32> -> vector<2x32xf32>
    %236 = vector.broadcast %7 : vector<1x32xf32> to vector<2x32xf32>
    %237 = arith.addf %235, %236 : vector<2x32xf32>
    %238 = vector.extract_strided_slice %33 {offsets = [0, 2, 0], sizes = [2, 1, 128], strides = [1, 1, 1]} : vector<2x8x128xf32> to vector<2x1x128xf32>
    %239 = vector.shape_cast %238 : vector<2x1x128xf32> to vector<2x128xf32>
    %cst_91 = arith.constant dense<0.000000e+00> : vector<2x128xf32>
    %240 = tpu.matmul %237, %10, %cst_91 {dimension_numbers = #tpu.dot_dimension_numbers<[1], [0], [0], [1], [0, 0, 1, 1], [], []>} : vector<2x32xf32>, vector<32x128xf32>, vector<2x128xf32> -> vector<2x128xf32>
    %241 = arith.addf %239, %240 : vector<2x128xf32>
    %cst_92 = arith.constant dense<0.000000e+00> : vector<2x128xf32>
    %242 = tpu.matmul %182, %11, %cst_92 {dimension_numbers = #tpu.dot_dimension_numbers<[1], [0], [0], [1], [0, 0, 1, 1], [], []>} : vector<2x32xf32>, vector<32x128xf32>, vector<2x128xf32> -> vector<2x128xf32>
    %243 = arith.addf %241, %242 : vector<2x128xf32>
    %244 = vector.extract_strided_slice %243 {offsets = [0, 0], sizes = [2, 32], strides = [1, 1]} : vector<2x128xf32> to vector<2x32xf32>
    %245 = arith.negf %244 : vector<2x32xf32>
    %246 = math.exp %245 : vector<2x32xf32>
    %cst_93 = arith.constant 1.000000e+00 : f32
    %247 = vector.broadcast %cst_93 : f32 to vector<2x32xf32>
    %248 = arith.addf %247, %246 : vector<2x32xf32>
    %249 = arith.divf %247, %248 : vector<2x32xf32>
    %250 = vector.extract_strided_slice %243 {offsets = [0, 32], sizes = [2, 32], strides = [1, 1]} : vector<2x128xf32> to vector<2x32xf32>
    %251 = arith.negf %250 : vector<2x32xf32>
    %252 = math.exp %251 : vector<2x32xf32>
    %cst_94 = arith.constant 1.000000e+00 : f32
    %253 = vector.broadcast %cst_94 : f32 to vector<2x32xf32>
    %254 = arith.addf %253, %252 : vector<2x32xf32>
    %255 = arith.divf %253, %254 : vector<2x32xf32>
    %256 = vector.extract_strided_slice %243 {offsets = [0, 64], sizes = [2, 32], strides = [1, 1]} : vector<2x128xf32> to vector<2x32xf32>
    %257 = math.tanh %256 : vector<2x32xf32>
    %258 = vector.extract_strided_slice %243 {offsets = [0, 96], sizes = [2, 32], strides = [1, 1]} : vector<2x128xf32> to vector<2x32xf32>
    %259 = arith.negf %258 : vector<2x32xf32>
    %260 = math.exp %259 : vector<2x32xf32>
    %cst_95 = arith.constant 1.000000e+00 : f32
    %261 = vector.broadcast %cst_95 : f32 to vector<2x32xf32>
    %262 = arith.addf %261, %260 : vector<2x32xf32>
    %263 = arith.divf %261, %262 : vector<2x32xf32>
    %264 = arith.mulf %255, %180 : vector<2x32xf32>
    %265 = arith.mulf %249, %257 : vector<2x32xf32>
    %266 = arith.addf %264, %265 : vector<2x32xf32>
    %267 = math.tanh %266 : vector<2x32xf32>
    %268 = arith.mulf %263, %267 : vector<2x32xf32>
    %cst_96 = arith.constant dense<0.000000e+00> : vector<2x128xf32>
    %269 = tpu.matmul %268, %13, %cst_96 {dimension_numbers = #tpu.dot_dimension_numbers<[1], [0], [0], [1], [0, 0, 1, 1], [], []>} : vector<2x32xf32>, vector<32x128xf32>, vector<2x128xf32> -> vector<2x128xf32>
    %cst_97 = arith.constant dense<0.000000e+00> : vector<2x128xf32>
    %270 = tpu.matmul %212, %14, %cst_97 {dimension_numbers = #tpu.dot_dimension_numbers<[1], [0], [0], [1], [0, 0, 1, 1], [], []>} : vector<2x32xf32>, vector<32x128xf32>, vector<2x128xf32> -> vector<2x128xf32>
    %271 = arith.addf %269, %270 : vector<2x128xf32>
    %272 = vector.broadcast %15 : vector<1x128xf32> to vector<2x128xf32>
    %273 = arith.addf %271, %272 : vector<2x128xf32>
    %274 = vector.extract_strided_slice %273 {offsets = [0, 0], sizes = [2, 32], strides = [1, 1]} : vector<2x128xf32> to vector<2x32xf32>
    %275 = arith.negf %274 : vector<2x32xf32>
    %276 = math.exp %275 : vector<2x32xf32>
    %cst_98 = arith.constant 1.000000e+00 : f32
    %277 = vector.broadcast %cst_98 : f32 to vector<2x32xf32>
    %278 = arith.addf %277, %276 : vector<2x32xf32>
    %279 = arith.divf %277, %278 : vector<2x32xf32>
    %280 = vector.extract_strided_slice %273 {offsets = [0, 32], sizes = [2, 32], strides = [1, 1]} : vector<2x128xf32> to vector<2x32xf32>
    %281 = arith.negf %280 : vector<2x32xf32>
    %282 = math.exp %281 : vector<2x32xf32>
    %cst_99 = arith.constant 1.000000e+00 : f32
    %283 = vector.broadcast %cst_99 : f32 to vector<2x32xf32>
    %284 = arith.addf %283, %282 : vector<2x32xf32>
    %285 = arith.divf %283, %284 : vector<2x32xf32>
    %286 = vector.extract_strided_slice %273 {offsets = [0, 64], sizes = [2, 32], strides = [1, 1]} : vector<2x128xf32> to vector<2x32xf32>
    %287 = math.tanh %286 : vector<2x32xf32>
    %288 = vector.extract_strided_slice %273 {offsets = [0, 96], sizes = [2, 32], strides = [1, 1]} : vector<2x128xf32> to vector<2x32xf32>
    %289 = arith.negf %288 : vector<2x32xf32>
    %290 = math.exp %289 : vector<2x32xf32>
    %cst_100 = arith.constant 1.000000e+00 : f32
    %291 = vector.broadcast %cst_100 : f32 to vector<2x32xf32>
    %292 = arith.addf %291, %290 : vector<2x32xf32>
    %293 = arith.divf %291, %292 : vector<2x32xf32>
    %294 = arith.mulf %285, %210 : vector<2x32xf32>
    %295 = arith.mulf %279, %287 : vector<2x32xf32>
    %296 = arith.addf %294, %295 : vector<2x32xf32>
    %297 = math.tanh %296 : vector<2x32xf32>
    %298 = arith.mulf %293, %297 : vector<2x32xf32>
    %c0_101 = arith.constant 0 : index
    %c2 = arith.constant 2 : index
    %c0_102 = arith.constant 0 : index
    %299 = vector.load %arg24[%c0_101, %c2, %c0_102] : memref<2x8x32xf32, #tpu.memory_space<vmem>>, vector<2x1x32xf32>
    %300 = vector.shape_cast %299 : vector<2x1x32xf32> to vector<2x32xf32>
    %301 = vector.shape_cast %298 : vector<2x32xf32> to vector<2x1x32xf32>
    tpu.vector_store %arg24[%c0_101, %c2, %c0_102], %301 {strides = array<i32>} : memref<2x8x32xf32, #tpu.memory_space<vmem>>, vector<2x1x32xf32>,
    %cst_103 = arith.constant dense<0.000000e+00> : vector<2x32xf32>
    %302 = tpu.matmul %298, %0, %cst_103 {dimension_numbers = #tpu.dot_dimension_numbers<[1], [0], [0], [1], [0, 0, 1, 1], [], []>} : vector<2x32xf32>, vector<32x32xf32>, vector<2x32xf32> -> vector<2x32xf32>
    %303 = vector.broadcast %1 : vector<1x32xf32> to vector<2x32xf32>
    %304 = arith.addf %302, %303 : vector<2x32xf32>
    %305 = vector.shape_cast %304 : vector<2x32xf32> to vector<2x1x32xf32>
    "tpu.trace_start"() <{level = 10 : i32, message = "bqe,bse->bqs"}> : () -> ()
    %cst_104 = arith.constant dense<0.000000e+00> : vector<2x1x8xf32>
    %306 = tpu.matmul %305, %23, %cst_104 {dimension_numbers = #tpu.dot_dimension_numbers<[2], [2], [1], [1], [0, 0, 0, 1, 1, 1], [0], [0]>} : vector<2x1x32xf32>, vector<2x8x32xf32>, vector<2x1x8xf32> -> vector<2x1x8xf32>
    "tpu.trace_stop"() : () -> ()
    %cst_105 = arith.constant 0.176776692 : f32
    %307 = vector.broadcast %cst_105 : f32 to vector<2x1x8xf32>
    %308 = arith.mulf %306, %307 : vector<2x1x8xf32>
    %cst_106 = arith.constant dense<0xFF800000> : vector<2x1xf32>
    %309 = vector.multi_reduction <maximumf>, %308, %cst_106 [2] : vector<2x1x8xf32> to vector<2x1xf32>
    %310 = vector.shape_cast %309 : vector<2x1xf32> to vector<2x1x1xf32>
    %311 = vector.broadcast %310 : vector<2x1x1xf32> to vector<2x1x8xf32>
    %312 = arith.subf %308, %311 : vector<2x1x8xf32>
    %313 = math.exp %312 : vector<2x1x8xf32>
    %cst_107 = arith.constant dense<0.000000e+00> : vector<2x1xf32>
    %314 = vector.multi_reduction <add>, %313, %cst_107 [2] : vector<2x1x8xf32> to vector<2x1xf32>
    %315 = vector.shape_cast %314 : vector<2x1xf32> to vector<2x1x1xf32>
    %316 = tpu.reciprocal %315 {approx = true} : vector<2x1x1xf32> -> vector<2x1x1xf32>
    %317 = vector.broadcast %316 : vector<2x1x1xf32> to vector<2x1x8xf32>
    %318 = arith.mulf %313, %317 : vector<2x1x8xf32>
    "tpu.trace_start"() <{level = 10 : i32, message = "bqs,bse->bqe"}> : () -> ()
    %cst_108 = arith.constant dense<0.000000e+00> : vector<2x1x32xf32>
    %319 = tpu.matmul %318, %27, %cst_108 {dimension_numbers = #tpu.dot_dimension_numbers<[2], [1], [1], [2], [0, 0, 0, 1, 1, 2], [0], [0]>} : vector<2x1x8xf32>, vector<2x8x32xf32>, vector<2x1x32xf32> -> vector<2x1x32xf32>
    "tpu.trace_stop"() : () -> ()
    %320 = vector.shape_cast %319 : vector<2x1x32xf32> to vector<2x32xf32>
    %cst_109 = arith.constant dense<0.000000e+00> : vector<2x32xf32>
    %321 = tpu.matmul %320, %6, %cst_109 {dimension_numbers = #tpu.dot_dimension_numbers<[1], [0], [0], [1], [0, 0, 1, 1], [], []>} : vector<2x32xf32>, vector<32x32xf32>, vector<2x32xf32> -> vector<2x32xf32>
    %322 = vector.broadcast %7 : vector<1x32xf32> to vector<2x32xf32>
    %323 = arith.addf %321, %322 : vector<2x32xf32>
    %324 = vector.extract_strided_slice %33 {offsets = [0, 3, 0], sizes = [2, 1, 128], strides = [1, 1, 1]} : vector<2x8x128xf32> to vector<2x1x128xf32>
    %325 = vector.shape_cast %324 : vector<2x1x128xf32> to vector<2x128xf32>
    %cst_110 = arith.constant dense<0.000000e+00> : vector<2x128xf32>
    %326 = tpu.matmul %323, %10, %cst_110 {dimension_numbers = #tpu.dot_dimension_numbers<[1], [0], [0], [1], [0, 0, 1, 1], [], []>} : vector<2x32xf32>, vector<32x128xf32>, vector<2x128xf32> -> vector<2x128xf32>
    %327 = arith.addf %325, %326 : vector<2x128xf32>
    %cst_111 = arith.constant dense<0.000000e+00> : vector<2x128xf32>
    %328 = tpu.matmul %268, %11, %cst_111 {dimension_numbers = #tpu.dot_dimension_numbers<[1], [0], [0], [1], [0, 0, 1, 1], [], []>} : vector<2x32xf32>, vector<32x128xf32>, vector<2x128xf32> -> vector<2x128xf32>
    %329 = arith.addf %327, %328 : vector<2x128xf32>
    %330 = vector.extract_strided_slice %329 {offsets = [0, 0], sizes = [2, 32], strides = [1, 1]} : vector<2x128xf32> to vector<2x32xf32>
    %331 = arith.negf %330 : vector<2x32xf32>
    %332 = math.exp %331 : vector<2x32xf32>
    %cst_112 = arith.constant 1.000000e+00 : f32
    %333 = vector.broadcast %cst_112 : f32 to vector<2x32xf32>
    %334 = arith.addf %333, %332 : vector<2x32xf32>
    %335 = arith.divf %333, %334 : vector<2x32xf32>
    %336 = vector.extract_strided_slice %329 {offsets = [0, 32], sizes = [2, 32], strides = [1, 1]} : vector<2x128xf32> to vector<2x32xf32>
    %337 = arith.negf %336 : vector<2x32xf32>
    %338 = math.exp %337 : vector<2x32xf32>
    %cst_113 = arith.constant 1.000000e+00 : f32
    %339 = vector.broadcast %cst_113 : f32 to vector<2x32xf32>
    %340 = arith.addf %339, %338 : vector<2x32xf32>
    %341 = arith.divf %339, %340 : vector<2x32xf32>
    %342 = vector.extract_strided_slice %329 {offsets = [0, 64], sizes = [2, 32], strides = [1, 1]} : vector<2x128xf32> to vector<2x32xf32>
    %343 = math.tanh %342 : vector<2x32xf32>
    %344 = vector.extract_strided_slice %329 {offsets = [0, 96], sizes = [2, 32], strides = [1, 1]} : vector<2x128xf32> to vector<2x32xf32>
    %345 = arith.negf %344 : vector<2x32xf32>
    %346 = math.exp %345 : vector<2x32xf32>
    %cst_114 = arith.constant 1.000000e+00 : f32
    %347 = vector.broadcast %cst_114 : f32 to vector<2x32xf32>
    %348 = arith.addf %347, %346 : vector<2x32xf32>
    %349 = arith.divf %347, %348 : vector<2x32xf32>
    %350 = arith.mulf %341, %266 : vector<2x32xf32>
    %351 = arith.mulf %335, %343 : vector<2x32xf32>
    %352 = arith.addf %350, %351 : vector<2x32xf32>
    %353 = math.tanh %352 : vector<2x32xf32>
    %354 = arith.mulf %349, %353 : vector<2x32xf32>
    %cst_115 = arith.constant dense<0.000000e+00> : vector<2x128xf32>
    %355 = tpu.matmul %354, %13, %cst_115 {dimension_numbers = #tpu.dot_dimension_numbers<[1], [0], [0], [1], [0, 0, 1, 1], [], []>} : vector<2x32xf32>, vector<32x128xf32>, vector<2x128xf32> -> vector<2x128xf32>
    %cst_116 = arith.constant dense<0.000000e+00> : vector<2x128xf32>
    %356 = tpu.matmul %298, %14, %cst_116 {dimension_numbers = #tpu.dot_dimension_numbers<[1], [0], [0], [1], [0, 0, 1, 1], [], []>} : vector<2x32xf32>, vector<32x128xf32>, vector<2x128xf32> -> vector<2x128xf32>
    %357 = arith.addf %355, %356 : vector<2x128xf32>
    %358 = vector.broadcast %15 : vector<1x128xf32> to vector<2x128xf32>
    %359 = arith.addf %357, %358 : vector<2x128xf32>
    %360 = vector.extract_strided_slice %359 {offsets = [0, 0], sizes = [2, 32], strides = [1, 1]} : vector<2x128xf32> to vector<2x32xf32>
    %361 = arith.negf %360 : vector<2x32xf32>
    %362 = math.exp %361 : vector<2x32xf32>
    %cst_117 = arith.constant 1.000000e+00 : f32
    %363 = vector.broadcast %cst_117 : f32 to vector<2x32xf32>
    %364 = arith.addf %363, %362 : vector<2x32xf32>
    %365 = arith.divf %363, %364 : vector<2x32xf32>
    %366 = vector.extract_strided_slice %359 {offsets = [0, 32], sizes = [2, 32], strides = [1, 1]} : vector<2x128xf32> to vector<2x32xf32>
    %367 = arith.negf %366 : vector<2x32xf32>
    %368 = math.exp %367 : vector<2x32xf32>
    %cst_118 = arith.constant 1.000000e+00 : f32
    %369 = vector.broadcast %cst_118 : f32 to vector<2x32xf32>
    %370 = arith.addf %369, %368 : vector<2x32xf32>
    %371 = arith.divf %369, %370 : vector<2x32xf32>
    %372 = vector.extract_strided_slice %359 {offsets = [0, 64], sizes = [2, 32], strides = [1, 1]} : vector<2x128xf32> to vector<2x32xf32>
    %373 = math.tanh %372 : vector<2x32xf32>
    %374 = vector.extract_strided_slice %359 {offsets = [0, 96], sizes = [2, 32], strides = [1, 1]} : vector<2x128xf32> to vector<2x32xf32>
    %375 = arith.negf %374 : vector<2x32xf32>
    %376 = math.exp %375 : vector<2x32xf32>
    %cst_119 = arith.constant 1.000000e+00 : f32
    %377 = vector.broadcast %cst_119 : f32 to vector<2x32xf32>
    %378 = arith.addf %377, %376 : vector<2x32xf32>
    %379 = arith.divf %377, %378 : vector<2x32xf32>
    %380 = arith.mulf %371, %296 : vector<2x32xf32>
    %381 = arith.mulf %365, %373 : vector<2x32xf32>
    %382 = arith.addf %380, %381 : vector<2x32xf32>
    %383 = math.tanh %382 : vector<2x32xf32>
    %384 = arith.mulf %379, %383 : vector<2x32xf32>
    %c0_120 = arith.constant 0 : index
    %c3 = arith.constant 3 : index
    %c0_121 = arith.constant 0 : index
    %385 = vector.load %arg24[%c0_120, %c3, %c0_121] : memref<2x8x32xf32, #tpu.memory_space<vmem>>, vector<2x1x32xf32>
    %386 = vector.shape_cast %385 : vector<2x1x32xf32> to vector<2x32xf32>
    %387 = vector.shape_cast %384 : vector<2x32xf32> to vector<2x1x32xf32>
    tpu.vector_store %arg24[%c0_120, %c3, %c0_121], %387 {strides = array<i32>} : memref<2x8x32xf32, #tpu.memory_space<vmem>>, vector<2x1x32xf32>,
    %cst_122 = arith.constant dense<0.000000e+00> : vector<2x32xf32>
    %388 = tpu.matmul %384, %0, %cst_122 {dimension_numbers = #tpu.dot_dimension_numbers<[1], [0], [0], [1], [0, 0, 1, 1], [], []>} : vector<2x32xf32>, vector<32x32xf32>, vector<2x32xf32> -> vector<2x32xf32>
    %389 = vector.broadcast %1 : vector<1x32xf32> to vector<2x32xf32>
    %390 = arith.addf %388, %389 : vector<2x32xf32>
    %391 = vector.shape_cast %390 : vector<2x32xf32> to vector<2x1x32xf32>
    "tpu.trace_start"() <{level = 10 : i32, message = "bqe,bse->bqs"}> : () -> ()
    %cst_123 = arith.constant dense<0.000000e+00> : vector<2x1x8xf32>
    %392 = tpu.matmul %391, %23, %cst_123 {dimension_numbers = #tpu.dot_dimension_numbers<[2], [2], [1], [1], [0, 0, 0, 1, 1, 1], [0], [0]>} : vector<2x1x32xf32>, vector<2x8x32xf32>, vector<2x1x8xf32> -> vector<2x1x8xf32>
    "tpu.trace_stop"() : () -> ()
    %cst_124 = arith.constant 0.176776692 : f32
    %393 = vector.broadcast %cst_124 : f32 to vector<2x1x8xf32>
    %394 = arith.mulf %392, %393 : vector<2x1x8xf32>
    %cst_125 = arith.constant dense<0xFF800000> : vector<2x1xf32>
    %395 = vector.multi_reduction <maximumf>, %394, %cst_125 [2] : vector<2x1x8xf32> to vector<2x1xf32>
    %396 = vector.shape_cast %395 : vector<2x1xf32> to vector<2x1x1xf32>
    %397 = vector.broadcast %396 : vector<2x1x1xf32> to vector<2x1x8xf32>
    %398 = arith.subf %394, %397 : vector<2x1x8xf32>
    %399 = math.exp %398 : vector<2x1x8xf32>
    %cst_126 = arith.constant dense<0.000000e+00> : vector<2x1xf32>
    %400 = vector.multi_reduction <add>, %399, %cst_126 [2] : vector<2x1x8xf32> to vector<2x1xf32>
    %401 = vector.shape_cast %400 : vector<2x1xf32> to vector<2x1x1xf32>
    %402 = tpu.reciprocal %401 {approx = true} : vector<2x1x1xf32> -> vector<2x1x1xf32>
    %403 = vector.broadcast %402 : vector<2x1x1xf32> to vector<2x1x8xf32>
    %404 = arith.mulf %399, %403 : vector<2x1x8xf32>
    "tpu.trace_start"() <{level = 10 : i32, message = "bqs,bse->bqe"}> : () -> ()
    %cst_127 = arith.constant dense<0.000000e+00> : vector<2x1x32xf32>
    %405 = tpu.matmul %404, %27, %cst_127 {dimension_numbers = #tpu.dot_dimension_numbers<[2], [1], [1], [2], [0, 0, 0, 1, 1, 2], [0], [0]>} : vector<2x1x8xf32>, vector<2x8x32xf32>, vector<2x1x32xf32> -> vector<2x1x32xf32>
    "tpu.trace_stop"() : () -> ()
    %406 = vector.shape_cast %405 : vector<2x1x32xf32> to vector<2x32xf32>
    %cst_128 = arith.constant dense<0.000000e+00> : vector<2x32xf32>
    %407 = tpu.matmul %406, %6, %cst_128 {dimension_numbers = #tpu.dot_dimension_numbers<[1], [0], [0], [1], [0, 0, 1, 1], [], []>} : vector<2x32xf32>, vector<32x32xf32>, vector<2x32xf32> -> vector<2x32xf32>
    %408 = vector.broadcast %7 : vector<1x32xf32> to vector<2x32xf32>
    %409 = arith.addf %407, %408 : vector<2x32xf32>
    %410 = vector.extract_strided_slice %33 {offsets = [0, 4, 0], sizes = [2, 1, 128], strides = [1, 1, 1]} : vector<2x8x128xf32> to vector<2x1x128xf32>
    %411 = vector.shape_cast %410 : vector<2x1x128xf32> to vector<2x128xf32>
    %cst_129 = arith.constant dense<0.000000e+00> : vector<2x128xf32>
    %412 = tpu.matmul %409, %10, %cst_129 {dimension_numbers = #tpu.dot_dimension_numbers<[1], [0], [0], [1], [0, 0, 1, 1], [], []>} : vector<2x32xf32>, vector<32x128xf32>, vector<2x128xf32> -> vector<2x128xf32>
    %413 = arith.addf %411, %412 : vector<2x128xf32>
    %cst_130 = arith.constant dense<0.000000e+00> : vector<2x128xf32>
    %414 = tpu.matmul %354, %11, %cst_130 {dimension_numbers = #tpu.dot_dimension_numbers<[1], [0], [0], [1], [0, 0, 1, 1], [], []>} : vector<2x32xf32>, vector<32x128xf32>, vector<2x128xf32> -> vector<2x128xf32>
    %415 = arith.addf %413, %414 : vector<2x128xf32>
    %416 = vector.extract_strided_slice %415 {offsets = [0, 0], sizes = [2, 32], strides = [1, 1]} : vector<2x128xf32> to vector<2x32xf32>
    %417 = arith.negf %416 : vector<2x32xf32>
    %418 = math.exp %417 : vector<2x32xf32>
    %cst_131 = arith.constant 1.000000e+00 : f32
    %419 = vector.broadcast %cst_131 : f32 to vector<2x32xf32>
    %420 = arith.addf %419, %418 : vector<2x32xf32>
    %421 = arith.divf %419, %420 : vector<2x32xf32>
    %422 = vector.extract_strided_slice %415 {offsets = [0, 32], sizes = [2, 32], strides = [1, 1]} : vector<2x128xf32> to vector<2x32xf32>
    %423 = arith.negf %422 : vector<2x32xf32>
    %424 = math.exp %423 : vector<2x32xf32>
    %cst_132 = arith.constant 1.000000e+00 : f32
    %425 = vector.broadcast %cst_132 : f32 to vector<2x32xf32>
    %426 = arith.addf %425, %424 : vector<2x32xf32>
    %427 = arith.divf %425, %426 : vector<2x32xf32>
    %428 = vector.extract_strided_slice %415 {offsets = [0, 64], sizes = [2, 32], strides = [1, 1]} : vector<2x128xf32> to vector<2x32xf32>
    %429 = math.tanh %428 : vector<2x32xf32>
    %430 = vector.extract_strided_slice %415 {offsets = [0, 96], sizes = [2, 32], strides = [1, 1]} : vector<2x128xf32> to vector<2x32xf32>
    %431 = arith.negf %430 : vector<2x32xf32>
    %432 = math.exp %431 : vector<2x32xf32>
    %cst_133 = arith.constant 1.000000e+00 : f32
    %433 = vector.broadcast %cst_133 : f32 to vector<2x32xf32>
    %434 = arith.addf %433, %432 : vector<2x32xf32>
    %435 = arith.divf %433, %434 : vector<2x32xf32>
    %436 = arith.mulf %427, %352 : vector<2x32xf32>
    %437 = arith.mulf %421, %429 : vector<2x32xf32>
    %438 = arith.addf %436, %437 : vector<2x32xf32>
    %439 = math.tanh %438 : vector<2x32xf32>
    %440 = arith.mulf %435, %439 : vector<2x32xf32>
    %cst_134 = arith.constant dense<0.000000e+00> : vector<2x128xf32>
    %441 = tpu.matmul %440, %13, %cst_134 {dimension_numbers = #tpu.dot_dimension_numbers<[1], [0], [0], [1], [0, 0, 1, 1], [], []>} : vector<2x32xf32>, vector<32x128xf32>, vector<2x128xf32> -> vector<2x128xf32>
    %cst_135 = arith.constant dense<0.000000e+00> : vector<2x128xf32>
    %442 = tpu.matmul %384, %14, %cst_135 {dimension_numbers = #tpu.dot_dimension_numbers<[1], [0], [0], [1], [0, 0, 1, 1], [], []>} : vector<2x32xf32>, vector<32x128xf32>, vector<2x128xf32> -> vector<2x128xf32>
    %443 = arith.addf %441, %442 : vector<2x128xf32>
    %444 = vector.broadcast %15 : vector<1x128xf32> to vector<2x128xf32>
    %445 = arith.addf %443, %444 : vector<2x128xf32>
    %446 = vector.extract_strided_slice %445 {offsets = [0, 0], sizes = [2, 32], strides = [1, 1]} : vector<2x128xf32> to vector<2x32xf32>
    %447 = arith.negf %446 : vector<2x32xf32>
    %448 = math.exp %447 : vector<2x32xf32>
    %cst_136 = arith.constant 1.000000e+00 : f32
    %449 = vector.broadcast %cst_136 : f32 to vector<2x32xf32>
    %450 = arith.addf %449, %448 : vector<2x32xf32>
    %451 = arith.divf %449, %450 : vector<2x32xf32>
    %452 = vector.extract_strided_slice %445 {offsets = [0, 32], sizes = [2, 32], strides = [1, 1]} : vector<2x128xf32> to vector<2x32xf32>
    %453 = arith.negf %452 : vector<2x32xf32>
    %454 = math.exp %453 : vector<2x32xf32>
    %cst_137 = arith.constant 1.000000e+00 : f32
    %455 = vector.broadcast %cst_137 : f32 to vector<2x32xf32>
    %456 = arith.addf %455, %454 : vector<2x32xf32>
    %457 = arith.divf %455, %456 : vector<2x32xf32>
    %458 = vector.extract_strided_slice %445 {offsets = [0, 64], sizes = [2, 32], strides = [1, 1]} : vector<2x128xf32> to vector<2x32xf32>
    %459 = math.tanh %458 : vector<2x32xf32>
    %460 = vector.extract_strided_slice %445 {offsets = [0, 96], sizes = [2, 32], strides = [1, 1]} : vector<2x128xf32> to vector<2x32xf32>
    %461 = arith.negf %460 : vector<2x32xf32>
    %462 = math.exp %461 : vector<2x32xf32>
    %cst_138 = arith.constant 1.000000e+00 : f32
    %463 = vector.broadcast %cst_138 : f32 to vector<2x32xf32>
    %464 = arith.addf %463, %462 : vector<2x32xf32>
    %465 = arith.divf %463, %464 : vector<2x32xf32>
    %466 = arith.mulf %457, %382 : vector<2x32xf32>
    %467 = arith.mulf %451, %459 : vector<2x32xf32>
    %468 = arith.addf %466, %467 : vector<2x32xf32>
    %469 = math.tanh %468 : vector<2x32xf32>
    %470 = arith.mulf %465, %469 : vector<2x32xf32>
    %c0_139 = arith.constant 0 : index
    %c4 = arith.constant 4 : index
    %c0_140 = arith.constant 0 : index
    %471 = vector.load %arg24[%c0_139, %c4, %c0_140] : memref<2x8x32xf32, #tpu.memory_space<vmem>>, vector<2x1x32xf32>
    %472 = vector.shape_cast %471 : vector<2x1x32xf32> to vector<2x32xf32>
    %473 = vector.shape_cast %470 : vector<2x32xf32> to vector<2x1x32xf32>
    tpu.vector_store %arg24[%c0_139, %c4, %c0_140], %473 {strides = array<i32>} : memref<2x8x32xf32, #tpu.memory_space<vmem>>, vector<2x1x32xf32>,
    %cst_141 = arith.constant dense<0.000000e+00> : vector<2x32xf32>
    %474 = tpu.matmul %470, %0, %cst_141 {dimension_numbers = #tpu.dot_dimension_numbers<[1], [0], [0], [1], [0, 0, 1, 1], [], []>} : vector<2x32xf32>, vector<32x32xf32>, vector<2x32xf32> -> vector<2x32xf32>
    %475 = vector.broadcast %1 : vector<1x32xf32> to vector<2x32xf32>
    %476 = arith.addf %474, %475 : vector<2x32xf32>
    %477 = vector.shape_cast %476 : vector<2x32xf32> to vector<2x1x32xf32>
    "tpu.trace_start"() <{level = 10 : i32, message = "bqe,bse->bqs"}> : () -> ()
    %cst_142 = arith.constant dense<0.000000e+00> : vector<2x1x8xf32>
    %478 = tpu.matmul %477, %23, %cst_142 {dimension_numbers = #tpu.dot_dimension_numbers<[2], [2], [1], [1], [0, 0, 0, 1, 1, 1], [0], [0]>} : vector<2x1x32xf32>, vector<2x8x32xf32>, vector<2x1x8xf32> -> vector<2x1x8xf32>
    "tpu.trace_stop"() : () -> ()
    %cst_143 = arith.constant 0.176776692 : f32
    %479 = vector.broadcast %cst_143 : f32 to vector<2x1x8xf32>
    %480 = arith.mulf %478, %479 : vector<2x1x8xf32>
    %cst_144 = arith.constant dense<0xFF800000> : vector<2x1xf32>
    %481 = vector.multi_reduction <maximumf>, %480, %cst_144 [2] : vector<2x1x8xf32> to vector<2x1xf32>
    %482 = vector.shape_cast %481 : vector<2x1xf32> to vector<2x1x1xf32>
    %483 = vector.broadcast %482 : vector<2x1x1xf32> to vector<2x1x8xf32>
    %484 = arith.subf %480, %483 : vector<2x1x8xf32>
    %485 = math.exp %484 : vector<2x1x8xf32>
    %cst_145 = arith.constant dense<0.000000e+00> : vector<2x1xf32>
    %486 = vector.multi_reduction <add>, %485, %cst_145 [2] : vector<2x1x8xf32> to vector<2x1xf32>
    %487 = vector.shape_cast %486 : vector<2x1xf32> to vector<2x1x1xf32>
    %488 = tpu.reciprocal %487 {approx = true} : vector<2x1x1xf32> -> vector<2x1x1xf32>
    %489 = vector.broadcast %488 : vector<2x1x1xf32> to vector<2x1x8xf32>
    %490 = arith.mulf %485, %489 : vector<2x1x8xf32>
    "tpu.trace_start"() <{level = 10 : i32, message = "bqs,bse->bqe"}> : () -> ()
    %cst_146 = arith.constant dense<0.000000e+00> : vector<2x1x32xf32>
    %491 = tpu.matmul %490, %27, %cst_146 {dimension_numbers = #tpu.dot_dimension_numbers<[2], [1], [1], [2], [0, 0, 0, 1, 1, 2], [0], [0]>} : vector<2x1x8xf32>, vector<2x8x32xf32>, vector<2x1x32xf32> -> vector<2x1x32xf32>
    "tpu.trace_stop"() : () -> ()
    %492 = vector.shape_cast %491 : vector<2x1x32xf32> to vector<2x32xf32>
    %cst_147 = arith.constant dense<0.000000e+00> : vector<2x32xf32>
    %493 = tpu.matmul %492, %6, %cst_147 {dimension_numbers = #tpu.dot_dimension_numbers<[1], [0], [0], [1], [0, 0, 1, 1], [], []>} : vector<2x32xf32>, vector<32x32xf32>, vector<2x32xf32> -> vector<2x32xf32>
    %494 = vector.broadcast %7 : vector<1x32xf32> to vector<2x32xf32>
    %495 = arith.addf %493, %494 : vector<2x32xf32>
    %496 = vector.extract_strided_slice %33 {offsets = [0, 5, 0], sizes = [2, 1, 128], strides = [1, 1, 1]} : vector<2x8x128xf32> to vector<2x1x128xf32>
    %497 = vector.shape_cast %496 : vector<2x1x128xf32> to vector<2x128xf32>
    %cst_148 = arith.constant dense<0.000000e+00> : vector<2x128xf32>
    %498 = tpu.matmul %495, %10, %cst_148 {dimension_numbers = #tpu.dot_dimension_numbers<[1], [0], [0], [1], [0, 0, 1, 1], [], []>} : vector<2x32xf32>, vector<32x128xf32>, vector<2x128xf32> -> vector<2x128xf32>
    %499 = arith.addf %497, %498 : vector<2x128xf32>
    %cst_149 = arith.constant dense<0.000000e+00> : vector<2x128xf32>
    %500 = tpu.matmul %440, %11, %cst_149 {dimension_numbers = #tpu.dot_dimension_numbers<[1], [0], [0], [1], [0, 0, 1, 1], [], []>} : vector<2x32xf32>, vector<32x128xf32>, vector<2x128xf32> -> vector<2x128xf32>
    %501 = arith.addf %499, %500 : vector<2x128xf32>
    %502 = vector.extract_strided_slice %501 {offsets = [0, 0], sizes = [2, 32], strides = [1, 1]} : vector<2x128xf32> to vector<2x32xf32>
    %503 = arith.negf %502 : vector<2x32xf32>
    %504 = math.exp %503 : vector<2x32xf32>
    %cst_150 = arith.constant 1.000000e+00 : f32
    %505 = vector.broadcast %cst_150 : f32 to vector<2x32xf32>
    %506 = arith.addf %505, %504 : vector<2x32xf32>
    %507 = arith.divf %505, %506 : vector<2x32xf32>
    %508 = vector.extract_strided_slice %501 {offsets = [0, 32], sizes = [2, 32], strides = [1, 1]} : vector<2x128xf32> to vector<2x32xf32>
    %509 = arith.negf %508 : vector<2x32xf32>
    %510 = math.exp %509 : vector<2x32xf32>
    %cst_151 = arith.constant 1.000000e+00 : f32
    %511 = vector.broadcast %cst_151 : f32 to vector<2x32xf32>
    %512 = arith.addf %511, %510 : vector<2x32xf32>
    %513 = arith.divf %511, %512 : vector<2x32xf32>
    %514 = vector.extract_strided_slice %501 {offsets = [0, 64], sizes = [2, 32], strides = [1, 1]} : vector<2x128xf32> to vector<2x32xf32>
    %515 = math.tanh %514 : vector<2x32xf32>
    %516 = vector.extract_strided_slice %501 {offsets = [0, 96], sizes = [2, 32], strides = [1, 1]} : vector<2x128xf32> to vector<2x32xf32>
    %517 = arith.negf %516 : vector<2x32xf32>
    %518 = math.exp %517 : vector<2x32xf32>
    %cst_152 = arith.constant 1.000000e+00 : f32
    %519 = vector.broadcast %cst_152 : f32 to vector<2x32xf32>
    %520 = arith.addf %519, %518 : vector<2x32xf32>
    %521 = arith.divf %519, %520 : vector<2x32xf32>
    %522 = arith.mulf %513, %438 : vector<2x32xf32>
    %523 = arith.mulf %507, %515 : vector<2x32xf32>
    %524 = arith.addf %522, %523 : vector<2x32xf32>
    %525 = math.tanh %524 : vector<2x32xf32>
    %526 = arith.mulf %521, %525 : vector<2x32xf32>
    %cst_153 = arith.constant dense<0.000000e+00> : vector<2x128xf32>
    %527 = tpu.matmul %526, %13, %cst_153 {dimension_numbers = #tpu.dot_dimension_numbers<[1], [0], [0], [1], [0, 0, 1, 1], [], []>} : vector<2x32xf32>, vector<32x128xf32>, vector<2x128xf32> -> vector<2x128xf32>
    %cst_154 = arith.constant dense<0.000000e+00> : vector<2x128xf32>
    %528 = tpu.matmul %470, %14, %cst_154 {dimension_numbers = #tpu.dot_dimension_numbers<[1], [0], [0], [1], [0, 0, 1, 1], [], []>} : vector<2x32xf32>, vector<32x128xf32>, vector<2x128xf32> -> vector<2x128xf32>
    %529 = arith.addf %527, %528 : vector<2x128xf32>
    %530 = vector.broadcast %15 : vector<1x128xf32> to vector<2x128xf32>
    %531 = arith.addf %529, %530 : vector<2x128xf32>
    %532 = vector.extract_strided_slice %531 {offsets = [0, 0], sizes = [2, 32], strides = [1, 1]} : vector<2x128xf32> to vector<2x32xf32>
    %533 = arith.negf %532 : vector<2x32xf32>
    %534 = math.exp %533 : vector<2x32xf32>
    %cst_155 = arith.constant 1.000000e+00 : f32
    %535 = vector.broadcast %cst_155 : f32 to vector<2x32xf32>
    %536 = arith.addf %535, %534 : vector<2x32xf32>
    %537 = arith.divf %535, %536 : vector<2x32xf32>
    %538 = vector.extract_strided_slice %531 {offsets = [0, 32], sizes = [2, 32], strides = [1, 1]} : vector<2x128xf32> to vector<2x32xf32>
    %539 = arith.negf %538 : vector<2x32xf32>
    %540 = math.exp %539 : vector<2x32xf32>
    %cst_156 = arith.constant 1.000000e+00 : f32
    %541 = vector.broadcast %cst_156 : f32 to vector<2x32xf32>
    %542 = arith.addf %541, %540 : vector<2x32xf32>
    %543 = arith.divf %541, %542 : vector<2x32xf32>
    %544 = vector.extract_strided_slice %531 {offsets = [0, 64], sizes = [2, 32], strides = [1, 1]} : vector<2x128xf32> to vector<2x32xf32>
    %545 = math.tanh %544 : vector<2x32xf32>
    %546 = vector.extract_strided_slice %531 {offsets = [0, 96], sizes = [2, 32], strides = [1, 1]} : vector<2x128xf32> to vector<2x32xf32>
    %547 = arith.negf %546 : vector<2x32xf32>
    %548 = math.exp %547 : vector<2x32xf32>
    %cst_157 = arith.constant 1.000000e+00 : f32
    %549 = vector.broadcast %cst_157 : f32 to vector<2x32xf32>
    %550 = arith.addf %549, %548 : vector<2x32xf32>
    %551 = arith.divf %549, %550 : vector<2x32xf32>
    %552 = arith.mulf %543, %468 : vector<2x32xf32>
    %553 = arith.mulf %537, %545 : vector<2x32xf32>
    %554 = arith.addf %552, %553 : vector<2x32xf32>
    %555 = math.tanh %554 : vector<2x32xf32>
    %556 = arith.mulf %551, %555 : vector<2x32xf32>
    %c0_158 = arith.constant 0 : index
    %c5 = arith.constant 5 : index
    %c0_159 = arith.constant 0 : index
    %557 = vector.load %arg24[%c0_158, %c5, %c0_159] : memref<2x8x32xf32, #tpu.memory_space<vmem>>, vector<2x1x32xf32>
    %558 = vector.shape_cast %557 : vector<2x1x32xf32> to vector<2x32xf32>
    %559 = vector.shape_cast %556 : vector<2x32xf32> to vector<2x1x32xf32>
    tpu.vector_store %arg24[%c0_158, %c5, %c0_159], %559 {strides = array<i32>} : memref<2x8x32xf32, #tpu.memory_space<vmem>>, vector<2x1x32xf32>,
    %cst_160 = arith.constant dense<0.000000e+00> : vector<2x32xf32>
    %560 = tpu.matmul %556, %0, %cst_160 {dimension_numbers = #tpu.dot_dimension_numbers<[1], [0], [0], [1], [0, 0, 1, 1], [], []>} : vector<2x32xf32>, vector<32x32xf32>, vector<2x32xf32> -> vector<2x32xf32>
    %561 = vector.broadcast %1 : vector<1x32xf32> to vector<2x32xf32>
    %562 = arith.addf %560, %561 : vector<2x32xf32>
    %563 = vector.shape_cast %562 : vector<2x32xf32> to vector<2x1x32xf32>
    "tpu.trace_start"() <{level = 10 : i32, message = "bqe,bse->bqs"}> : () -> ()
    %cst_161 = arith.constant dense<0.000000e+00> : vector<2x1x8xf32>
    %564 = tpu.matmul %563, %23, %cst_161 {dimension_numbers = #tpu.dot_dimension_numbers<[2], [2], [1], [1], [0, 0, 0, 1, 1, 1], [0], [0]>} : vector<2x1x32xf32>, vector<2x8x32xf32>, vector<2x1x8xf32> -> vector<2x1x8xf32>
    "tpu.trace_stop"() : () -> ()
    %cst_162 = arith.constant 0.176776692 : f32
    %565 = vector.broadcast %cst_162 : f32 to vector<2x1x8xf32>
    %566 = arith.mulf %564, %565 : vector<2x1x8xf32>
    %cst_163 = arith.constant dense<0xFF800000> : vector<2x1xf32>
    %567 = vector.multi_reduction <maximumf>, %566, %cst_163 [2] : vector<2x1x8xf32> to vector<2x1xf32>
    %568 = vector.shape_cast %567 : vector<2x1xf32> to vector<2x1x1xf32>
    %569 = vector.broadcast %568 : vector<2x1x1xf32> to vector<2x1x8xf32>
    %570 = arith.subf %566, %569 : vector<2x1x8xf32>
    %571 = math.exp %570 : vector<2x1x8xf32>
    %cst_164 = arith.constant dense<0.000000e+00> : vector<2x1xf32>
    %572 = vector.multi_reduction <add>, %571, %cst_164 [2] : vector<2x1x8xf32> to vector<2x1xf32>
    %573 = vector.shape_cast %572 : vector<2x1xf32> to vector<2x1x1xf32>
    %574 = tpu.reciprocal %573 {approx = true} : vector<2x1x1xf32> -> vector<2x1x1xf32>
    %575 = vector.broadcast %574 : vector<2x1x1xf32> to vector<2x1x8xf32>
    %576 = arith.mulf %571, %575 : vector<2x1x8xf32>
    "tpu.trace_start"() <{level = 10 : i32, message = "bqs,bse->bqe"}> : () -> ()
    %cst_165 = arith.constant dense<0.000000e+00> : vector<2x1x32xf32>
    %577 = tpu.matmul %576, %27, %cst_165 {dimension_numbers = #tpu.dot_dimension_numbers<[2], [1], [1], [2], [0, 0, 0, 1, 1, 2], [0], [0]>} : vector<2x1x8xf32>, vector<2x8x32xf32>, vector<2x1x32xf32> -> vector<2x1x32xf32>
    "tpu.trace_stop"() : () -> ()
    %578 = vector.shape_cast %577 : vector<2x1x32xf32> to vector<2x32xf32>
    %cst_166 = arith.constant dense<0.000000e+00> : vector<2x32xf32>
    %579 = tpu.matmul %578, %6, %cst_166 {dimension_numbers = #tpu.dot_dimension_numbers<[1], [0], [0], [1], [0, 0, 1, 1], [], []>} : vector<2x32xf32>, vector<32x32xf32>, vector<2x32xf32> -> vector<2x32xf32>
    %580 = vector.broadcast %7 : vector<1x32xf32> to vector<2x32xf32>
    %581 = arith.addf %579, %580 : vector<2x32xf32>
    %582 = vector.extract_strided_slice %33 {offsets = [0, 6, 0], sizes = [2, 1, 128], strides = [1, 1, 1]} : vector<2x8x128xf32> to vector<2x1x128xf32>
    %583 = vector.shape_cast %582 : vector<2x1x128xf32> to vector<2x128xf32>
    %cst_167 = arith.constant dense<0.000000e+00> : vector<2x128xf32>
    %584 = tpu.matmul %581, %10, %cst_167 {dimension_numbers = #tpu.dot_dimension_numbers<[1], [0], [0], [1], [0, 0, 1, 1], [], []>} : vector<2x32xf32>, vector<32x128xf32>, vector<2x128xf32> -> vector<2x128xf32>
    %585 = arith.addf %583, %584 : vector<2x128xf32>
    %cst_168 = arith.constant dense<0.000000e+00> : vector<2x128xf32>
    %586 = tpu.matmul %526, %11, %cst_168 {dimension_numbers = #tpu.dot_dimension_numbers<[1], [0], [0], [1], [0, 0, 1, 1], [], []>} : vector<2x32xf32>, vector<32x128xf32>, vector<2x128xf32> -> vector<2x128xf32>
    %587 = arith.addf %585, %586 : vector<2x128xf32>
    %588 = vector.extract_strided_slice %587 {offsets = [0, 0], sizes = [2, 32], strides = [1, 1]} : vector<2x128xf32> to vector<2x32xf32>
    %589 = arith.negf %588 : vector<2x32xf32>
    %590 = math.exp %589 : vector<2x32xf32>
    %cst_169 = arith.constant 1.000000e+00 : f32
    %591 = vector.broadcast %cst_169 : f32 to vector<2x32xf32>
    %592 = arith.addf %591, %590 : vector<2x32xf32>
    %593 = arith.divf %591, %592 : vector<2x32xf32>
    %594 = vector.extract_strided_slice %587 {offsets = [0, 32], sizes = [2, 32], strides = [1, 1]} : vector<2x128xf32> to vector<2x32xf32>
    %595 = arith.negf %594 : vector<2x32xf32>
    %596 = math.exp %595 : vector<2x32xf32>
    %cst_170 = arith.constant 1.000000e+00 : f32
    %597 = vector.broadcast %cst_170 : f32 to vector<2x32xf32>
    %598 = arith.addf %597, %596 : vector<2x32xf32>
    %599 = arith.divf %597, %598 : vector<2x32xf32>
    %600 = vector.extract_strided_slice %587 {offsets = [0, 64], sizes = [2, 32], strides = [1, 1]} : vector<2x128xf32> to vector<2x32xf32>
    %601 = math.tanh %600 : vector<2x32xf32>
    %602 = vector.extract_strided_slice %587 {offsets = [0, 96], sizes = [2, 32], strides = [1, 1]} : vector<2x128xf32> to vector<2x32xf32>
    %603 = arith.negf %602 : vector<2x32xf32>
    %604 = math.exp %603 : vector<2x32xf32>
    %cst_171 = arith.constant 1.000000e+00 : f32
    %605 = vector.broadcast %cst_171 : f32 to vector<2x32xf32>
    %606 = arith.addf %605, %604 : vector<2x32xf32>
    %607 = arith.divf %605, %606 : vector<2x32xf32>
    %608 = arith.mulf %599, %524 : vector<2x32xf32>
    %609 = arith.mulf %593, %601 : vector<2x32xf32>
    %610 = arith.addf %608, %609 : vector<2x32xf32>
    %611 = math.tanh %610 : vector<2x32xf32>
    %612 = arith.mulf %607, %611 : vector<2x32xf32>
    %cst_172 = arith.constant dense<0.000000e+00> : vector<2x128xf32>
    %613 = tpu.matmul %612, %13, %cst_172 {dimension_numbers = #tpu.dot_dimension_numbers<[1], [0], [0], [1], [0, 0, 1, 1], [], []>} : vector<2x32xf32>, vector<32x128xf32>, vector<2x128xf32> -> vector<2x128xf32>
    %cst_173 = arith.constant dense<0.000000e+00> : vector<2x128xf32>
    %614 = tpu.matmul %556, %14, %cst_173 {dimension_numbers = #tpu.dot_dimension_numbers<[1], [0], [0], [1], [0, 0, 1, 1], [], []>} : vector<2x32xf32>, vector<32x128xf32>, vector<2x128xf32> -> vector<2x128xf32>
    %615 = arith.addf %613, %614 : vector<2x128xf32>
    %616 = vector.broadcast %15 : vector<1x128xf32> to vector<2x128xf32>
    %617 = arith.addf %615, %616 : vector<2x128xf32>
    %618 = vector.extract_strided_slice %617 {offsets = [0, 0], sizes = [2, 32], strides = [1, 1]} : vector<2x128xf32> to vector<2x32xf32>
    %619 = arith.negf %618 : vector<2x32xf32>
    %620 = math.exp %619 : vector<2x32xf32>
    %cst_174 = arith.constant 1.000000e+00 : f32
    %621 = vector.broadcast %cst_174 : f32 to vector<2x32xf32>
    %622 = arith.addf %621, %620 : vector<2x32xf32>
    %623 = arith.divf %621, %622 : vector<2x32xf32>
    %624 = vector.extract_strided_slice %617 {offsets = [0, 32], sizes = [2, 32], strides = [1, 1]} : vector<2x128xf32> to vector<2x32xf32>
    %625 = arith.negf %624 : vector<2x32xf32>
    %626 = math.exp %625 : vector<2x32xf32>
    %cst_175 = arith.constant 1.000000e+00 : f32
    %627 = vector.broadcast %cst_175 : f32 to vector<2x32xf32>
    %628 = arith.addf %627, %626 : vector<2x32xf32>
    %629 = arith.divf %627, %628 : vector<2x32xf32>
    %630 = vector.extract_strided_slice %617 {offsets = [0, 64], sizes = [2, 32], strides = [1, 1]} : vector<2x128xf32> to vector<2x32xf32>
    %631 = math.tanh %630 : vector<2x32xf32>
    %632 = vector.extract_strided_slice %617 {offsets = [0, 96], sizes = [2, 32], strides = [1, 1]} : vector<2x128xf32> to vector<2x32xf32>
    %633 = arith.negf %632 : vector<2x32xf32>
    %634 = math.exp %633 : vector<2x32xf32>
    %cst_176 = arith.constant 1.000000e+00 : f32
    %635 = vector.broadcast %cst_176 : f32 to vector<2x32xf32>
    %636 = arith.addf %635, %634 : vector<2x32xf32>
    %637 = arith.divf %635, %636 : vector<2x32xf32>
    %638 = arith.mulf %629, %554 : vector<2x32xf32>
    %639 = arith.mulf %623, %631 : vector<2x32xf32>
    %640 = arith.addf %638, %639 : vector<2x32xf32>
    %641 = math.tanh %640 : vector<2x32xf32>
    %642 = arith.mulf %637, %641 : vector<2x32xf32>
    %c0_177 = arith.constant 0 : index
    %c6 = arith.constant 6 : index
    %c0_178 = arith.constant 0 : index
    %643 = vector.load %arg24[%c0_177, %c6, %c0_178] : memref<2x8x32xf32, #tpu.memory_space<vmem>>, vector<2x1x32xf32>
    %644 = vector.shape_cast %643 : vector<2x1x32xf32> to vector<2x32xf32>
    %645 = vector.shape_cast %642 : vector<2x32xf32> to vector<2x1x32xf32>
    tpu.vector_store %arg24[%c0_177, %c6, %c0_178], %645 {strides = array<i32>} : memref<2x8x32xf32, #tpu.memory_space<vmem>>, vector<2x1x32xf32>,
    %cst_179 = arith.constant dense<0.000000e+00> : vector<2x32xf32>
    %646 = tpu.matmul %642, %0, %cst_179 {dimension_numbers = #tpu.dot_dimension_numbers<[1], [0], [0], [1], [0, 0, 1, 1], [], []>} : vector<2x32xf32>, vector<32x32xf32>, vector<2x32xf32> -> vector<2x32xf32>
    %647 = vector.broadcast %1 : vector<1x32xf32> to vector<2x32xf32>
    %648 = arith.addf %646, %647 : vector<2x32xf32>
    %649 = vector.shape_cast %648 : vector<2x32xf32> to vector<2x1x32xf32>
    "tpu.trace_start"() <{level = 10 : i32, message = "bqe,bse->bqs"}> : () -> ()
    %cst_180 = arith.constant dense<0.000000e+00> : vector<2x1x8xf32>
    %650 = tpu.matmul %649, %23, %cst_180 {dimension_numbers = #tpu.dot_dimension_numbers<[2], [2], [1], [1], [0, 0, 0, 1, 1, 1], [0], [0]>} : vector<2x1x32xf32>, vector<2x8x32xf32>, vector<2x1x8xf32> -> vector<2x1x8xf32>
    "tpu.trace_stop"() : () -> ()
    %cst_181 = arith.constant 0.176776692 : f32
    %651 = vector.broadcast %cst_181 : f32 to vector<2x1x8xf32>
    %652 = arith.mulf %650, %651 : vector<2x1x8xf32>
    %cst_182 = arith.constant dense<0xFF800000> : vector<2x1xf32>
    %653 = vector.multi_reduction <maximumf>, %652, %cst_182 [2] : vector<2x1x8xf32> to vector<2x1xf32>
    %654 = vector.shape_cast %653 : vector<2x1xf32> to vector<2x1x1xf32>
    %655 = vector.broadcast %654 : vector<2x1x1xf32> to vector<2x1x8xf32>
    %656 = arith.subf %652, %655 : vector<2x1x8xf32>
    %657 = math.exp %656 : vector<2x1x8xf32>
    %cst_183 = arith.constant dense<0.000000e+00> : vector<2x1xf32>
    %658 = vector.multi_reduction <add>, %657, %cst_183 [2] : vector<2x1x8xf32> to vector<2x1xf32>
    %659 = vector.shape_cast %658 : vector<2x1xf32> to vector<2x1x1xf32>
    %660 = tpu.reciprocal %659 {approx = true} : vector<2x1x1xf32> -> vector<2x1x1xf32>
    %661 = vector.broadcast %660 : vector<2x1x1xf32> to vector<2x1x8xf32>
    %662 = arith.mulf %657, %661 : vector<2x1x8xf32>
    "tpu.trace_start"() <{level = 10 : i32, message = "bqs,bse->bqe"}> : () -> ()
    %cst_184 = arith.constant dense<0.000000e+00> : vector<2x1x32xf32>
    %663 = tpu.matmul %662, %27, %cst_184 {dimension_numbers = #tpu.dot_dimension_numbers<[2], [1], [1], [2], [0, 0, 0, 1, 1, 2], [0], [0]>} : vector<2x1x8xf32>, vector<2x8x32xf32>, vector<2x1x32xf32> -> vector<2x1x32xf32>
    "tpu.trace_stop"() : () -> ()
    %664 = vector.shape_cast %663 : vector<2x1x32xf32> to vector<2x32xf32>
    %cst_185 = arith.constant dense<0.000000e+00> : vector<2x32xf32>
    %665 = tpu.matmul %664, %6, %cst_185 {dimension_numbers = #tpu.dot_dimension_numbers<[1], [0], [0], [1], [0, 0, 1, 1], [], []>} : vector<2x32xf32>, vector<32x32xf32>, vector<2x32xf32> -> vector<2x32xf32>
    %666 = vector.broadcast %7 : vector<1x32xf32> to vector<2x32xf32>
    %667 = arith.addf %665, %666 : vector<2x32xf32>
    %668 = vector.extract_strided_slice %33 {offsets = [0, 7, 0], sizes = [2, 1, 128], strides = [1, 1, 1]} : vector<2x8x128xf32> to vector<2x1x128xf32>
    %669 = vector.shape_cast %668 : vector<2x1x128xf32> to vector<2x128xf32>
    %cst_186 = arith.constant dense<0.000000e+00> : vector<2x128xf32>
    %670 = tpu.matmul %667, %10, %cst_186 {dimension_numbers = #tpu.dot_dimension_numbers<[1], [0], [0], [1], [0, 0, 1, 1], [], []>} : vector<2x32xf32>, vector<32x128xf32>, vector<2x128xf32> -> vector<2x128xf32>
    %671 = arith.addf %669, %670 : vector<2x128xf32>
    %cst_187 = arith.constant dense<0.000000e+00> : vector<2x128xf32>
    %672 = tpu.matmul %612, %11, %cst_187 {dimension_numbers = #tpu.dot_dimension_numbers<[1], [0], [0], [1], [0, 0, 1, 1], [], []>} : vector<2x32xf32>, vector<32x128xf32>, vector<2x128xf32> -> vector<2x128xf32>
    %673 = arith.addf %671, %672 : vector<2x128xf32>
    %674 = vector.extract_strided_slice %673 {offsets = [0, 0], sizes = [2, 32], strides = [1, 1]} : vector<2x128xf32> to vector<2x32xf32>
    %675 = arith.negf %674 : vector<2x32xf32>
    %676 = math.exp %675 : vector<2x32xf32>
    %cst_188 = arith.constant 1.000000e+00 : f32
    %677 = vector.broadcast %cst_188 : f32 to vector<2x32xf32>
    %678 = arith.addf %677, %676 : vector<2x32xf32>
    %679 = arith.divf %677, %678 : vector<2x32xf32>
    %680 = vector.extract_strided_slice %673 {offsets = [0, 32], sizes = [2, 32], strides = [1, 1]} : vector<2x128xf32> to vector<2x32xf32>
    %681 = arith.negf %680 : vector<2x32xf32>
    %682 = math.exp %681 : vector<2x32xf32>
    %cst_189 = arith.constant 1.000000e+00 : f32
    %683 = vector.broadcast %cst_189 : f32 to vector<2x32xf32>
    %684 = arith.addf %683, %682 : vector<2x32xf32>
    %685 = arith.divf %683, %684 : vector<2x32xf32>
    %686 = vector.extract_strided_slice %673 {offsets = [0, 64], sizes = [2, 32], strides = [1, 1]} : vector<2x128xf32> to vector<2x32xf32>
    %687 = math.tanh %686 : vector<2x32xf32>
    %688 = vector.extract_strided_slice %673 {offsets = [0, 96], sizes = [2, 32], strides = [1, 1]} : vector<2x128xf32> to vector<2x32xf32>
    %689 = arith.negf %688 : vector<2x32xf32>
    %690 = math.exp %689 : vector<2x32xf32>
    %cst_190 = arith.constant 1.000000e+00 : f32
    %691 = vector.broadcast %cst_190 : f32 to vector<2x32xf32>
    %692 = arith.addf %691, %690 : vector<2x32xf32>
    %693 = arith.divf %691, %692 : vector<2x32xf32>
    %694 = arith.mulf %685, %610 : vector<2x32xf32>
    %695 = arith.mulf %679, %687 : vector<2x32xf32>
    %696 = arith.addf %694, %695 : vector<2x32xf32>
    %697 = math.tanh %696 : vector<2x32xf32>
    %698 = arith.mulf %693, %697 : vector<2x32xf32>
    %cst_191 = arith.constant dense<0.000000e+00> : vector<2x128xf32>
    %699 = tpu.matmul %698, %13, %cst_191 {dimension_numbers = #tpu.dot_dimension_numbers<[1], [0], [0], [1], [0, 0, 1, 1], [], []>} : vector<2x32xf32>, vector<32x128xf32>, vector<2x128xf32> -> vector<2x128xf32>
    %cst_192 = arith.constant dense<0.000000e+00> : vector<2x128xf32>
    %700 = tpu.matmul %642, %14, %cst_192 {dimension_numbers = #tpu.dot_dimension_numbers<[1], [0], [0], [1], [0, 0, 1, 1], [], []>} : vector<2x32xf32>, vector<32x128xf32>, vector<2x128xf32> -> vector<2x128xf32>
    %701 = arith.addf %699, %700 : vector<2x128xf32>
    %702 = vector.broadcast %15 : vector<1x128xf32> to vector<2x128xf32>
    %703 = arith.addf %701, %702 : vector<2x128xf32>
    %704 = vector.extract_strided_slice %703 {offsets = [0, 0], sizes = [2, 32], strides = [1, 1]} : vector<2x128xf32> to vector<2x32xf32>
    %705 = arith.negf %704 : vector<2x32xf32>
    %706 = math.exp %705 : vector<2x32xf32>
    %cst_193 = arith.constant 1.000000e+00 : f32
    %707 = vector.broadcast %cst_193 : f32 to vector<2x32xf32>
    %708 = arith.addf %707, %706 : vector<2x32xf32>
    %709 = arith.divf %707, %708 : vector<2x32xf32>
    %710 = vector.extract_strided_slice %703 {offsets = [0, 32], sizes = [2, 32], strides = [1, 1]} : vector<2x128xf32> to vector<2x32xf32>
    %711 = arith.negf %710 : vector<2x32xf32>
    %712 = math.exp %711 : vector<2x32xf32>
    %cst_194 = arith.constant 1.000000e+00 : f32
    %713 = vector.broadcast %cst_194 : f32 to vector<2x32xf32>
    %714 = arith.addf %713, %712 : vector<2x32xf32>
    %715 = arith.divf %713, %714 : vector<2x32xf32>
    %716 = vector.extract_strided_slice %703 {offsets = [0, 64], sizes = [2, 32], strides = [1, 1]} : vector<2x128xf32> to vector<2x32xf32>
    %717 = math.tanh %716 : vector<2x32xf32>
    %718 = vector.extract_strided_slice %703 {offsets = [0, 96], sizes = [2, 32], strides = [1, 1]} : vector<2x128xf32> to vector<2x32xf32>
    %719 = arith.negf %718 : vector<2x32xf32>
    %720 = math.exp %719 : vector<2x32xf32>
    %cst_195 = arith.constant 1.000000e+00 : f32
    %721 = vector.broadcast %cst_195 : f32 to vector<2x32xf32>
    %722 = arith.addf %721, %720 : vector<2x32xf32>
    %723 = arith.divf %721, %722 : vector<2x32xf32>
    %724 = arith.mulf %715, %640 : vector<2x32xf32>
    %725 = arith.mulf %709, %717 : vector<2x32xf32>
    %726 = arith.addf %724, %725 : vector<2x32xf32>
    %727 = math.tanh %726 : vector<2x32xf32>
    %728 = arith.mulf %723, %727 : vector<2x32xf32>
    %c0_196 = arith.constant 0 : index
    %c7 = arith.constant 7 : index
    %c0_197 = arith.constant 0 : index
    %729 = vector.load %arg24[%c0_196, %c7, %c0_197] : memref<2x8x32xf32, #tpu.memory_space<vmem>>, vector<2x1x32xf32>
    %730 = vector.shape_cast %729 : vector<2x1x32xf32> to vector<2x32xf32>
    %731 = vector.shape_cast %728 : vector<2x32xf32> to vector<2x1x32xf32>
    tpu.vector_store %arg24[%c0_196, %c7, %c0_197], %731 {strides = array<i32>} : memref<2x8x32xf32, #tpu.memory_space<vmem>>, vector<2x1x32xf32>,
    %c0_198 = arith.constant 0 : index
    %c0_199 = arith.constant 0 : index
    %c0_200 = arith.constant 0 : index
    %732 = vector.load %arg24[%c0_198, %c0_199, %c0_200] : memref<2x8x32xf32, #tpu.memory_space<vmem>>, vector<2x8x32xf32>
    %733 = vector.shape_cast %732 : vector<2x8x32xf32> to vector<16x32xf32>
    %cst_201 = arith.constant dense<0.000000e+00> : vector<16x128xf32>
    %734 = tpu.matmul %733, %16, %cst_201 {dimension_numbers = #tpu.dot_dimension_numbers<[1], [0], [0], [1], [0, 0, 1, 1], [], []>} : vector<16x32xf32>, vector<32x128xf32>, vector<16x128xf32> -> vector<16x128xf32>
    %735 = vector.broadcast %17 : vector<1x128xf32> to vector<16x128xf32>
    %736 = arith.addf %734, %735 : vector<16x128xf32>
    %737 = vector.shape_cast %736 : vector<16x128xf32> to vector<2x8x128xf32>
    %c0_202 = arith.constant 0 : index
    %c0_203 = arith.constant 0 : index
    %c0_204 = arith.constant 0 : index
    %738 = vector.load %arg21[%c0_202, %c0_203, %c0_204] : memref<2x8x128xf32, #tpu.memory_space<vmem>>, vector<2x8x128xf32>
    tpu.vector_store %arg21[%c0_202, %c0_203, %c0_204], %737 {strides = array<i32>} : memref<2x8x128xf32, #tpu.memory_space<vmem>>, vector<2x8x128xf32>,
    %c0_205 = arith.constant 0 : index
    %c0_206 = arith.constant 0 : index
    %c0_207 = arith.constant 0 : index
    %739 = vector.load %arg22[%c0_205, %c0_206, %c0_207] : memref<2x2x32xf32, #tpu.memory_space<vmem>>, vector<2x1x32xf32>
    %740 = vector.shape_cast %739 : vector<2x1x32xf32> to vector<2x32xf32>
    %741 = vector.shape_cast %698 : vector<2x32xf32> to vector<2x1x32xf32>
    tpu.vector_store %arg22[%c0_205, %c0_206, %c0_207], %741 {strides = array<i32>} : memref<2x2x32xf32, #tpu.memory_space<vmem>>, vector<2x1x32xf32>,
    %c0_208 = arith.constant 0 : index
    %c1_209 = arith.constant 1 : index
    %c0_210 = arith.constant 0 : index
    %742 = vector.load %arg22[%c0_208, %c1_209, %c0_210] : memref<2x2x32xf32, #tpu.memory_space<vmem>>, vector<2x1x32xf32>
    %743 = vector.shape_cast %742 : vector<2x1x32xf32> to vector<2x32xf32>
    %744 = vector.shape_cast %728 : vector<2x32xf32> to vector<2x1x32xf32>
    tpu.vector_store %arg22[%c0_208, %c1_209, %c0_210], %744 {strides = array<i32>} : memref<2x2x32xf32, #tpu.memory_space<vmem>>, vector<2x1x32xf32>,
    %c0_211 = arith.constant 0 : index
    %c0_212 = arith.constant 0 : index
    %c0_213 = arith.constant 0 : index
    %745 = vector.load %arg23[%c0_211, %c0_212, %c0_213] : memref<2x2x32xf32, #tpu.memory_space<vmem>>, vector<2x1x32xf32>
    %746 = vector.shape_cast %745 : vector<2x1x32xf32> to vector<2x32xf32>
    %747 = vector.shape_cast %696 : vector<2x32xf32> to vector<2x1x32xf32>
    tpu.vector_store %arg23[%c0_211, %c0_212, %c0_213], %747 {strides = array<i32>} : memref<2x2x32xf32, #tpu.memory_space<vmem>>, vector<2x1x32xf32>,
    %c0_214 = arith.constant 0 : index
    %c1_215 = arith.constant 1 : index
    %c0_216 = arith.constant 0 : index
    %748 = vector.load %arg23[%c0_214, %c1_215, %c0_216] : memref<2x2x32xf32, #tpu.memory_space<vmem>>, vector<2x1x32xf32>
    %749 = vector.shape_cast %748 : vector<2x1x32xf32> to vector<2x32xf32>
    %750 = vector.shape_cast %726 : vector<2x32xf32> to vector<2x1x32xf32>
    tpu.vector_store %arg23[%c0_214, %c1_215, %c0_216], %750 {strides = array<i32>} : memref<2x2x32xf32, #tpu.memory_space<vmem>>, vector<2x1x32xf32>,
    return
  }
  func.func @transform_0(%arg0: i32) -> (i32, i32, i32) {
    %c0_i32 = arith.constant 0 : i32
    %c0_i32_0 = arith.constant 0 : i32
    %c0_i32_1 = arith.constant 0 : i32
    return %arg0, %c0_i32, %c0_i32_0 : i32, i32, i32
  }
  func.func @transform_1(%arg0: i32) -> (i32, i32, i32) {
    %c0_i32 = arith.constant 0 : i32
    %c0_i32_0 = arith.constant 0 : i32
    %c0_i32_1 = arith.constant 0 : i32
    return %arg0, %c0_i32, %c0_i32_0 : i32, i32, i32
  }
  func.func @transform_2(%arg0: i32) -> (i32, i32, i32) {
    %c0_i32 = arith.constant 0 : i32
    %c0_i32_0 = arith.constant 0 : i32
    %c0_i32_1 = arith.constant 0 : i32
    return %arg0, %c0_i32, %c0_i32_0 : i32, i32, i32
  }
  func.func @transform_3(%arg0: i32) -> (i32, i32, i32) {
    %c0_i32 = arith.constant 0 : i32
    %c0_i32_0 = arith.constant 0 : i32
    %c0_i32_1 = arith.constant 0 : i32
    return %arg0, %c0_i32, %c0_i32_0 : i32, i32, i32
  }
  func.func @transform_4(%arg0: i32) -> (i32, i32) {
    %c0_i32 = arith.constant 0 : i32
    %c0_i32_0 = arith.constant 0 : i32
    %c0_i32_1 = arith.constant 0 : i32
    return %c0_i32, %c0_i32_0 : i32, i32
  }
  func.func @transform_5(%arg0: i32) -> (i32, i32) {
    %c0_i32 = arith.constant 0 : i32
    %c0_i32_0 = arith.constant 0 : i32
    %c0_i32_1 = arith.constant 0 : i32
    return %c0_i32, %c0_i32_0 : i32, i32
  }
  func.func @transform_6(%arg0: i32) -> (i32, i32) {
    %c0_i32 = arith.constant 0 : i32
    %c0_i32_0 = arith.constant 0 : i32
    %c0_i32_1 = arith.constant 0 : i32
    return %c0_i32, %c0_i32_0 : i32, i32
  }
  func.func @transform_7(%arg0: i32) -> (i32, i32) {
    %c0_i32 = arith.constant 0 : i32
    %c0_i32_0 = arith.constant 0 : i32
    %c0_i32_1 = arith.constant 0 : i32
    return %c0_i32, %c0_i32_0 : i32, i32
  }
  func.func @transform_8(%arg0: i32) -> (i32, i32) {
    %c0_i32 = arith.constant 0 : i32
    %c0_i32_0 = arith.constant 0 : i32
    %c0_i32_1 = arith.constant 0 : i32
    return %c0_i32, %c0_i32_0 : i32, i32
  }
  func.func @transform_9(%arg0: i32) -> (i32, i32) {
    %c0_i32 = arith.constant 0 : i32
    %c0_i32_0 = arith.constant 0 : i32
    %c0_i32_1 = arith.constant 0 : i32
    return %c0_i32, %c0_i32_0 : i32, i32
  }
  func.func @transform_10(%arg0: i32) -> (i32, i32) {
    %c0_i32 = arith.constant 0 : i32
    %c0_i32_0 = arith.constant 0 : i32
    %c0_i32_1 = arith.constant 0 : i32
    return %c0_i32, %c0_i32_0 : i32, i32
  }
  func.func @transform_11(%arg0: i32) -> (i32, i32) {
    %c0_i32 = arith.constant 0 : i32
    %c0_i32_0 = arith.constant 0 : i32
    %c0_i32_1 = arith.constant 0 : i32
    return %c0_i32, %c0_i32_0 : i32, i32
  }
  func.func @transform_12(%arg0: i32) -> (i32, i32) {
    %c0_i32 = arith.constant 0 : i32
    %c0_i32_0 = arith.constant 0 : i32
    %c0_i32_1 = arith.constant 0 : i32
    return %c0_i32, %c0_i32_0 : i32, i32
  }
  func.func @transform_13(%arg0: i32) -> (i32, i32) {
    %c0_i32 = arith.constant 0 : i32
    %c0_i32_0 = arith.constant 0 : i32
    %c0_i32_1 = arith.constant 0 : i32
    return %c0_i32, %c0_i32_0 : i32, i32
  }
  func.func @transform_14(%arg0: i32) -> (i32, i32) {
    %c0_i32 = arith.constant 0 : i32
    %c0_i32_0 = arith.constant 0 : i32
    %c0_i32_1 = arith.constant 0 : i32
    return %c0_i32, %c0_i32_0 : i32, i32
  }
  func.func @transform_15(%arg0: i32) -> (i32, i32) {
    %c0_i32 = arith.constant 0 : i32
    %c0_i32_0 = arith.constant 0 : i32
    %c0_i32_1 = arith.constant 0 : i32
    return %c0_i32, %c0_i32_0 : i32, i32
  }
  func.func @transform_16(%arg0: i32) -> (i32, i32) {
    %c0_i32 = arith.constant 0 : i32
    %c0_i32_0 = arith.constant 0 : i32
    %c0_i32_1 = arith.constant 0 : i32
    return %c0_i32, %c0_i32_0 : i32, i32
  }
  func.func @transform_17(%arg0: i32) -> (i32, i32) {
    %c0_i32 = arith.constant 0 : i32
    %c0_i32_0 = arith.constant 0 : i32
    %c0_i32_1 = arith.constant 0 : i32
    return %c0_i32, %c0_i32_0 : i32, i32
  }
  func.func @transform_18(%arg0: i32) -> (i32, i32) {
    %c0_i32 = arith.constant 0 : i32
    %c0_i32_0 = arith.constant 0 : i32
    %c0_i32_1 = arith.constant 0 : i32
    return %c0_i32, %c0_i32_0 : i32, i32
  }
  func.func @transform_19(%arg0: i32) -> (i32, i32) {
    %c0_i32 = arith.constant 0 : i32
    %c0_i32_0 = arith.constant 0 : i32
    %c0_i32_1 = arith.constant 0 : i32
    return %c0_i32, %c0_i32_0 : i32, i32
  }
  func.func @transform_20(%arg0: i32) -> (i32, i32, i32) {
    %c0_i32 = arith.constant 0 : i32
    %c0_i32_0 = arith.constant 0 : i32
    %c0_i32_1 = arith.constant 0 : i32
    return %arg0, %c0_i32, %c0_i32_0 : i32, i32, i32
  }
  func.func @transform_21(%arg0: i32) -> (i32, i32, i32) {
    %c0_i32 = arith.constant 0 : i32
    %c0_i32_0 = arith.constant 0 : i32
    %c0_i32_1 = arith.constant 0 : i32
    return %arg0, %c0_i32, %c0_i32_0 : i32, i32, i32
  }
  func.func @transform_22(%arg0: i32) -> (i32, i32, i32) {
    %c0_i32 = arith.constant 0 : i32
    %c0_i32_0 = arith.constant 0 : i32
    %c0_i32_1 = arith.constant 0 : i32
    return %arg0, %c0_i32, %c0_i32_0 : i32, i32, i32
  }
}

</mosaic_0001>

<bundles_post_ra>
// kernel: decoder_forward.1
= control target key start
LH: loop header
LB: loop body
LE: loop exit
PB: predicated region body
PF: predicated region fallthrough
CT: control target
= control target key end

     0   :  { %s6240_s0 = inlined_call_operand.vmem [shape: f32[4,8,32], index: 0, kind: input, shape index: {}]   ;;  %s6241_s1 = inlined_call_operand.vmem [shape: f32[4,8,32], index: 1, kind: input, shape index: {}]   ;;  %s6242_s2 = inlined_call_operand.vmem [shape: f32[4,2,32], index: 2, kind: input, shape index: {}]   ;;  %s6243_s3 = inlined_call_operand.vmem [shape: f32[4,2,32], index: 3, kind: input, shape index: {}]   ;;  %s6244_s4 = inlined_call_operand.vmem [shape: f32[32,32], index: 4, kind: input, shape index: {}]   ;;  %s6245_s5 = inlined_call_operand.vmem [shape: f32[1,32], index: 5, kind: input, shape index: {}]   ;;  %s6246_s6 = inlined_call_operand.vmem [shape: f32[32,32], index: 6, kind: input, shape index: {}]   ;;  %s6247_s7 = inlined_call_operand.vmem [shape: f32[1,32], index: 7, kind: input, shape index: {}]   ;;  %s6248_s8 = inlined_call_operand.vmem [shape: f32[32,32], index: 8, kind: input, shape index: {}]   ;;  %s6249_s9 = inlined_call_operand.vmem [shape: f32[1,32], index: 9, kind: input, shape index: {}]   ;;  %s6250_s10 = inlined_call_operand.vmem [shape: f32[32,32], index: 10, kind: input, shape index: {}]   ;;  %s6251_s11 = inlined_call_operand.vmem [shape: f32[1,32], index: 11, kind: input, shape index: {}]   ;;  %s6252_s12 = inlined_call_operand.vmem [shape: f32[64,128], index: 12, kind: input, shape index: {}]   ;;  %s6253_s13 = inlined_call_operand.vmem [shape: f32[32,128], index: 13, kind: input, shape index: {}]   ;;  %s6254_s14 = inlined_call_operand.vmem [shape: f32[1,128], index: 14, kind: input, shape index: {}]   ;;  %s6255_s15 = inlined_call_operand.vmem [shape: f32[32,128], index: 15, kind: input, shape index: {}]   ;;  %s6256_s16 = inlined_call_operand.vmem [shape: f32[32,128], index: 16, kind: input, shape index: {}]   ;;  %s6257_s17 = inlined_call_operand.vmem [shape: f32[1,128], index: 17, kind: input, shape index: {}]   ;;  %s6258_s18 = inlined_call_operand.vmem [shape: f32[32,128], index: 18, kind: input, shape index: {}]   ;;  %s6259_s19 = inlined_call_operand.vmem [shape: f32[1,128], index: 19, kind: input, shape index: {}]   ;;  %s6260_s20 = inlined_call_operand.vmem [shape: f32[4,8,128], index: 20, kind: output, shape index: {0}]   ;;  %s6261_s21 = inlined_call_operand.vmem [shape: f32[4,2,32], index: 21, kind: output, shape index: {1}]   ;;  %s6262_s22 = inlined_call_operand.vmem [shape: f32[4,2,32], index: 22, kind: output, shape index: {2}]  }
   0x1   :  { %6270 = sst [smem:[#allocation4_spill]] %s6240_s0 }
   0x2   :  { %6271 = sst [smem:[#allocation5_spill]] %s6241_s1 }
   0x3   :  { %6272 = sst [smem:[#allocation6_spill]] %s6242_s2 }
   0x4   :  { %6273 = sst [smem:[#allocation7_spill]] %s6243_s3  ;;  %s5004_s3 = smov 0  }
   0x5   :  { %6274 = sst [smem:[#allocation8_spill]] %s6244_s4 }
   0x6   :  { %6275 = sst [smem:[#allocation9_spill]] %s6245_s5 }
   0x7   :  { %6276 = sst [smem:[#allocation10_spill]] %s6246_s6 }
   0x8 LB: > { %6277 = sst [smem:[#allocation3_spill]] %s4884_s3  ;;  %s4397_s28 = sadd.s32 4294967295, %s4884_s3   ;;  %s4884_s3 = sphi %s5004_s3, %s33_s3  }
   0x9   : > { %p4401_p0 = scmp.ge.s32.totalorder %s4884_s3, 1  ;;  %p651_p1 = scmp.lt.s32.totalorder %s4884_s3, 3 }
   0xb   : > { %p652_p2 = pnand %p4401_p0, %p651_p1 }
   0xc   : > { %s6278_s4 = sld [smem:[#allocation10_spill]] (!%p652_p2)  ;;  %s4402_s24 = sshll.u32 (!%p652_p2), %s4397_s28, 1 }
   0xd   : > { %655 = sbr.rel (%p652_p2) target bundleno = 15840 (0x3de0), region = 100  ;;  %p739_p3 = scmp.lt.s32.totalorder (!%p652_p2), %s4402_s24, 3 }
   0xe   : > { %s6279_s6 = sld [smem:[#allocation8_spill]] (!%p652_p2)  ;;  %s6268_s2 = smov (!%p652_p2), 32  }
   0xf   : > { %s6280_s29 = sld [smem:[#allocation5_spill]] (!%p652_p2)  ;;  %s4887_s0 = smov (!%p652_p2), 64  }
  0x10   : > { %s6281_s23 = sld [smem:[#allocation4_spill]] (!%p652_p2) }
  0x12   : > { %v788_v0 = vld [vmem:[%s6278_s4 + $0x18] sm:$0xff]  ;;  %v787_v2 = vld [vmem:[%s6278_s4 + $0x10] sm:$0xff]  ;;  %v786_v4 = vld [vmem:[%s6278_s4 + $0x8] sm:$0xff]  ;;  %s6288_s24 = smov (!%p739_p3, %s4402_s24), 3  ;;  %vm832_vm0 = vcmask 261120   ;;  %vm932_vm1 = vcmask 1041409  }
  0x13   : > { %v803_v1 = vld [vmem:[%s6252_s12 + $0x18] sm:$0xff]  ;;  %851 = vmatpush.msra.mxu0 %v788_v0  ;;  %v802_v3 = vld [vmem:[%s6252_s12 + $0x10] sm:$0xff]  ;;  %v801_v5 = vld [vmem:[%s6252_s12 + $0x8] sm:$0xff]  ;;  %s5041_s25 = sshll.u32 %s6288_s24, 3  ;;  %s5043_s26 = sshll.u32 %s6288_s24, 1  ;;  %vm1010_vm2 = vcmask 57344  }
  0x14   : > { %4546 = vmatpush.msra.mxu3 %v803_v1  ;;  %911 = vmatpush.msra.mxu2 %v803_v1  ;;  %v785_v6 = vld [vmem:[%s6278_s4] sm:$0xff]  ;;  %v5039_v8 = vld [vmem:[%s6279_s6 + $0x18] sm:$0xff]  ;;  %s6282_s24 = sld [smem:[#allocation6_spill]]  ;;  %v5065_v11 = vld [vmem:[%s6279_s6 + $0x10] sm:$0xff]  ;;  %vm1033_vm3 = vcmask 64512   ;;  %s766_s28 = scalar_lea.vmem %s6260_s20, %s5041_s25 }
  0x15   : > { %852 = vmatpush.msra.mxu0 %v787_v2  ;;  %v800_v7 = vld [vmem:[%s6252_s12] sm:$0xff]  ;;  %s748_s30 = scalar_lea.vmem %s6280_s29, %s5041_s25  ;;  %v5074_v14 = vld [vmem:[%s6279_s6 + $0x8] sm:$0xff]  ;;  %v793_v29 = vld [vmem:[%s6248_s8 + $0x18] sm:$0xff] }
  0x16   : > { %4547 = vmatpush.msra.mxu3 %v802_v3  ;;  %912 = vmatpush.msra.mxu2 %v802_v3  ;;  %s5053_s1 = scalar_lea.vmem %s6281_s23, %s5041_s25  ;;  %v827_v9 = vld [vmem:[%s748_s30] sm:$0xff]  ;;  %v828_v17 = vld [vmem:[%s748_s30 + $0x8] sm:$0xff]  ;;  %v792_v30 = vld [vmem:[%s6248_s8 + $0x10] sm:$0xff]  ;;  %s6284_s30 = sld [smem:[#allocation7_spill]] }
  0x17   : > { %853 = vmatpush.msra.mxu0 %v786_v4  ;;  %v889_v10 = vld [vmem:[%s5053_s1 + $0x8] sm:$0xff]  ;;  %v5082_v16 = vld [vmem:[%s6279_s6] sm:$0xff]  ;;  %877 = vmatpush.msra.mxu1 %v793_v29  ;;  %v5145_v55 = vld [vmem:[%s6256_s16 + $0x18] sm:$0xff] }
  0x18   : > { %4548 = vmatpush.msra.mxu3 %v801_v5  ;;  %913 = vmatpush.msra.mxu2 %v801_v5  ;;  %v4561_v19 = vld [vmem:[%s6247_s7] ss:$0 sm:$0xff]  ;;  %v791_v31 = vld [vmem:[%s6248_s8 + $0x8] sm:$0xff]  ;;  %v5151_v56 = vld [vmem:[%s6256_s16 + $0x10] sm:$0xff] }
  0x19   : > { %854 = vmatpush.msra.mxu0 %v785_v6  ;;  %878 = vmatpush.msra.mxu1 %v792_v30  ;;  %v790_v32 = vld [vmem:[%s6248_s8] sm:$0xff]  ;;  %v5157_v57 = vld [vmem:[%s6256_s16 + $0x8] sm:$0xff]  ;;  %v5170_v59 = vld [vmem:[%s6253_s13 + $0x18] sm:$0xff] }
  0x1a   : > { %4549 = vmatpush.msra.mxu3 %v800_v7  ;;  %s754_s3 = scalar_lea.vmem %s6282_s24, %s5043_s26  ;;  %4416 = vmatmul.msk.f32.vlgmr.msra.gmra.mxu0 %vm832_vm0, %v827_v9  ;;  %s6283_s24 = sld [smem:[#allocation9_spill]]  ;;  %v4564_v39 = vld [vmem:[%s6249_s9] ss:$0 sm:$0xff]  ;;  %v5175_v60 = vld [vmem:[%s6253_s13 + $0x10] sm:$0xff]  ;;  %v5181_v61 = vld [vmem:[%s6253_s13 + $0x8] sm:$0xff] }
  0x1b   : > { %4421 = vmatmul.msk.f32.vlgmr.msra.gmra.mxu3 %vm832_vm0, %v889_v10  ;;  %v5067_v12 = vld [vmem:[%s754_s3] sm:$0x3]  ;;  %914 = vmatpush.msra.mxu2 %v800_v7  ;;  %v5076_v15 = vld [vmem:[%s754_s3 + $0x2] sm:$0x3]  ;;  %v5194_v63 = vld [vmem:[%s6250_s10 + $0x18] sm:$0xff] }
  0x1c   : > { %948 = vmatpush.msrb.mxu3 %v5039_v8  ;;  %v931_v13 = vrot.slane %v5067_v12, 1  ;;  %879 = vmatpush.msra.mxu1 %v791_v31  ;;  %v888_v54 = vld [vmem:[%s5053_s1] sm:$0xff]  ;;  %v5208_v6 = vld [vmem:[%s6250_s10 + $0x10] sm:$0xff]  ;;  %v5213_v7 = vld [vmem:[%s6250_s10 + $0x8] sm:$0xff]  ;;  %s760_s5 = scalar_lea.vmem %s6284_s30, %s5043_s26  ;;  %s778_s30 = scalar_lea.vmem %s6262_s22, %s5043_s26 }
  0x1d   : > { %4420 = vmatmul.msk.f32.vlgmr.msra.gmra.mxu2 %vm832_vm0, %v888_v54  ;;  %v5164_v58 = vld [vmem:[%s6256_s16] sm:$0xff]  ;;  %v5225_v10 = vld [vmem:[%s6255_s15 + $0x18] sm:$0xff] }
  0x1e   : > { %949 = vmatpush.msrb.mxu3 %v5065_v11  ;;  %v5087_v18 = vsel %vm932_vm1, %v5076_v15, %v931_v13  ;;  %880 = vmatpush.msra.mxu1 %v790_v32  ;;  %v5187_v62 = vld [vmem:[%s6253_s13] sm:$0xff]  ;;  %v5231_v13 = vld [vmem:[%s6255_s15 + $0x10] sm:$0xff]  ;;  %v1138_v32 = vrot.slane %v5076_v15, 7 }
  0x1f   : > { %4418 = vmatmul.msk.f32.vlgmr.msra.gmra.mxu1 %vm832_vm0, %v827_v9  ;;  %v5219_v9 = vld [vmem:[%s6250_s10] sm:$0xff] }
  0x20   : > { %950 = vmatpush.msrb.mxu3 %v5074_v14  ;;  %v5109_v25 = vld [vmem:[%s6283_s24] ss:$0 sm:$0xff] }
  0x22   : > { %951 = vmatpush.msrb.mxu3 %v5082_v16  ;;  %4417 = vmatmul.msk.f32.gmra.mxu0 %vm832_vm0, %v828_v17 }
  0x23   : > { %4422 = vmatmul.msk.f32.vlgmr.msrb.gmra.mxu3 %vm832_vm0, %v5087_v18 }
  0x27   : > { %4419 = vmatmul.msk.f32.gmra.mxu1 %vm832_vm0, %v828_v17  ;;  %v5238_v17 = vld [vmem:[%s6255_s15 + $0x8] sm:$0xff] }
  0x97   : > { %v856_v20 = vpop.f32.mrf.mxu0 }
  0x98   : > { %v5096_v21 = vadd.f32 %v4561_v19, %v856_v20  ;;  %v5255_v20 = vld [vmem:[%s6252_s12 + $0x30] sm:$0xff] }
  0x9a   : > { %4423 = vmatpush.xpose.msk.msra.mxu3 %vm832_vm0, %v5096_v21 }
  0x9c   : > { %v882_v40 = vpop.f32.mrf.mxu1 }
  0x9d   : > { %v5133_v41 = vadd.f32 %v4564_v39, %v882_v40 }
  0x9e   : > { %v5100_v22 = vpop.f32.mrf.mxu3  ;;  %1101 = vmatpush.msrb.mxu3 %v5194_v63 }
  0x9f   : > { %v859_v23 = vpop.f32.mrf.mxu0  ;;  %1052 = vmatpush.msrb.mxu1 %v5133_v41 }
  0xa0   : > { %v5102_v24 = vadd.f32 %v4561_v19, %v859_v23  ;;  %1102 = vmatpush.msrb.mxu3 %v5208_v6  ;;  %v5250_v19 = vld [vmem:[%s6252_s12 + $0x38] sm:$0xff]  ;;  %v5262_v23 = vld [vmem:[%s6252_s12 + $0x28] sm:$0xff] }
  0xa1   : > { %1154 = vmatpush.msra.mxu1 %v5170_v59 }
  0xa2   : > { %4425 = vmatpush.xpose.msk.msrb.mxu0 %vm832_vm0, %v5102_v24  ;;  %1103 = vmatpush.msrb.mxu3 %v5213_v7 }
  0xa3   : > { %1155 = vmatpush.msra.mxu1 %v5175_v60 }
  0xa4   : > { %v885_v44 = vpop.f32.mrf.mxu1  ;;  %1104 = vmatpush.msrb.mxu3 %v5219_v9 }
  0xa5   : > { %v5136_v46 = vadd.f32 %v4564_v39, %v885_v44  ;;  %1156 = vmatpush.msra.mxu1 %v5181_v61 }
  0xa6   : > { %v953_v26 = vpop.f32.mrf.mxu3  ;;  %1124 = vmatpush.msra.mxu0 %v5250_v19 }
  0xa7   : > { %v954_v27 = vadd.f32 %v5109_v25, %v953_v26  ;;  %1075 = vmatpush.msrb.mxu2 %v5136_v46  ;;  %1157 = vmatpush.msra.mxu1 %v5187_v62  ;;  %v5269_v26 = vld [vmem:[%s6252_s12 + $0x20] sm:$0xff] }
  0xa8   : > { %1125 = vmatpush.msra.mxu0 %v5255_v20 }
  0xa9   : > { %v957_v28 = vrot.slane %v954_v27, 1  ;;  %4424 = vmatmul.msk.f32.vlgmr.msra.gmra.mxu3 %vm832_vm0, %v954_v27  ;;  %1262 = vmatpush.msra.mxu2 %v5145_v55  ;;  %v916_v27 = vpop.f32.mrf.mxu2 }
  0xaa   : > { %1290 = vmatpush.msra.mxu3 %v5225_v10  ;;  %1126 = vmatpush.msra.mxu0 %v5262_v23 }
  0xab   : > { %4426 = vmatmul.msk.f32.vlgmr.msrb.gmra.mxu0 %vm832_vm0, %v957_v28  ;;  %1263 = vmatpush.msra.mxu2 %v5151_v56 }
  0xac   : > { %1291 = vmatpush.msra.mxu3 %v5231_v13  ;;  %1127 = vmatpush.msra.mxu0 %v5269_v26 }
  0xad   : > { %1264 = vmatpush.msra.mxu2 %v5157_v57 }
  0xae   : > { %1292 = vmatpush.msra.mxu3 %v5238_v17  ;;  %1373 = vmatpush.msrb.mxu0 %v5039_v8 }
  0xaf   : > { %1265 = vmatpush.msra.mxu2 %v5164_v58 }
  0xb0   : > { %1374 = vmatpush.msrb.mxu0 %v5065_v11 }
  0xb2   : > { %1375 = vmatpush.msrb.mxu0 %v5074_v14 }
  0xb4   : > { %1376 = vmatpush.msrb.mxu0 %v5082_v16 }
 0x128   : > { %v1005_v33 = vpop.f32.mrf.mxu0 }
 0x129   : > { %v1009_v34 = vmul.f32 0.17677669, %v1005_v33  ;;  %v1139_v33 = vsel %vm932_vm1, %v1138_v32, %v5067_v12  ;;  %v5305_v12 = vld [vmem:[%s6251_s11] ss:$0 sm:$0xff] }
 0x12b   : > { %v1014_v35 = vsel %vm1010_vm2, %v1009_v34, -inf }
 0x12c   : > { %1015 = vmax.xlane.f32.xlu0 %v1014_v35  ;;  %v980_v36 = vpop.f32.mrf.mxu3  ;;  %v5291_v35 = vld [vmem:[%s760_s5 + $0x2] sm:$0x3] }
 0x12d   : > { %v1008_v37 = vmul.f32 0.17677669, %v980_v36 }
 0x12f   : > { %v1011_v38 = vsel %vm1010_vm2, %v1008_v37, -inf }
 0x134   : > { %1012 = vmax.xlane.f32.xlu0 %v1011_v38 }
 0x148   : > { %1212 = vrot.lane.b32.xlu0 %v5291_v35, %s6268_s2 }
 0x19f   : > { %v1016_v42 = vpop.xlane.xlu0 %1015 }
 0x1a0   : > { %v1018_v43 = vsub.f32 %v1009_v34, %v1016_v42  ;;  %v5289_v34 = vld [vmem:[%s760_s5] sm:$0x3]  ;;  %s772_s5 = scalar_lea.vmem %s6261_s21, %s5043_s26 }
 0x1a2   : > { %v1021_v45 = vmul.f32 1.442695, %v1018_v43 }
 0x1a4   : > { %4568 = vpow2.f32 %v1021_v45 }
 0x1a7   : > { %v1013_v47 = vpop.xlane.xlu0 %1012 }
 0x1a8   : > { %v1017_v48 = vsub.f32 %v1008_v37, %v1013_v47  ;;  %v4562_v37 = vld [vmem:[%s6254_s14] ss:$0 sm:$0xff] }
 0x1a9   : > { %v5314_v40 = vadd.f32 %v4562_v37, %v5100_v22  ;;  %v5317_v47 = vadd.f32 %v4562_v37, %v916_v27 }
 0x1aa   : > { %v4569_v49 = vpop.eup %4568  ;;  %v1019_v50 = vmul.f32 1.442695, %v1017_v48 }
 0x1ab   : > { %v1026_v51 = vsel %vm1010_vm2, %v4569_v49, 0.0 }
 0x1ac   : > { %4570 = vpow2.f32 %v1019_v50  ;;  %1027 = vadd.xlane.f32.xlu1 %v1026_v51 }
 0x1b2   : > { %v4571_v52 = vpop.eup %4570 }
 0x1b3   : > { %v1023_v53 = vsel %vm1010_vm2, %v4571_v52, 0.0 }
 0x1b4   : > { %1024 = vadd.xlane.f32.xlu1 %v1023_v53 }
 0x1cd   : > { %1210 = vrot.lane.b32.xlu1 %v5289_v34, %s6268_s2 }
 0x21f   : > { %v1028_v0 = vpop.xlane.xlu1 %1027 }
 0x220   : > { %4572 = vrcp.f32 %v1028_v0 }
 0x226   : > { %v4573_v1 = vpop.eup %4572 }
 0x227   : > { %v1025_v2 = vpop.xlane.xlu1 %1024  ;;  %v1032_v3 = vmul.f32 %v4573_v1, %v4569_v49 }
 0x228   : > { %4574 = vrcp.f32 %v1025_v2 }
 0x229   : > { %4428 = vmatmul.msk.f32.vlgmr.msrb.gmra.mxu2 %vm1033_vm3, %v1032_v3 }
 0x22a   : > { %4440 = vmatpush.xpose.msk.msrb.mxu2 %vm832_vm0, %v5102_v24 }
 0x22e   : > { %v4575_v4 = vpop.eup %4574 }
 0x22f   : > { %v1031_v5 = vmul.f32 %v4575_v4, %v4571_v52 }
 0x231   : > { %4427 = vmatmul.msk.f32.vlgmr.msrb.gmra.mxu1 %vm1033_vm3, %v1031_v5  ;;  %4434 = vmatmul.msk.f32.vlgmr.msra.gmra.mxu2 %vm832_vm0, %v5087_v18  ;;  %v5244_v18 = vld [vmem:[%s6255_s15] sm:$0xff] }
 0x232   : > { %4438 = vmatpush.xpose.msk.msrb.mxu1 %vm832_vm0, %v5096_v21  ;;  %1293 = vmatpush.msra.mxu3 %v5244_v18 }
 0x233   : > { %1538 = vmatpush.msra.mxu2 %v5250_v19 }
 0x235   : > { %1539 = vmatpush.msra.mxu2 %v5255_v20 }
 0x237   : > { %1540 = vmatpush.msra.mxu2 %v5262_v23 }
 0x239   : > { %1541 = vmatpush.msra.mxu2 %v5269_v26  ;;  %4431 = vmatmul.msk.f32.vlgmr.msra.gmra.mxu1 %vm832_vm0, %v1139_v33 }
 0x23a   : > { %1515 = vmatpush.msra.mxu1 %v5194_v63 }
 0x23c   : > { %1516 = vmatpush.msra.mxu1 %v5208_v6 }
 0x23e   : > { %1517 = vmatpush.msra.mxu1 %v5213_v7 }
 0x240   : > { %1518 = vmatpush.msra.mxu1 %v5219_v9 }
 0x2ac   : > { %v1077_v28 = vpop.f32.mrf.mxu2 }
 0x2ad   : > { %v1085_v29 = vrot.slane %v1077_v28, 7 }
 0x2ae   : > { %v1054_v30 = vpop.f32.mrf.mxu1 }
 0x2af   : > { %v1086_v31 = vsel %vm932_vm1, %v1085_v29, %v1054_v30 }
 0x2b0   : > { %4429 = vmatmul.msk.f32.vlgmr.msrb.gmra.mxu3 %vm832_vm0, %v1086_v31 }
 0x2b1   : > { %1469 = vmatpush.msrb.mxu3 %v5133_v41 }
 0x2b6   : > { %v1159_v38 = vpop.f32.mrf.mxu1 }
 0x2b7   : > { %v1163_v43 = vrot.slane %v1159_v38, 1 }
 0x333   : > { %v1106_v15 = vpop.f32.mrf.mxu3 }
 0x334   : > { %v1107_v36 = vadd.f32 %v5305_v12, %v1106_v15 }
 0x336   : > { %4430 = vmatmul.msk.f32.vlgmr.msra.gmra.mxu0 %vm832_vm0, %v1107_v36 }
 0x337   : > { %1492 = vmatpush.msra.mxu0 %v5136_v46 }
 0x3b3   : > { %v1129_v39 = vpop.f32.mrf.mxu0 }
 0x3b4   : > { %v1133_v42 = vrot.slane %v1129_v39, 1  ;;  %v1136_v48 = vadd.f32 %v1129_v39, %v5317_v47 }
 0x3b6   : > { %v1137_v44 = vadd.f32 %v1133_v42, %v5314_v40  ;;  %v1166_v49 = vadd.f32 %v1159_v38, %v1136_v48 }
 0x3b8   : > { %v1167_v45 = vadd.f32 %v1163_v43, %v1137_v44  ;;  %v4432_v52 = vmul.f32 -1.442695, %v1166_v49 }
 0x3ba   : > { %4576 = vtanh.f32 %v1167_v45  ;;  %v4433_v22 = vmul.f32 -1.442695, %v1167_v45 }
 0x3bb   : > { %4578 = vtanh.f32 %v1166_v49 }
 0x3bc   : > { %4580 = vpow2.f32 %v4433_v22  ;;  %v1213_v22 = vpop.permute.xlu0 %1212 }
 0x3bd   : > { %4582 = vpow2.f32 %v4432_v52 }
 0x3c0   : > { %v4577_v50 = vpop.eup %4576 }
 0x3c1   : > { %1222 = vrot.lane.b32.xlu2 %v4577_v50, %s4887_s0  ;;  %v4579_v51 = vpop.eup %4578 }
 0x3c2   : > { %v4581_v53 = vpop.eup %4580 }
 0x3c3   : > { %v1175_v54 = vadd.f32 1.0, %v4581_v53  ;;  %v4583_v0 = vpop.eup %4582 }
 0x3c4   : > { %v1174_v1 = vadd.f32 1.0, %v4583_v0  ;;  %v1211_v0 = vpop.permute.xlu1 %1210 }
 0x3c5   : > { %4584 = vrcp.f32 %v1175_v54  ;;  %v1202_v31 = vand.u32 2147483648, %v1175_v54  ;;  %vm1196_vm5 = vweird.f32 %v1175_v54  ;;  %v1200_v32 = vand.u32 2147483647, %v1175_v54 }
 0x3c6   : > { %4586 = vrcp.f32 %v1174_v1  ;;  %v1187_v43 = vand.u32 2147483648, %v1174_v1  ;;  %vm1181_vm9 = vweird.f32 %v1174_v1  ;;  %v1185_v44 = vand.u32 2147483647, %v1174_v1 }
 0x3c7   : > { %v1203_v36 = vor.u32 1.1754944e-38, %v1202_v31  ;;  %vm1201_vm7 = vcmp.eq.f32.partialorder %v1200_v32, 8.507059e+37 }
 0x3c8   : > { %v1188_v48 = vor.u32 1.1754944e-38, %v1187_v43  ;;  %vm1186_vm11 = vcmp.eq.f32.partialorder %v1185_v44, 8.507059e+37 }
 0x3c9   : > { %1220 = vrot.lane.b32.xlu2 %v4579_v51, %s4887_s0 }
 0x3cb   : > { %v4585_v2 = vpop.eup %4584 }
 0x3cc   : > { %v1192_v3 = vmul.f32 %v4585_v2, %v1175_v54  ;;  %v4587_v5 = vpop.eup %4586  ;;  %vm1197_vm4 = vweird.f32 %v4585_v2 }
 0x3cd   : > { %v1177_v27 = vmul.f32 %v4587_v5, %v1174_v1  ;;  %vm1198_vm6 = vmor %vm1196_vm5, %vm1197_vm4  ;;  %vm1182_vm8 = vweird.f32 %v4587_v5 }
 0x3ce   : > { %v1193_v4 = vsub.f32 1.0, %v1192_v3  ;;  %vm1183_vm10 = vmor %vm1181_vm9, %vm1182_vm8 }
 0x3cf   : > { %v1178_v29 = vsub.f32 1.0, %v1177_v27 }
 0x3d0   : > { %v1194_v28 = vmul.f32 %v4585_v2, %v1193_v4 }
 0x3d1   : > { %v1179_v33 = vmul.f32 %v4587_v5, %v1178_v29 }
 0x3d2   : > { %v1195_v30 = vadd.f32 %v4585_v2, %v1194_v28 }
 0x3d3   : > { %v1180_v39 = vadd.f32 %v4587_v5, %v1179_v33  ;;  %v1322_v33 = vrot.slane %v5289_v34, 1  ;;  %v5349_v34 = vld [vmem:[%s6257_s17] ss:$0 sm:$0xff] }
 0x3d4   : > { %v1199_v15 = vsel %vm1198_vm6, %v4585_v2, %v1195_v30 }
 0x3d5   : > { %v1204_v37 = vsel %vm1201_vm7, %v1203_v36, %v1199_v15  ;;  %v1184_v45 = vsel %vm1183_vm10, %v4587_v5, %v1180_v39  ;;  %v1323_v15 = vsel %vm932_vm1, %v5291_v35, %v1322_v33 }
 0x3d6   : > { %v1189_v49 = vsel %vm1186_vm11, %v1188_v48, %v1184_v45  ;;  %v1217_v52 = vmul.f32 %v1213_v22, %v1204_v37 }
 0x3d7   : > { %v1216_v1 = vmul.f32 %v1211_v0, %v1189_v49 }
 0x41b   : > { %v1223_v38 = vpop.permute.xlu2 %1222 }
 0x41c   : > { %v1227_v42 = vmul.f32 %v1223_v38, %v1204_v37 }
 0x41e   : > { %1232 = vrot.lane.b32.xlu2 %v1227_v42, %s6268_s2 }
 0x423   : > { %v1221_v50 = vpop.permute.xlu2 %1220 }
 0x424   : > { %v1226_v51 = vmul.f32 %v1221_v50, %v1189_v49 }
 0x426   : > { %1230 = vrot.lane.b32.xlu2 %v1226_v51, %s6268_s2 }
 0x478   : > { %v1233_v53 = vpop.permute.xlu2 %1232 }
 0x479   : > { %v5324_v54 = vadd.f32 %v1233_v53, %v1217_v52 }
 0x47b   : > { %4588 = vtanh.f32 %v5324_v54 }
 0x480   : > { %v1231_v2 = vpop.permute.xlu2 %1230 }
 0x481   : > { %v4589_v3 = vpop.eup %4588  ;;  %v5327_v4 = vadd.f32 %v1231_v2, %v1216_v1 }
 0x482   : > { %1244 = vrot.lane.b32.xlu2 %v4589_v3, %s4887_s0 }
 0x483   : > { %4590 = vtanh.f32 %v5327_v4 }
 0x489   : > { %v4591_v5 = vpop.eup %4590 }
 0x48a   : > { %1242 = vrot.lane.b32.xlu0 %v4591_v5, %s4887_s0 }
 0x492   : > { %1324 = vrot.lane.b32.xlu0 %v1323_v15, %s6268_s2 }
 0x4dc   : > { %v1245_v27 = vpop.permute.xlu2 %1244 }
 0x4dd   : > { %v1249_v28 = vmul.f32 %v1245_v27, %v1204_v37  ;;  %v1267_v37 = vpop.f32.mrf.mxu2 }
 0x4df   : > { %v1272_v30 = vrot.slane %v1249_v28, 7 }
 0x4fc   : > { %v1243_v29 = vpop.permute.xlu0 %1242 }
 0x4fd   : > { %v1248_v31 = vmul.f32 %v1243_v29, %v1189_v49 }
 0x4ff   : > { %v1273_v32 = vsel %vm932_vm1, %v1272_v30, %v1248_v31 }
 0x500   : > { %1274 = vrot.lane.b32.xlu2 %v1273_v32, %s6268_s2 }
 0x504   : > { %v1325_v27 = vpop.permute.xlu0 %1324 }
 0x55a   : > { %v5338_v36 = vpop.permute.xlu2 %1274 }
 0x55b   : > { %4435 = vmatmul.msk.f32.vlgmr.msra.gmra.mxu3 %vm832_vm0, %v5338_v36 }
 0x55c   : > { %1564 = vmatpush.msra.mxu3 %v5170_v59 }
 0x55e   : > { %1565 = vmatpush.msra.mxu3 %v5175_v60 }
 0x560   : > { %1566 = vmatpush.msra.mxu3 %v5181_v61 }
 0x562   : > { %1567 = vmatpush.msra.mxu3 %v5187_v62 }
 0x5de   : > { %v1295_v35 = vpop.f32.mrf.mxu3 }
 0x5df   : > { %v1296_v38 = vadd.f32 %v1295_v35, %v1267_v37 }
 0x5e1   : > { %v1301_v39 = vadd.f32 %v5349_v34, %v1296_v38 }
 0x5e3   : > { %4592 = vtanh.f32 %v1301_v39  ;;  %v4436_v43 = vmul.f32 -1.442695, %v1301_v39 }
 0x5e5   : > { %4594 = vpow2.f32 %v4436_v43 }
 0x5e9   : > { %v4593_v42 = vpop.eup %4592 }
 0x5ea   : > { %1329 = vrot.lane.b32.xlu1 %v4593_v42, %s4887_s0 }
 0x5eb   : > { %v4595_v44 = vpop.eup %4594 }
 0x5ec   : > { %v1305_v45 = vadd.f32 1.0, %v4595_v44 }
 0x5ee   : > { %4596 = vrcp.f32 %v1305_v45  ;;  %v1317_v52 = vand.u32 2147483648, %v1305_v45  ;;  %vm1311_vm13 = vweird.f32 %v1305_v45  ;;  %v1315_v53 = vand.u32 2147483647, %v1305_v45 }
 0x5f0   : > { %v1318_v1 = vor.u32 1.1754944e-38, %v1317_v52  ;;  %vm1316_vm15 = vcmp.eq.f32.partialorder %v1315_v53, 8.507059e+37 }
 0x5f4   : > { %v4597_v48 = vpop.eup %4596 }
 0x5f5   : > { %v1307_v49 = vmul.f32 %v4597_v48, %v1305_v45  ;;  %vm1312_vm12 = vweird.f32 %v4597_v48 }
 0x5f6   : > { %vm1313_vm14 = vmor %vm1311_vm13, %vm1312_vm12 }
 0x5f7   : > { %v1308_v50 = vsub.f32 1.0, %v1307_v49 }
 0x5f9   : > { %v1309_v51 = vmul.f32 %v4597_v48, %v1308_v50 }
 0x5fb   : > { %v1310_v22 = vadd.f32 %v4597_v48, %v1309_v51 }
 0x5fd   : > { %v1314_v0 = vsel %vm1313_vm14, %v4597_v48, %v1310_v22 }
 0x5fe   : > { %v1319_v2 = vsel %vm1316_vm15, %v1318_v1, %v1314_v0 }
 0x5ff   : > { %v1327_v28 = vmul.f32 %v1325_v27, %v1319_v2 }
 0x65c   : > { %v1330_v3 = vpop.permute.xlu1 %1329 }
 0x65d   : > { %v1332_v5 = vmul.f32 %v1330_v3, %v1319_v2 }
 0x65f   : > { %1334 = vrot.lane.b32.xlu2 %v1332_v5, %s6268_s2 }
 0x6b9   : > { %v1335_v29 = vpop.permute.xlu2 %1334 }
 0x6ba   : > { %v5354_v30 = vadd.f32 %v1335_v29, %v1327_v28 }
 0x6bc   : > { %4598 = vtanh.f32 %v5354_v30 }
 0x6c2   : > { %v4599_v31 = vpop.eup %4598 }
 0x6c3   : > { %1340 = vrot.lane.b32.xlu1 %v4599_v31, %s4887_s0 }
 0x735   : > { %v1341_v32 = vpop.permute.xlu1 %1340 }
 0x736   : > { %v5358_v33 = vmul.f32 %v1341_v32, %v1319_v2 }
 0x738   : > { %1357 = vrot.lane.b32.xlu0 %v5358_v33, %s6268_s2 }
 0x7aa   : > { %v1358_v15 = vpop.permute.xlu0 %1357 }
 0x7ab   : > { %4437 = vmatmul.msk.f32.vlgmr.msrb.gmra.mxu0 %vm832_vm0, %v1358_v15 }
 0x7ac   : > { %1670 = vmatpush.msrb.mxu0 %v5145_v55 }
 0x7ae   : > { %1671 = vmatpush.msrb.mxu0 %v5151_v56 }
 0x7b0   : > { %1672 = vmatpush.msrb.mxu0 %v5157_v57 }
 0x7b2   : > { %1673 = vmatpush.msrb.mxu0 %v5164_v58 }
 0x828   : > { %v1378_v37 = vpop.f32.mrf.mxu0 }
 0x829   : > { %v1379_v35 = vadd.f32 %v5109_v25, %v1378_v37 }
 0x82b   : > { %v1382_v38 = vrot.slane %v1379_v35, 1  ;;  %4439 = vmatmul.msk.f32.vlgmr.msrb.gmra.mxu1 %vm832_vm0, %v1379_v35 }
 0x82c   : > { %1698 = vmatpush.msrb.mxu1 %v5225_v10 }
 0x82d   : > { %4441 = vmatmul.msk.f32.vlgmr.msrb.gmra.mxu2 %vm832_vm0, %v1382_v38 }
 0x82e   : > { %1699 = vmatpush.msrb.mxu1 %v5231_v13  ;;  %1772 = vmatpush.msrb.mxu2 %v5039_v8 }
 0x830   : > { %1700 = vmatpush.msrb.mxu1 %v5238_v17  ;;  %1773 = vmatpush.msrb.mxu2 %v5065_v11 }
 0x832   : > { %1701 = vmatpush.msrb.mxu1 %v5244_v18  ;;  %1774 = vmatpush.msrb.mxu2 %v5074_v14 }
 0x834   : > { %1775 = vmatpush.msrb.mxu2 %v5082_v16 }
 0x8a8   : > { %v1402_v39 = vpop.f32.mrf.mxu1 }
 0x8a9   : > { %v1427_v42 = vmul.f32 0.17677669, %v1402_v39 }
 0x8ab   : > { %v1429_v43 = vsel %vm1010_vm2, %v1427_v42, -inf }
 0x8ac   : > { %1430 = vmax.xlane.f32.xlu2 %v1429_v43 }
 0x8b0   : > { %v1424_v44 = vpop.f32.mrf.mxu2 }
 0x8b1   : > { %v1428_v45 = vmul.f32 0.17677669, %v1424_v44 }
 0x8b3   : > { %v1432_v48 = vsel %vm1010_vm2, %v1428_v45, -inf }
 0x8b4   : > { %1433 = vmax.xlane.f32.xlu1 %v1432_v48 }
 0x91f   : > { %v1431_v8 = vpop.xlane.xlu2 %1430 }
 0x920   : > { %v1435_v49 = vsub.f32 %v1427_v42, %v1431_v8 }
 0x922   : > { %v1437_v50 = vmul.f32 1.442695, %v1435_v49 }
 0x924   : > { %4600 = vpow2.f32 %v1437_v50 }
 0x927   : > { %v1434_v51 = vpop.xlane.xlu1 %1433 }
 0x928   : > { %v1436_v22 = vsub.f32 %v1428_v45, %v1434_v51 }
 0x92a   : > { %v4601_v52 = vpop.eup %4600  ;;  %v1439_v53 = vmul.f32 1.442695, %v1436_v22 }
 0x92b   : > { %v1441_v0 = vsel %vm1010_vm2, %v4601_v52, 0.0 }
 0x92c   : > { %4602 = vpow2.f32 %v1439_v53  ;;  %1442 = vadd.xlane.f32.xlu0 %v1441_v0 }
 0x932   : > { %v4603_v1 = vpop.eup %4602 }
 0x933   : > { %v1444_v2 = vsel %vm1010_vm2, %v4603_v1, 0.0 }
 0x934   : > { %1445 = vadd.xlane.f32.xlu2 %v1444_v2 }
 0x99f   : > { %v1443_v3 = vpop.xlane.xlu0 %1442 }
 0x9a0   : > { %4604 = vrcp.f32 %v1443_v3 }
 0x9a6   : > { %v4605_v5 = vpop.eup %4604 }
 0x9a7   : > { %v1449_v27 = vmul.f32 %v4605_v5, %v4601_v52  ;;  %v1446_v28 = vpop.xlane.xlu2 %1445 }
 0x9a8   : > { %4606 = vrcp.f32 %v1446_v28 }
 0x9a9   : > { %4442 = vmatmul.msk.f32.vlgmr.msrb.gmra.mxu3 %vm1033_vm3, %v1449_v27 }
 0x9aa   : > { %4453 = vmatpush.xpose.msk.msrb.mxu3 %vm832_vm0, %v5096_v21 }
 0x9ae   : > { %v4607_v29 = vpop.eup %4606 }
 0x9af   : > { %v1450_v31 = vmul.f32 %v4607_v29, %v4603_v1 }
 0x9b1   : > { %4443 = vmatmul.msk.f32.vlgmr.msra.gmra.mxu0 %vm1033_vm3, %v1450_v31  ;;  %4446 = vmatmul.msk.f32.vlgmr.msra.gmra.mxu3 %vm832_vm0, %v5338_v36 }
 0x9b2   : > { %4455 = vmatpush.xpose.msk.msra.mxu0 %vm832_vm0, %v5102_v24  ;;  %1914 = vmatpush.msra.mxu3 %v5194_v63 }
 0x9b4   : > { %1915 = vmatpush.msra.mxu3 %v5208_v6 }
 0x9b6   : > { %1916 = vmatpush.msra.mxu3 %v5213_v7 }
 0x9b8   : > { %1917 = vmatpush.msra.mxu3 %v5219_v9 }
 0x9b9   : > { %4449 = vmatmul.msk.f32.vlgmr.msrb.gmra.mxu0 %vm832_vm0, %v1358_v15 }
 0x9ba   : > { %1937 = vmatpush.msrb.mxu0 %v5250_v19 }
 0x9bc   : > { %1938 = vmatpush.msrb.mxu0 %v5255_v20 }
 0x9be   : > { %1939 = vmatpush.msrb.mxu0 %v5262_v23 }
 0x9c0   : > { %1940 = vmatpush.msrb.mxu0 %v5269_v26 }
 0xa2c   : > { %v1471_v37 = vpop.f32.mrf.mxu3 }
 0xa2e   : > { %v1494_v36 = vpop.f32.mrf.mxu0 }
 0xa2f   : > { %v1499_v32 = vrot.slane %v1494_v36, 7 }
 0xa31   : > { %v1500_v35 = vsel %vm932_vm1, %v1499_v32, %v1471_v37 }
 0xa32   : > { %4444 = vmatmul.msk.f32.vlgmr.msra.gmra.mxu1 %vm832_vm0, %v1500_v35 }
 0xa33   : > { %1868 = vmatpush.msra.mxu1 %v5133_v41 }
 0xa34   : > { %v1569_v39 = vpop.f32.mrf.mxu3 }
 0xa35   : > { %v1573_v45 = vrot.slane %v1569_v39, 7 }
 0xaaf   : > { %v1520_v38 = vpop.f32.mrf.mxu1 }
 0xab0   : > { %v1521_v15 = vadd.f32 %v5305_v12, %v1520_v38 }
 0xab2   : > { %4445 = vmatmul.msk.f32.vlgmr.msra.gmra.mxu2 %vm832_vm0, %v1521_v15 }
 0xab3   : > { %1891 = vmatpush.msra.mxu2 %v5136_v46 }
 0xb35   : > { %v1543_v42 = vpop.f32.mrf.mxu2 }
 0xb36   : > { %v1547_v43 = vrot.slane %v1543_v42, 7  ;;  %v1551_v44 = vadd.f32 %v1543_v42, %v5314_v40 }
 0xb38   : > { %v1550_v48 = vadd.f32 %v1547_v43, %v5317_v47  ;;  %v1577_v8 = vadd.f32 %v1569_v39, %v1551_v44 }
 0xb3a   : > { %v1576_v49 = vadd.f32 %v1573_v45, %v1550_v48  ;;  %4608 = vtanh.f32 %v1577_v8  ;;  %v4448_v22 = vmul.f32 -1.442695, %v1577_v8 }
 0xb3c   : > { %4610 = vtanh.f32 %v1576_v49  ;;  %v4447_v52 = vmul.f32 -1.442695, %v1576_v49 }
 0xb3d   : > { %4612 = vpow2.f32 %v4448_v22 }
 0xb3e   : > { %4614 = vpow2.f32 %v4447_v52 }
 0xb40   : > { %v4609_v50 = vpop.eup %4608 }
 0xb41   : > { %1630 = vrot.lane.b32.xlu0 %v4609_v50, %s4887_s0 }
 0xb42   : > { %v4611_v51 = vpop.eup %4610 }
 0xb43   : > { %1628 = vrot.lane.b32.xlu1 %v4611_v51, %s4887_s0  ;;  %v4613_v53 = vpop.eup %4612 }
 0xb44   : > { %v4615_v0 = vpop.eup %4614  ;;  %v1585_v1 = vadd.f32 1.0, %v4613_v53  ;;  %v1620_v53 = vrot.slane %v5327_v4, 7 }
 0xb45   : > { %v1584_v2 = vadd.f32 1.0, %v4615_v0 }
 0xb46   : > { %4616 = vrcp.f32 %v1585_v1  ;;  %v1612_v35 = vand.u32 2147483648, %v1585_v1  ;;  %vm1606_vm5 = vweird.f32 %v1585_v1  ;;  %v1610_v38 = vand.u32 2147483647, %v1585_v1 }
 0xb47   : > { %4618 = vrcp.f32 %v1584_v2  ;;  %v1597_v42 = vand.u32 2147483648, %v1584_v2  ;;  %vm1591_vm8 = vweird.f32 %v1584_v2  ;;  %v1595_v44 = vand.u32 2147483647, %v1584_v2 }
 0xb48   : > { %v1613_v43 = vor.u32 1.1754944e-38, %v1612_v35  ;;  %vm1611_vm9 = vcmp.eq.f32.partialorder %v1610_v38, 8.507059e+37 }
 0xb49   : > { %v1598_v50 = vor.u32 1.1754944e-38, %v1597_v42  ;;  %vm1596_vm11 = vcmp.eq.f32.partialorder %v1595_v44, 8.507059e+37 }
 0xb4c   : > { %v4617_v3 = vpop.eup %4616 }
 0xb4d   : > { %v4619_v5 = vpop.eup %4618  ;;  %v1602_v27 = vmul.f32 %v4617_v3, %v1585_v1  ;;  %vm1607_vm4 = vweird.f32 %v4617_v3 }
 0xb4e   : > { %v1587_v28 = vmul.f32 %v4619_v5, %v1584_v2  ;;  %vm1608_vm6 = vmor %vm1606_vm5, %vm1607_vm4  ;;  %vm1592_vm7 = vweird.f32 %v4619_v5 }
 0xb4f   : > { %v1603_v29 = vsub.f32 1.0, %v1602_v27  ;;  %vm1593_vm10 = vmor %vm1591_vm8, %vm1592_vm7 }
 0xb50   : > { %v1588_v31 = vsub.f32 1.0, %v1587_v28 }
 0xb51   : > { %v1604_v36 = vmul.f32 %v4617_v3, %v1603_v29 }
 0xb52   : > { %v1589_v32 = vmul.f32 %v4619_v5, %v1588_v31 }
 0xb53   : > { %v1605_v37 = vadd.f32 %v4617_v3, %v1604_v36 }
 0xb54   : > { %v1590_v15 = vadd.f32 %v4619_v5, %v1589_v32 }
 0xb55   : > { %v1609_v39 = vsel %vm1608_vm6, %v4617_v3, %v1605_v37 }
 0xb56   : > { %v1614_v48 = vsel %vm1611_vm9, %v1613_v43, %v1609_v39  ;;  %v1594_v8 = vsel %vm1593_vm10, %v4619_v5, %v1590_v15  ;;  %v1621_v5 = vrot.slane %v5324_v54, 7  ;;  %v1675_v54 = vpop.f32.mrf.mxu0 }
 0xb57   : > { %v1599_v22 = vsel %vm1596_vm11, %v1598_v50, %v1594_v8 }
 0xb58   : > { %v1624_v0 = vmul.f32 %v1620_v53, %v1599_v22  ;;  %v1625_v27 = vmul.f32 %v1621_v5, %v1614_v48 }
 0xbb3   : > { %v1631_v45 = vpop.permute.xlu0 %1630 }
 0xbb4   : > { %v1635_v49 = vmul.f32 %v1631_v45, %v1614_v48 }
 0xbb5   : > { %v1629_v51 = vpop.permute.xlu1 %1628 }
 0xbb6   : > { %1640 = vrot.lane.b32.xlu0 %v1635_v49, %s6268_s2  ;;  %v1634_v52 = vmul.f32 %v1629_v51, %v1599_v22 }
 0xbb8   : > { %1638 = vrot.lane.b32.xlu2 %v1634_v52, %s6268_s2 }
 0xc12   : > { %v1639_v1 = vpop.permute.xlu2 %1638 }
 0xc13   : > { %v5412_v2 = vadd.f32 %v1639_v1, %v1624_v0 }
 0xc15   : > { %4620 = vtanh.f32 %v5412_v2 }
 0xc1b   : > { %v4621_v3 = vpop.eup %4620 }
 0xc1c   : > { %1650 = vrot.lane.b32.xlu1 %v4621_v3, %s4887_s0 }
 0xc28   : > { %v1641_v28 = vpop.permute.xlu0 %1640 }
 0xc29   : > { %v5417_v29 = vadd.f32 %v1641_v28, %v1625_v27 }
 0xc2b   : > { %4622 = vtanh.f32 %v5417_v29 }
 0xc31   : > { %v4623_v31 = vpop.eup %4622 }
 0xc32   : > { %1652 = vrot.lane.b32.xlu2 %v4623_v31, %s4887_s0 }
 0xc8c   : > { %v1653_v4 = vpop.permute.xlu2 %1652 }
 0xc8d   : > { %v1657_v37 = vmul.f32 %v1653_v4, %v1614_v48 }
 0xc8e   : > { %v1651_v36 = vpop.permute.xlu1 %1650 }
 0xc8f   : > { %v1656_v32 = vmul.f32 %v1651_v36, %v1599_v22 }
 0xc91   : > { %v1680_v35 = vrot.slane %v1656_v32, 1 }
 0xc93   : > { %v1681_v38 = vsel %vm932_vm1, %v1657_v37, %v1680_v35 }
 0xc94   : > { %1682 = vrot.lane.b32.xlu0 %v1681_v38, %s6268_s2 }
 0xd06   : > { %v5423_v15 = vpop.permute.xlu0 %1682 }
 0xd07   : > { %4450 = vmatmul.msk.f32.vlgmr.msrb.gmra.mxu1 %vm832_vm0, %v5423_v15 }
 0xd08   : > { %1964 = vmatpush.msrb.mxu1 %v5170_v59 }
 0xd0a   : > { %1965 = vmatpush.msrb.mxu1 %v5175_v60 }
 0xd0c   : > { %1966 = vmatpush.msrb.mxu1 %v5181_v61 }
 0xd0e   : > { %1967 = vmatpush.msrb.mxu1 %v5187_v62 }
 0xd84   : > { %v1703_v39 = vpop.f32.mrf.mxu1 }
 0xd85   : > { %v1704_v42 = vadd.f32 %v1703_v39, %v1675_v54 }
 0xd87   : > { %v1706_v43 = vadd.f32 %v5349_v34, %v1704_v42 }
 0xd89   : > { %4624 = vtanh.f32 %v1706_v43  ;;  %v4451_v45 = vmul.f32 -1.442695, %v1706_v43 }
 0xd8b   : > { %4626 = vpow2.f32 %v4451_v45 }
 0xd8f   : > { %v4625_v44 = vpop.eup %4624 }
 0xd90   : > { %1729 = vrot.lane.b32.xlu1 %v4625_v44, %s4887_s0 }
 0xd91   : > { %v4627_v48 = vpop.eup %4626 }
 0xd92   : > { %v1710_v8 = vadd.f32 1.0, %v4627_v48 }
 0xd94   : > { %4628 = vrcp.f32 %v1710_v8  ;;  %v1722_v62 = vand.u32 2147483648, %v1710_v8  ;;  %vm1716_vm13 = vweird.f32 %v1710_v8  ;;  %v1720_v51 = vand.u32 2147483647, %v1710_v8 }
 0xd96   : > { %v1723_v52 = vor.u32 1.1754944e-38, %v1722_v62  ;;  %vm1721_vm15 = vcmp.eq.f32.partialorder %v1720_v51, 8.507059e+37 }
 0xd9a   : > { %v4629_v59 = vpop.eup %4628 }
 0xd9b   : > { %v1712_v60 = vmul.f32 %v4629_v59, %v1710_v8  ;;  %vm1717_vm12 = vweird.f32 %v4629_v59 }
 0xd9c   : > { %vm1718_vm14 = vmor %vm1716_vm13, %vm1717_vm12 }
 0xd9d   : > { %v1713_v49 = vsub.f32 1.0, %v1712_v60 }
 0xd9f   : > { %v1714_v61 = vmul.f32 %v4629_v59, %v1713_v49 }
 0xda1   : > { %v1715_v50 = vadd.f32 %v4629_v59, %v1714_v61 }
 0xda3   : > { %v1719_v22 = vsel %vm1718_vm14, %v4629_v59, %v1715_v50 }
 0xda4   : > { %v1724_v0 = vsel %vm1721_vm15, %v1723_v52, %v1719_v22 }
 0xda5   : > { %v1727_v3 = vmul.f32 %v1724_v0, %v5354_v30 }
 0xe02   : > { %v1730_v53 = vpop.permute.xlu1 %1729 }
 0xe03   : > { %v1732_v1 = vmul.f32 %v1730_v53, %v1724_v0 }
 0xe05   : > { %1734 = vrot.lane.b32.xlu2 %v1732_v1, %s6268_s2 }
 0xe5f   : > { %v1735_v5 = vpop.permute.xlu2 %1734 }
 0xe60   : > { %v5435_v27 = vadd.f32 %v1735_v5, %v1727_v3 }
 0xe62   : > { %4630 = vtanh.f32 %v5435_v27 }
 0xe68   : > { %v4631_v28 = vpop.eup %4630 }
 0xe69   : > { %1740 = vrot.lane.b32.xlu0 %v4631_v28, %s4887_s0 }
 0xedb   : > { %v1741_v31 = vpop.permute.xlu0 %1740 }
 0xedc   : > { %v5439_v4 = vmul.f32 %v1741_v31, %v1724_v0 }
 0xede   : > { %1756 = vrot.lane.b32.xlu1 %v5439_v4, %s6268_s2 }
 0xf50   : > { %v1757_v36 = vpop.permute.xlu1 %1756 }
 0xf51   : > { %4452 = vmatmul.msk.f32.vlgmr.msrb.gmra.mxu2 %vm832_vm0, %v1757_v36 }
 0xf52   : > { %2071 = vmatpush.msrb.mxu2 %v5145_v55  ;;  %v5456_v55 = vld [vmem:[%s6279_s6 + $0x18] sm:$0xff] }
 0xf54   : > { %2072 = vmatpush.msrb.mxu2 %v5151_v56 }
 0xf56   : > { %2073 = vmatpush.msrb.mxu2 %v5157_v57 }
 0xf58   : > { %2074 = vmatpush.msrb.mxu2 %v5164_v58 }
 0xfd4   : > { %v1777_v30 = vpop.f32.mrf.mxu2 }
 0xfd5   : > { %v1778_v32 = vadd.f32 %v5109_v25, %v1777_v30 }
 0xfd7   : > { %v1781_v37 = vrot.slane %v1778_v32, 1  ;;  %4454 = vmatmul.msk.f32.vlgmr.msrb.gmra.mxu3 %vm832_vm0, %v1778_v32 }
 0xfd8   : > { %2100 = vmatpush.msrb.mxu3 %v5225_v10 }
 0xfd9   : > { %4456 = vmatmul.msk.f32.vlgmr.msra.gmra.mxu0 %vm832_vm0, %v1781_v37 }
 0xfda   : > { %2101 = vmatpush.msrb.mxu3 %v5231_v13  ;;  %2174 = vmatpush.msra.mxu0 %v5456_v55 }
 0xfdc   : > { %2102 = vmatpush.msrb.mxu3 %v5238_v17  ;;  %2175 = vmatpush.msra.mxu0 %v5065_v11 }
 0xfde   : > { %2103 = vmatpush.msrb.mxu3 %v5244_v18  ;;  %2176 = vmatpush.msra.mxu0 %v5074_v14 }
 0xfe0   : > { %2177 = vmatpush.msra.mxu0 %v5082_v16 }
0x1056   : > { %v1823_v25 = vpop.f32.mrf.mxu0 }
0x1057   : > { %v1827_v56 = vmul.f32 0.17677669, %v1823_v25 }
0x1059   : > { %v1831_v57 = vsel %vm1010_vm2, %v1827_v56, -inf }
0x105a   : > { %v1801_v58 = vpop.f32.mrf.mxu3  ;;  %1832 = vmax.xlane.f32.xlu2 %v1831_v57 }
0x105b   : > { %v1826_v10 = vmul.f32 0.17677669, %v1801_v58 }
0x105d   : > { %v1828_v13 = vsel %vm1010_vm2, %v1826_v10, -inf }
0x105e   : > { %1829 = vmax.xlane.f32.xlu0 %v1828_v13 }
0x10cd   : > { %v1833_v35 = vpop.xlane.xlu2 %1832 }
0x10ce   : > { %v1835_v17 = vsub.f32 %v1827_v56, %v1833_v35 }
0x10d0   : > { %v1838_v38 = vmul.f32 1.442695, %v1835_v17 }
0x10d1   : > { %v1830_v11 = vpop.xlane.xlu0 %1829 }
0x10d2   : > { %4632 = vpow2.f32 %v1838_v38  ;;  %v1834_v18 = vsub.f32 %v1826_v10, %v1830_v11 }
0x10d4   : > { %v1836_v54 = vmul.f32 1.442695, %v1834_v18 }
0x10d6   : > { %4634 = vpow2.f32 %v1836_v54 }
0x10d8   : > { %v4633_v14 = vpop.eup %4632 }
0x10d9   : > { %v1843_v16 = vsel %vm1010_vm2, %v4633_v14, 0.0 }
0x10da   : > { %1844 = vadd.xlane.f32.xlu1 %v1843_v16 }
0x10dc   : > { %v4635_v39 = vpop.eup %4634 }
0x10dd   : > { %v1840_v42 = vsel %vm1010_vm2, %v4635_v39, 0.0 }
0x10de   : > { %1841 = vadd.xlane.f32.xlu2 %v1840_v42 }
0x114d   : > { %v1845_v43 = vpop.xlane.xlu1 %1844 }
0x114e   : > { %4636 = vrcp.f32 %v1845_v43 }
0x1151   : > { %v1842_v44 = vpop.xlane.xlu2 %1841 }
0x1152   : > { %4638 = vrcp.f32 %v1842_v44 }
0x1154   : > { %v4637_v45 = vpop.eup %4636 }
0x1155   : > { %v1849_v48 = vmul.f32 %v4637_v45, %v4633_v14 }
0x1157   : > { %4458 = vmatmul.msk.f32.vlgmr.msra.gmra.mxu2 %vm1033_vm3, %v1849_v48  ;;  %v2021_v48 = vrot.slane %v5412_v2, 7 }
0x1158   : > { %v4639_v8 = vpop.eup %4638  ;;  %4470 = vmatpush.xpose.msk.msra.mxu2 %vm832_vm0, %v5102_v24 }
0x1159   : > { %v1848_v59 = vmul.f32 %v4639_v8, %v4635_v39 }
0x115b   : > { %4457 = vmatmul.msk.f32.vlgmr.msra.gmra.mxu1 %vm1033_vm3, %v1848_v59 }
0x115c   : > { %4468 = vmatpush.xpose.msk.msra.mxu1 %vm832_vm0, %v5096_v21 }
0x115f   : > { %4464 = vmatmul.msk.f32.vlgmr.msrb.gmra.mxu2 %vm832_vm0, %v1757_v36 }
0x1160   : > { %2339 = vmatpush.msrb.mxu2 %v5250_v19 }
0x1162   : > { %2340 = vmatpush.msrb.mxu2 %v5255_v20 }
0x1163   : > { %4461 = vmatmul.msk.f32.vlgmr.msrb.gmra.mxu1 %vm832_vm0, %v5423_v15 }
0x1164   : > { %2316 = vmatpush.msrb.mxu1 %v5194_v63  ;;  %2341 = vmatpush.msrb.mxu2 %v5262_v23 }
0x1166   : > { %2317 = vmatpush.msrb.mxu1 %v5208_v6  ;;  %2342 = vmatpush.msrb.mxu2 %v5269_v26 }
0x1168   : > { %2318 = vmatpush.msrb.mxu1 %v5213_v7 }
0x116a   : > { %2319 = vmatpush.msrb.mxu1 %v5219_v9 }
0x11d8   : > { %v1870_v19 = vpop.f32.mrf.mxu1 }
0x11da   : > { %v1893_v60 = vpop.f32.mrf.mxu2 }
0x11db   : > { %v1898_v49 = vrot.slane %v1893_v60, 7 }
0x11dd   : > { %v1899_v20 = vsel %vm932_vm1, %v1898_v49, %v1870_v19  ;;  %v2022_v19 = vrot.slane %v5417_v29, 7 }
0x11de   : > { %4459 = vmatmul.msk.f32.vlgmr.msra.gmra.mxu3 %vm832_vm0, %v1899_v20 }
0x11df   : > { %2270 = vmatpush.msra.mxu3 %v5133_v41 }
0x11e0   : > { %v1969_v6 = vpop.f32.mrf.mxu1 }
0x11e1   : > { %v1973_v15 = vrot.slane %v1969_v6, 6  ;;  %v1974_v61 = vrot.slane %v1969_v6, 7 }
0x1261   : > { %v1919_v63 = vpop.f32.mrf.mxu3 }
0x1262   : > { %v1920_v23 = vadd.f32 %v5305_v12, %v1919_v63 }
0x1264   : > { %4460 = vmatmul.msk.f32.vlgmr.msrb.gmra.mxu0 %vm832_vm0, %v1920_v23 }
0x1265   : > { %2293 = vmatpush.msrb.mxu0 %v5136_v46 }
0x12e1   : > { %v1942_v7 = vpop.f32.mrf.mxu0 }
0x12e2   : > { %v1946_v26 = vrot.slane %v1942_v7, 6  ;;  %v1947_v9 = vrot.slane %v1942_v7, 7 }
0x12e4   : > { %v1950_v50 = vadd.f32 %v1946_v26, %v5317_v47  ;;  %v1951_v62 = vadd.f32 %v1947_v9, %v5314_v40 }
0x12e6   : > { %v1977_v51 = vadd.f32 %v1973_v15, %v1950_v50  ;;  %v1978_v22 = vadd.f32 %v1974_v61, %v1951_v62  ;;  %v5516_v62 = vld [vmem:[%s6253_s13 + $0x18] sm:$0xff] }
0x12e8   : > { %4640 = vtanh.f32 %v1977_v51  ;;  %v4462_v53 = vmul.f32 -1.442695, %v1977_v51  ;;  %v4463_v0 = vmul.f32 -1.442695, %v1978_v22  ;;  %v5522_v51 = vld [vmem:[%s6253_s13 + $0x10] sm:$0xff] }
0x12e9   : > { %4642 = vtanh.f32 %v1978_v22  ;;  %v5528_v22 = vld [vmem:[%s6253_s13 + $0x8] sm:$0xff] }
0x12ea   : > { %4644 = vpow2.f32 %v4462_v53 }
0x12eb   : > { %4646 = vpow2.f32 %v4463_v0 }
0x12ee   : > { %v4641_v52 = vpop.eup %4640 }
0x12ef   : > { %v4643_v12 = vpop.eup %4642  ;;  %2029 = vrot.lane.b32.xlu0 %v4641_v52, %s4887_s0  ;;  %v5534_v52 = vld [vmem:[%s6253_s13] sm:$0xff] }
0x12f0   : > { %2031 = vrot.lane.b32.xlu1 %v4643_v12, %s4887_s0  ;;  %v4645_v1 = vpop.eup %4644  ;;  %v2076_v12 = vpop.f32.mrf.mxu2 }
0x12f1   : > { %v4647_v3 = vpop.eup %4646  ;;  %v1985_v5 = vadd.f32 1.0, %v4645_v1 }
0x12f2   : > { %v1986_v28 = vadd.f32 1.0, %v4647_v3 }
0x12f3   : > { %4648 = vrcp.f32 %v1985_v5  ;;  %v1998_v13 = vand.u32 2147483648, %v1985_v5  ;;  %vm1992_vm6 = vweird.f32 %v1985_v5  ;;  %v1996_v17 = vand.u32 2147483647, %v1985_v5 }
0x12f4   : > { %4650 = vrcp.f32 %v1986_v28  ;;  %v2013_v35 = vand.u32 2147483648, %v1986_v28  ;;  %vm2007_vm7 = vweird.f32 %v1986_v28  ;;  %v2011_v38 = vand.u32 2147483647, %v1986_v28 }
0x12f5   : > { %v1999_v54 = vor.u32 1.1754944e-38, %v1998_v13  ;;  %vm1997_vm10 = vcmp.eq.f32.partialorder %v1996_v17, 8.507059e+37 }
0x12f6   : > { %v2014_v14 = vor.u32 1.1754944e-38, %v2013_v35  ;;  %vm2012_vm11 = vcmp.eq.f32.partialorder %v2011_v38, 8.507059e+37 }
0x12f9   : > { %v4649_v31 = vpop.eup %4648 }
0x12fa   : > { %v4651_v36 = vpop.eup %4650  ;;  %v1988_v30 = vmul.f32 %v4649_v31, %v1985_v5  ;;  %vm1993_vm4 = vweird.f32 %v4649_v31 }
0x12fb   : > { %v2003_v32 = vmul.f32 %v4651_v36, %v1986_v28  ;;  %vm2008_vm5 = vweird.f32 %v4651_v36  ;;  %vm1994_vm8 = vmor %vm1992_vm6, %vm1993_vm4 }
0x12fc   : > { %v1989_v37 = vsub.f32 1.0, %v1988_v30  ;;  %vm2009_vm9 = vmor %vm2007_vm7, %vm2008_vm5 }
0x12fd   : > { %v2004_v25 = vsub.f32 1.0, %v2003_v32 }
0x12fe   : > { %v1990_v56 = vmul.f32 %v4649_v31, %v1989_v37 }
0x12ff   : > { %v2005_v57 = vmul.f32 %v4651_v36, %v2004_v25 }
0x1300   : > { %v1991_v58 = vadd.f32 %v4649_v31, %v1990_v56 }
0x1301   : > { %v2006_v10 = vadd.f32 %v4651_v36, %v2005_v57 }
0x1302   : > { %v1995_v11 = vsel %vm1994_vm8, %v4649_v31, %v1991_v58 }
0x1303   : > { %v2010_v18 = vsel %vm2009_vm9, %v4651_v36, %v2006_v10  ;;  %v2000_v39 = vsel %vm1997_vm10, %v1999_v54, %v1995_v11 }
0x1304   : > { %v2015_v43 = vsel %vm2012_vm11, %v2014_v14, %v2010_v18  ;;  %v2025_v8 = vmul.f32 %v2021_v48, %v2000_v39 }
0x1305   : > { %v2026_v20 = vmul.f32 %v2022_v19, %v2015_v43  ;;  %v5601_v19 = vld [vmem:[%s6255_s15 + $0x8] sm:$0xff] }
0x1361   : > { %v2030_v16 = vpop.permute.xlu0 %2029 }
0x1362   : > { %v2032_v42 = vpop.permute.xlu1 %2031  ;;  %v2035_v44 = vmul.f32 %v2030_v16, %v2000_v39 }
0x1363   : > { %v2036_v45 = vmul.f32 %v2032_v42, %v2015_v43  ;;  %v5568_v42 = vld [vmem:[%s6256_s16 + $0x8] sm:$0xff] }
0x1364   : > { %2039 = vrot.lane.b32.xlu2 %v2035_v44, %s6268_s2 }
0x1365   : > { %2041 = vrot.lane.b32.xlu0 %v2036_v45, %s6268_s2  ;;  %v5580_v45 = vld [vmem:[%s6283_s24] ss:$0 sm:$0xff] }
0x13be   : > { %v2040_v59 = vpop.permute.xlu2 %2039 }
0x13bf   : > { %v5498_v60 = vadd.f32 %v2040_v59, %v2025_v8  ;;  %v5587_v59 = vld [vmem:[%s6255_s15 + $0x18] sm:$0xff] }
0x13c1   : > { %4652 = vtanh.f32 %v5498_v60 }
0x13c7   : > { %v4653_v49 = vpop.eup %4652 }
0x13c8   : > { %2051 = vrot.lane.b32.xlu1 %v4653_v49, %s4887_s0  ;;  %v5594_v49 = vld [vmem:[%s6255_s15 + $0x10] sm:$0xff] }
0x13d7   : > { %v2042_v63 = vpop.permute.xlu0 %2041 }
0x13d8   : > { %v5503_v23 = vadd.f32 %v2042_v63, %v2026_v20  ;;  %v5607_v20 = vld [vmem:[%s6279_s6 + $0x10] sm:$0xff]  ;;  %v5613_v63 = vld [vmem:[%s6255_s15] sm:$0xff] }
0x13da   : > { %4654 = vtanh.f32 %v5503_v23 }
0x13e0   : > { %v4655_v6 = vpop.eup %4654 }
0x13e1   : > { %2053 = vrot.lane.b32.xlu0 %v4655_v6, %s4887_s0  ;;  %v5619_v6 = vld [vmem:[%s6279_s6 + $0x8] sm:$0xff] }
0x143a   : > { %v2052_v2 = vpop.permute.xlu1 %2051 }
0x143b   : > { %v2057_v7 = vmul.f32 %v2052_v2, %v2000_v39  ;;  %v5562_v39 = vld [vmem:[%s6256_s16 + $0x10] sm:$0xff]  ;;  %v5625_v2 = vld [vmem:[%s6279_s6] sm:$0xff] }
0x143d   : > { %v2081_v15 = vrot.slane %v2057_v7, 2 }
0x1453   : > { %v2054_v26 = vpop.permute.xlu0 %2053 }
0x1454   : > { %v2058_v9 = vmul.f32 %v2054_v26, %v2015_v43  ;;  %v5574_v43 = vld [vmem:[%s6256_s16] sm:$0xff] }
0x1456   : > { %v2082_v61 = vrot.slane %v2058_v9, 1 }
0x1458   : > { %v2083_v50 = vsel %vm932_vm1, %v2082_v61, %v2081_v15 }
0x1459   : > { %2084 = vrot.lane.b32.xlu2 %v2083_v50, %s6268_s2 }
0x14b3   : > { %v5509_v29 = vpop.permute.xlu2 %2084 }
0x14b4   : > { %4465 = vmatmul.msk.f32.vlgmr.msrb.gmra.mxu3 %vm832_vm0, %v5509_v29 }
0x14b5   : > { %2366 = vmatpush.msrb.mxu3 %v5516_v62 }
0x14b7   : > { %2367 = vmatpush.msrb.mxu3 %v5522_v51 }
0x14b9   : > { %2368 = vmatpush.msrb.mxu3 %v5528_v22 }
0x14bb   : > { %2369 = vmatpush.msrb.mxu3 %v5534_v52 }
0x1537   : > { %v2105_v53 = vpop.f32.mrf.mxu3 }
0x1538   : > { %v2106_v0 = vadd.f32 %v2105_v53, %v2076_v12 }
0x153a   : > { %v2108_v1 = vadd.f32 %v5349_v34, %v2106_v0 }
0x153c   : > { %4656 = vtanh.f32 %v2108_v1  ;;  %v4466_v5 = vmul.f32 -1.442695, %v2108_v1 }
0x153e   : > { %4658 = vpow2.f32 %v4466_v5 }
0x1542   : > { %v4657_v3 = vpop.eup %4656 }
0x1543   : > { %2131 = vrot.lane.b32.xlu1 %v4657_v3, %s4887_s0 }
0x1544   : > { %v4659_v28 = vpop.eup %4658 }
0x1545   : > { %v2112_v31 = vadd.f32 1.0, %v4659_v28 }
0x1547   : > { %4660 = vrcp.f32 %v2112_v31  ;;  %v2124_v56 = vand.u32 2147483648, %v2112_v31  ;;  %vm2118_vm13 = vweird.f32 %v2112_v31  ;;  %v2122_v57 = vand.u32 2147483647, %v2112_v31 }
0x1549   : > { %v2125_v58 = vor.u32 1.1754944e-38, %v2124_v56  ;;  %vm2123_vm15 = vcmp.eq.f32.partialorder %v2122_v57, 8.507059e+37 }
0x154d   : > { %v4661_v36 = vpop.eup %4660 }
0x154e   : > { %v2114_v30 = vmul.f32 %v4661_v36, %v2112_v31  ;;  %vm2119_vm12 = vweird.f32 %v4661_v36 }
0x154f   : > { %vm2120_vm14 = vmor %vm2118_vm13, %vm2119_vm12 }
0x1550   : > { %v2115_v32 = vsub.f32 1.0, %v2114_v30 }
0x1552   : > { %v2116_v37 = vmul.f32 %v4661_v36, %v2115_v32 }
0x1554   : > { %v2117_v25 = vadd.f32 %v4661_v36, %v2116_v37 }
0x1556   : > { %v2121_v34 = vsel %vm2120_vm14, %v4661_v36, %v2117_v25 }
0x1557   : > { %v2126_v13 = vsel %vm2123_vm15, %v2125_v58, %v2121_v34  ;;  %v5643_v58 = vld [vmem:[%s6250_s10 + $0x18] sm:$0xff] }
0x1558   : > { %v2129_v17 = vmul.f32 %v2126_v13, %v5435_v27  ;;  %v5556_v27 = vld [vmem:[%s6256_s16 + $0x18] sm:$0xff] }
0x15b5   : > { %v2132_v10 = vpop.permute.xlu1 %2131 }
0x15b6   : > { %v2134_v35 = vmul.f32 %v2132_v10, %v2126_v13  ;;  %v5649_v10 = vld [vmem:[%s6250_s10 + $0x10] sm:$0xff] }
0x15b8   : > { %2136 = vrot.lane.b32.xlu0 %v2134_v35, %s6268_s2  ;;  %v5669_v35 = vld [vmem:[%s6252_s12 + $0x38] sm:$0xff] }
0x162a   : > { %v2137_v38 = vpop.permute.xlu0 %2136 }
0x162b   : > { %v5541_v11 = vadd.f32 %v2137_v38, %v2129_v17  ;;  %v5675_v17 = vld [vmem:[%s6252_s12 + $0x30] sm:$0xff]  ;;  %v5681_v38 = vld [vmem:[%s6252_s12 + $0x28] sm:$0xff] }
0x162d   : > { %4662 = vtanh.f32 %v5541_v11 }
0x1633   : > { %v4663_v18 = vpop.eup %4662 }
0x1634   : > { %2142 = vrot.lane.b32.xlu2 %v4663_v18, %s4887_s0  ;;  %v5687_v18 = vld [vmem:[%s6252_s12 + $0x20] sm:$0xff] }
0x168e   : > { %v2143_v54 = vpop.permute.xlu2 %2142 }
0x168f   : > { %v5545_v14 = vmul.f32 %v2143_v54, %v2126_v13  ;;  %v5661_v13 = vld [vmem:[%s6250_s10] sm:$0xff] }
0x1691   : > { %2158 = vrot.lane.b32.xlu1 %v5545_v14, %s6268_s2 }
0x1703   : > { %v5549_v16 = vpop.permute.xlu1 %2158 }
0x1704   : > { %4467 = vmatmul.msk.f32.vlgmr.msra.gmra.mxu0 %vm832_vm0, %v5549_v16 }
0x1705   : > { %2473 = vmatpush.msra.mxu0 %v5556_v27 }
0x1707   : > { %2474 = vmatpush.msra.mxu0 %v5562_v39 }
0x1709   : > { %2475 = vmatpush.msra.mxu0 %v5568_v42 }
0x170b   : > { %2476 = vmatpush.msra.mxu0 %v5574_v43 }
0x1781   : > { %v2179_v44 = vpop.f32.mrf.mxu0 }
0x1782   : > { %v2180_v48 = vadd.f32 %v5580_v45, %v2179_v44 }
0x1784   : > { %v2183_v8 = vrot.slane %v2180_v48, 1  ;;  %4469 = vmatmul.msk.f32.vlgmr.msra.gmra.mxu1 %vm832_vm0, %v2180_v48 }
0x1785   : > { %2502 = vmatpush.msra.mxu1 %v5587_v59 }
0x1786   : > { %4471 = vmatmul.msk.f32.vlgmr.msra.gmra.mxu2 %vm832_vm0, %v2183_v8 }
0x1787   : > { %2503 = vmatpush.msra.mxu1 %v5594_v49  ;;  %2576 = vmatpush.msra.mxu2 %v5456_v55 }
0x1789   : > { %2504 = vmatpush.msra.mxu1 %v5601_v19  ;;  %2577 = vmatpush.msra.mxu2 %v5607_v20 }
0x178b   : > { %2505 = vmatpush.msra.mxu1 %v5613_v63  ;;  %2578 = vmatpush.msra.mxu2 %v5619_v6 }
0x178d   : > { %2579 = vmatpush.msra.mxu2 %v5625_v2 }
0x1801   : > { %v2203_v7 = vpop.f32.mrf.mxu1 }
0x1802   : > { %v2228_v26 = vmul.f32 0.17677669, %v2203_v7  ;;  %v5696_v7 = vld [vmem:[%s6251_s11] ss:$0 sm:$0xff] }
0x1804   : > { %v2230_v9 = vsel %vm1010_vm2, %v2228_v26, -inf }
0x1805   : > { %2231 = vmax.xlane.f32.xlu0 %v2230_v9 }
0x1809   : > { %v2225_v15 = vpop.f32.mrf.mxu2 }
0x180a   : > { %v2229_v61 = vmul.f32 0.17677669, %v2225_v15 }
0x180c   : > { %v2233_v50 = vsel %vm1010_vm2, %v2229_v61, -inf }
0x180d   : > { %2234 = vmax.xlane.f32.xlu2 %v2233_v50 }
0x1878   : > { %v2232_v12 = vpop.xlane.xlu0 %2231 }
0x1879   : > { %v2236_v53 = vsub.f32 %v2228_v26, %v2232_v12 }
0x187b   : > { %v2238_v0 = vmul.f32 1.442695, %v2236_v53 }
0x187d   : > { %4664 = vpow2.f32 %v2238_v0 }
0x1880   : > { %v2235_v1 = vpop.xlane.xlu2 %2234 }
0x1881   : > { %v2237_v3 = vsub.f32 %v2229_v61, %v2235_v1 }
0x1883   : > { %v4665_v5 = vpop.eup %4664  ;;  %v2240_v28 = vmul.f32 1.442695, %v2237_v3 }
0x1884   : > { %v2242_v31 = vsel %vm1010_vm2, %v4665_v5, 0.0 }
0x1885   : > { %4666 = vpow2.f32 %v2240_v28  ;;  %2243 = vadd.xlane.f32.xlu1 %v2242_v31 }
0x188b   : > { %v4667_v36 = vpop.eup %4666 }
0x188c   : > { %v2245_v30 = vsel %vm1010_vm2, %v4667_v36, 0.0 }
0x188d   : > { %2246 = vadd.xlane.f32.xlu0 %v2245_v30 }
0x18f8   : > { %v2244_v32 = vpop.xlane.xlu1 %2243 }
0x18f9   : > { %4668 = vrcp.f32 %v2244_v32 }
0x18ff   : > { %v4669_v37 = vpop.eup %4668 }
0x1900   : > { %v2250_v25 = vmul.f32 %v4669_v37, %v4665_v5  ;;  %v2247_v56 = vpop.xlane.xlu0 %2246 }
0x1901   : > { %4670 = vrcp.f32 %v2247_v56 }
0x1902   : > { %4472 = vmatmul.msk.f32.vlgmr.msra.gmra.mxu3 %vm1033_vm3, %v2250_v25 }
0x1903   : > { %4483 = vmatpush.xpose.msk.msra.mxu3 %vm832_vm0, %v5096_v21 }
0x1907   : > { %v4671_v57 = vpop.eup %4670 }
0x1908   : > { %v2251_v34 = vmul.f32 %v4671_v57, %v4667_v36 }
0x190a   : > { %4473 = vmatmul.msk.f32.vlgmr.msrb.gmra.mxu0 %vm1033_vm3, %v2251_v34  ;;  %4476 = vmatmul.msk.f32.vlgmr.msrb.gmra.mxu3 %vm832_vm0, %v5509_v29  ;;  %v5655_v29 = vld [vmem:[%s6250_s10 + $0x8] sm:$0xff] }
0x190b   : > { %4485 = vmatpush.xpose.msk.msrb.mxu0 %vm832_vm0, %v5102_v24  ;;  %2718 = vmatpush.msrb.mxu3 %v5643_v58 }
0x190d   : > { %2719 = vmatpush.msrb.mxu3 %v5649_v10 }
0x190f   : > { %2720 = vmatpush.msrb.mxu3 %v5655_v29 }
0x1911   : > { %2721 = vmatpush.msrb.mxu3 %v5661_v13 }
0x1912   : > { %4479 = vmatmul.msk.f32.vlgmr.msra.gmra.mxu0 %vm832_vm0, %v5549_v16 }
0x1913   : > { %2741 = vmatpush.msra.mxu0 %v5669_v35 }
0x1915   : > { %2742 = vmatpush.msra.mxu0 %v5675_v17 }
0x1917   : > { %2743 = vmatpush.msra.mxu0 %v5681_v38 }
0x1919   : > { %2744 = vmatpush.msra.mxu0 %v5687_v18 }
0x1985   : > { %v2272_v44 = vpop.f32.mrf.mxu3 }
0x1987   : > { %v2295_v54 = vpop.f32.mrf.mxu0 }
0x1988   : > { %v2300_v16 = vrot.slane %v2295_v54, 7 }
0x198a   : > { %v2301_v48 = vsel %vm932_vm1, %v2300_v16, %v2272_v44 }
0x198b   : > { %4474 = vmatmul.msk.f32.vlgmr.msrb.gmra.mxu1 %vm832_vm0, %v2301_v48 }
0x198c   : > { %2672 = vmatpush.msrb.mxu1 %v5133_v41 }
0x198d   : > { %v2371_v9 = vpop.f32.mrf.mxu3 }
0x198e   : > { %v2375_v12 = vrot.slane %v2371_v9, 5  ;;  %v2376_v53 = vrot.slane %v2371_v9, 6 }
0x1a08   : > { %v2321_v8 = vpop.f32.mrf.mxu1 }
0x1a09   : > { %v2322_v26 = vadd.f32 %v5696_v7, %v2321_v8 }
0x1a0b   : > { %4475 = vmatmul.msk.f32.vlgmr.msrb.gmra.mxu2 %vm832_vm0, %v2322_v26 }
0x1a0c   : > { %2695 = vmatpush.msrb.mxu2 %v5136_v46 }
0x1a8e   : > { %v2344_v15 = vpop.f32.mrf.mxu2 }
0x1a8f   : > { %v2348_v61 = vrot.slane %v2344_v15, 5  ;;  %v2349_v50 = vrot.slane %v2344_v15, 6 }
0x1a91   : > { %v2352_v0 = vadd.f32 %v2348_v61, %v5317_v47  ;;  %v2353_v1 = vadd.f32 %v2349_v50, %v5314_v40 }
0x1a93   : > { %v2379_v3 = vadd.f32 %v2375_v12, %v2352_v0  ;;  %v2380_v5 = vadd.f32 %v2376_v53, %v2353_v1 }
0x1a95   : > { %4672 = vtanh.f32 %v2379_v3  ;;  %v4477_v36 = vmul.f32 -1.442695, %v2379_v3  ;;  %v4478_v25 = vmul.f32 -1.442695, %v2380_v5 }
0x1a96   : > { %4674 = vtanh.f32 %v2380_v5 }
0x1a97   : > { %4676 = vpow2.f32 %v4477_v36 }
0x1a9b   : > { %v4673_v28 = vpop.eup %4672 }
0x1a9c   : > { %v4675_v31 = vpop.eup %4674  ;;  %2431 = vrot.lane.b32.xlu2 %v4673_v28, %s4887_s0 }
0x1a9d   : > { %2433 = vrot.lane.b32.xlu1 %v4675_v31, %s4887_s0  ;;  %v4677_v30 = vpop.eup %4676 }
0x1a9e   : > { %v2387_v32 = vadd.f32 1.0, %v4677_v30 }
0x1aa0   : > { %4678 = vrcp.f32 %v2387_v32  ;;  %v2400_v48 = vand.u32 2147483648, %v2387_v32  ;;  %vm2394_vm5 = vweird.f32 %v2387_v32  ;;  %v2398_v8 = vand.u32 2147483647, %v2387_v32 }
0x1aa1   : > { %4680 = vpow2.f32 %v4478_v25  ;;  %v2423_v25 = vrot.slane %v5498_v60, 7 }
0x1aa2   : > { %v2401_v9 = vor.u32 1.1754944e-38, %v2400_v48  ;;  %vm2399_vm7 = vcmp.eq.f32.partialorder %v2398_v8, 8.507059e+37 }
0x1aa6   : > { %v4679_v37 = vpop.eup %4678 }
0x1aa7   : > { %v2390_v56 = vmul.f32 %v4679_v37, %v2387_v32  ;;  %v4681_v54 = vpop.eup %4680  ;;  %vm2395_vm4 = vweird.f32 %v4679_v37 }
0x1aa8   : > { %v2388_v16 = vadd.f32 1.0, %v4681_v54  ;;  %vm2396_vm6 = vmor %vm2394_vm5, %vm2395_vm4 }
0x1aa9   : > { %v2391_v57 = vsub.f32 1.0, %v2390_v56  ;;  %v2424_v56 = vrot.slane %v5503_v23, 7 }
0x1aaa   : > { %4682 = vrcp.f32 %v2388_v16  ;;  %v2415_v5 = vand.u32 2147483648, %v2388_v16  ;;  %vm2409_vm9 = vweird.f32 %v2388_v16  ;;  %v2413_v28 = vand.u32 2147483647, %v2388_v16 }
0x1aab   : > { %v2392_v34 = vmul.f32 %v4679_v37, %v2391_v57 }
0x1aac   : > { %v2416_v36 = vor.u32 1.1754944e-38, %v2415_v5  ;;  %vm2414_vm11 = vcmp.eq.f32.partialorder %v2413_v28, 8.507059e+37  ;;  %v5730_v5 = vld [vmem:[%s6257_s17] ss:$0 sm:$0xff] }
0x1aad   : > { %v2393_v44 = vadd.f32 %v4679_v37, %v2392_v34 }
0x1aaf   : > { %v2397_v26 = vsel %vm2396_vm6, %v4679_v37, %v2393_v44 }
0x1ab0   : > { %v2402_v61 = vsel %vm2399_vm7, %v2401_v9, %v2397_v26  ;;  %v4683_v12 = vpop.eup %4682 }
0x1ab1   : > { %v2405_v53 = vmul.f32 %v4683_v12, %v2388_v16  ;;  %vm2410_vm8 = vweird.f32 %v4683_v12  ;;  %v2427_v57 = vmul.f32 %v2423_v25, %v2402_v61 }
0x1ab2   : > { %vm2411_vm10 = vmor %vm2409_vm9, %vm2410_vm8 }
0x1ab3   : > { %v2406_v0 = vsub.f32 1.0, %v2405_v53 }
0x1ab5   : > { %v2407_v1 = vmul.f32 %v4683_v12, %v2406_v0 }
0x1ab7   : > { %v2408_v3 = vadd.f32 %v4683_v12, %v2407_v1 }
0x1ab9   : > { %v2412_v31 = vsel %vm2411_vm10, %v4683_v12, %v2408_v3 }
0x1aba   : > { %v2417_v32 = vsel %vm2414_vm11, %v2416_v36, %v2412_v31 }
0x1abb   : > { %v2428_v34 = vmul.f32 %v2424_v56, %v2417_v32 }
0x1af6   : > { %v2432_v15 = vpop.permute.xlu2 %2431 }
0x1af7   : > { %v2437_v50 = vmul.f32 %v2432_v15, %v2402_v61 }
0x1af9   : > { %2441 = vrot.lane.b32.xlu0 %v2437_v50, %s6268_s2 }
0x1b0f   : > { %v2434_v30 = vpop.permute.xlu1 %2433 }
0x1b10   : > { %v2438_v37 = vmul.f32 %v2434_v30, %v2417_v32 }
0x1b12   : > { %2443 = vrot.lane.b32.xlu2 %v2438_v37, %s6268_s2 }
0x1b6b   : > { %v2442_v54 = vpop.permute.xlu0 %2441 }
0x1b6c   : > { %v2444_v44 = vpop.permute.xlu2 %2443  ;;  %v5709_v48 = vadd.f32 %v2442_v54, %v2427_v57 }
0x1b6d   : > { %v5711_v16 = vadd.f32 %v2444_v44, %v2428_v34 }
0x1b6e   : > { %4684 = vtanh.f32 %v5709_v48 }
0x1b6f   : > { %4686 = vtanh.f32 %v5711_v16 }
0x1b74   : > { %v4685_v8 = vpop.eup %4684 }
0x1b75   : > { %v4687_v26 = vpop.eup %4686  ;;  %2453 = vrot.lane.b32.xlu0 %v4685_v8, %s4887_s0 }
0x1b76   : > { %2455 = vrot.lane.b32.xlu1 %v4687_v26, %s4887_s0 }
0x1be7   : > { %v2454_v60 = vpop.permute.xlu0 %2453 }
0x1be8   : > { %v2456_v23 = vpop.permute.xlu1 %2455  ;;  %v2459_v9 = vmul.f32 %v2454_v60, %v2402_v61  ;;  %v2478_v61 = vpop.f32.mrf.mxu0 }
0x1be9   : > { %v2460_v15 = vmul.f32 %v2456_v23, %v2417_v32 }
0x1bea   : > { %v2483_v50 = vrot.slane %v2459_v9, 3 }
0x1beb   : > { %v2484_v12 = vrot.slane %v2460_v15, 2 }
0x1bed   : > { %v2485_v53 = vsel %vm932_vm1, %v2484_v12, %v2483_v50 }
0x1bee   : > { %2486 = vrot.lane.b32.xlu2 %v2485_v53, %s6268_s2 }
0x1c48   : > { %v5719_v0 = vpop.permute.xlu2 %2486 }
0x1c49   : > { %4480 = vmatmul.msk.f32.vlgmr.msra.gmra.mxu1 %vm832_vm0, %v5719_v0 }
0x1c4a   : > { %2768 = vmatpush.msra.mxu1 %v5516_v62 }
0x1c4c   : > { %2769 = vmatpush.msra.mxu1 %v5522_v51 }
0x1c4e   : > { %2770 = vmatpush.msra.mxu1 %v5528_v22 }
0x1c50   : > { %2771 = vmatpush.msra.mxu1 %v5534_v52 }
0x1cc6   : > { %v2507_v1 = vpop.f32.mrf.mxu1 }
0x1cc7   : > { %v2508_v3 = vadd.f32 %v2507_v1, %v2478_v61 }
0x1cc9   : > { %v2510_v28 = vadd.f32 %v5730_v5, %v2508_v3 }
0x1ccb   : > { %4688 = vtanh.f32 %v2510_v28  ;;  %v4481_v36 = vmul.f32 -1.442695, %v2510_v28 }
0x1ccd   : > { %4690 = vpow2.f32 %v4481_v36 }
0x1cd1   : > { %v4689_v31 = vpop.eup %4688 }
0x1cd2   : > { %2533 = vrot.lane.b32.xlu0 %v4689_v31, %s4887_s0 }
0x1cd3   : > { %v4691_v30 = vpop.eup %4690 }
0x1cd4   : > { %v2514_v32 = vadd.f32 1.0, %v4691_v30 }
0x1cd6   : > { %4692 = vrcp.f32 %v2514_v32  ;;  %v2526_v54 = vand.u32 2147483648, %v2514_v32  ;;  %vm2520_vm13 = vweird.f32 %v2514_v32  ;;  %v2524_v44 = vand.u32 2147483647, %v2514_v32 }
0x1cd8   : > { %v2527_v26 = vor.u32 1.1754944e-38, %v2526_v54  ;;  %vm2525_vm15 = vcmp.eq.f32.partialorder %v2524_v44, 8.507059e+37 }
0x1cdc   : > { %v4693_v37 = vpop.eup %4692 }
0x1cdd   : > { %v2516_v25 = vmul.f32 %v4693_v37, %v2514_v32  ;;  %vm2521_vm12 = vweird.f32 %v4693_v37 }
0x1cde   : > { %vm2522_vm14 = vmor %vm2520_vm13, %vm2521_vm12 }
0x1cdf   : > { %v2517_v56 = vsub.f32 1.0, %v2516_v25 }
0x1ce1   : > { %v2518_v57 = vmul.f32 %v4693_v37, %v2517_v56 }
0x1ce3   : > { %v2519_v34 = vadd.f32 %v4693_v37, %v2518_v57 }
0x1ce5   : > { %v2523_v8 = vsel %vm2522_vm14, %v4693_v37, %v2519_v34 }
0x1ce6   : > { %v2528_v23 = vsel %vm2525_vm15, %v2527_v26, %v2523_v8 }
0x1ce7   : > { %v2531_v15 = vmul.f32 %v2528_v23, %v5541_v11 }
0x1d44   : > { %v2534_v60 = vpop.permute.xlu0 %2533 }
0x1d45   : > { %v2536_v9 = vmul.f32 %v2534_v60, %v2528_v23 }
0x1d47   : > { %2538 = vrot.lane.b32.xlu1 %v2536_v9, %s6268_s2 }
0x1db9   : > { %v2539_v50 = vpop.permute.xlu1 %2538 }
0x1dba   : > { %v5736_v12 = vadd.f32 %v2539_v50, %v2531_v15 }
0x1dbc   : > { %4694 = vtanh.f32 %v5736_v12 }
0x1dc2   : > { %v4695_v53 = vpop.eup %4694 }
0x1dc3   : > { %2544 = vrot.lane.b32.xlu2 %v4695_v53, %s4887_s0 }
0x1e1d   : > { %v2545_v61 = vpop.permute.xlu2 %2544 }
0x1e1e   : > { %v5740_v1 = vmul.f32 %v2545_v61, %v2528_v23 }
0x1e20   : > { %2560 = vrot.lane.b32.xlu0 %v5740_v1, %s6268_s2 }
0x1e92   : > { %v2561_v3 = vpop.permute.xlu0 %2560 }
0x1e93   : > { %4482 = vmatmul.msk.f32.vlgmr.msra.gmra.mxu2 %vm832_vm0, %v2561_v3 }
0x1e94   : > { %2875 = vmatpush.msra.mxu2 %v5556_v27 }
0x1e96   : > { %2876 = vmatpush.msra.mxu2 %v5562_v39 }
0x1e98   : > { %2877 = vmatpush.msra.mxu2 %v5568_v42 }
0x1e9a   : > { %2878 = vmatpush.msra.mxu2 %v5574_v43 }
0x1f16   : > { %v2581_v11 = vpop.f32.mrf.mxu2 }
0x1f17   : > { %v2582_v28 = vadd.f32 %v5580_v45, %v2581_v11 }
0x1f19   : > { %v2585_v31 = vrot.slane %v2582_v28, 1  ;;  %4484 = vmatmul.msk.f32.vlgmr.msra.gmra.mxu3 %vm832_vm0, %v2582_v28 }
0x1f1a   : > { %2904 = vmatpush.msra.mxu3 %v5587_v59 }
0x1f1b   : > { %4486 = vmatmul.msk.f32.vlgmr.msrb.gmra.mxu0 %vm832_vm0, %v2585_v31 }
0x1f1c   : > { %2905 = vmatpush.msra.mxu3 %v5594_v49  ;;  %2978 = vmatpush.msrb.mxu0 %v5456_v55 }
0x1f1e   : > { %2906 = vmatpush.msra.mxu3 %v5601_v19  ;;  %2979 = vmatpush.msrb.mxu0 %v5607_v20 }
0x1f20   : > { %2907 = vmatpush.msra.mxu3 %v5613_v63  ;;  %2980 = vmatpush.msrb.mxu0 %v5619_v6 }
0x1f22   : > { %2981 = vmatpush.msrb.mxu0 %v5625_v2 }
0x1f98   : > { %v2627_v36 = vpop.f32.mrf.mxu0 }
0x1f99   : > { %v2631_v30 = vmul.f32 0.17677669, %v2627_v36 }
0x1f9b   : > { %v2635_v32 = vsel %vm1010_vm2, %v2631_v30, -inf }
0x1f9c   : > { %v2605_v37 = vpop.f32.mrf.mxu3  ;;  %2636 = vmax.xlane.f32.xlu1 %v2635_v32 }
0x1f9d   : > { %v2630_v25 = vmul.f32 0.17677669, %v2605_v37 }
0x1f9f   : > { %v2632_v56 = vsel %vm1010_vm2, %v2630_v25, -inf }
0x1fa0   : > { %2633 = vmax.xlane.f32.xlu2 %v2632_v56 }
0x200f   : > { %v2637_v55 = vpop.xlane.xlu1 %2636 }
0x2010   : > { %v2639_v57 = vsub.f32 %v2631_v30, %v2637_v55 }
0x2012   : > { %v2642_v34 = vmul.f32 1.442695, %v2639_v57 }
0x2013   : > { %v2634_v54 = vpop.xlane.xlu2 %2633 }
0x2014   : > { %4696 = vpow2.f32 %v2642_v34  ;;  %v2638_v44 = vsub.f32 %v2630_v25, %v2634_v54 }
0x2016   : > { %v2640_v8 = vmul.f32 1.442695, %v2638_v44 }
0x2018   : > { %4698 = vpow2.f32 %v2640_v8 }
0x201a   : > { %v4697_v26 = vpop.eup %4696 }
0x201b   : > { %v2647_v60 = vsel %vm1010_vm2, %v4697_v26, 0.0 }
0x201c   : > { %2648 = vadd.xlane.f32.xlu0 %v2647_v60 }
0x201e   : > { %v4699_v23 = vpop.eup %4698 }
0x201f   : > { %v2644_v9 = vsel %vm1010_vm2, %v4699_v23, 0.0 }
0x2020   : > { %2645 = vadd.xlane.f32.xlu1 %v2644_v9 }
0x208f   : > { %v2649_v15 = vpop.xlane.xlu0 %2648 }
0x2090   : > { %4700 = vrcp.f32 %v2649_v15 }
0x2093   : > { %v2646_v50 = vpop.xlane.xlu1 %2645 }
0x2094   : > { %4702 = vrcp.f32 %v2646_v50 }
0x2096   : > { %v4701_v53 = vpop.eup %4700 }
0x2097   : > { %v2653_v61 = vmul.f32 %v4701_v53, %v4697_v26 }
0x2099   : > { %4488 = vmatmul.msk.f32.vlgmr.msrb.gmra.mxu2 %vm1033_vm3, %v2653_v61 }
0x209a   : > { %v4703_v11 = vpop.eup %4702  ;;  %4500 = vmatpush.xpose.msk.msrb.mxu2 %vm832_vm0, %v5102_v24 }
0x209b   : > { %v2652_v28 = vmul.f32 %v4703_v11, %v4699_v23 }
0x209d   : > { %4487 = vmatmul.msk.f32.vlgmr.msrb.gmra.mxu1 %vm1033_vm3, %v2652_v28 }
0x209e   : > { %4498 = vmatpush.xpose.msk.msrb.mxu1 %vm832_vm0, %v5096_v21 }
0x20a1   : > { %4494 = vmatmul.msk.f32.vlgmr.msra.gmra.mxu2 %vm832_vm0, %v2561_v3 }
0x20a2   : > { %3143 = vmatpush.msra.mxu2 %v5669_v35 }
0x20a4   : > { %3144 = vmatpush.msra.mxu2 %v5675_v17 }
0x20a5   : > { %4491 = vmatmul.msk.f32.vlgmr.msra.gmra.mxu1 %vm832_vm0, %v5719_v0 }
0x20a6   : > { %3120 = vmatpush.msra.mxu1 %v5643_v58  ;;  %3145 = vmatpush.msra.mxu2 %v5681_v38 }
0x20a8   : > { %3121 = vmatpush.msra.mxu1 %v5649_v10  ;;  %3146 = vmatpush.msra.mxu2 %v5687_v18 }
0x20aa   : > { %3122 = vmatpush.msra.mxu1 %v5655_v29 }
0x20ac   : > { %3123 = vmatpush.msra.mxu1 %v5661_v13 }
0x211a   : > { %v2674_v36 = vpop.f32.mrf.mxu1 }
0x211c   : > { %v2697_v3 = vpop.f32.mrf.mxu2 }
0x211d   : > { %v2702_v31 = vrot.slane %v2697_v3, 7 }
0x211f   : > { %v2703_v30 = vsel %vm932_vm1, %v2702_v31, %v2674_v36 }
0x2120   : > { %4489 = vmatmul.msk.f32.vlgmr.msrb.gmra.mxu3 %vm832_vm0, %v2703_v30 }
0x2121   : > { %3074 = vmatpush.msrb.mxu3 %v5133_v41 }
0x2122   : > { %v2773_v37 = vpop.f32.mrf.mxu1 }
0x2123   : > { %v2777_v57 = vrot.slane %v2773_v37, 4  ;;  %v2778_v34 = vrot.slane %v2773_v37, 5 }
0x21a3   : > { %v2723_v0 = vpop.f32.mrf.mxu3 }
0x21a4   : > { %v2724_v32 = vadd.f32 %v5696_v7, %v2723_v0 }
0x21a6   : > { %4490 = vmatmul.msk.f32.vlgmr.msra.gmra.mxu0 %vm832_vm0, %v2724_v32 }
0x21a7   : > { %3097 = vmatpush.msra.mxu0 %v5136_v46 }
0x2223   : > { %v2746_v25 = vpop.f32.mrf.mxu0 }
0x2224   : > { %v2750_v56 = vrot.slane %v2746_v25, 4  ;;  %v2751_v55 = vrot.slane %v2746_v25, 5 }
0x2226   : > { %v2754_v54 = vadd.f32 %v2750_v56, %v5317_v47  ;;  %v2755_v44 = vadd.f32 %v2751_v55, %v5314_v40 }
0x2228   : > { %v2781_v8 = vadd.f32 %v2777_v57, %v2754_v54  ;;  %v2782_v26 = vadd.f32 %v2778_v34, %v2755_v44 }
0x222a   : > { %4704 = vtanh.f32 %v2781_v8  ;;  %v4492_v9 = vmul.f32 -1.442695, %v2781_v8  ;;  %v4493_v61 = vmul.f32 -1.442695, %v2782_v26 }
0x222b   : > { %4706 = vtanh.f32 %v2782_v26 }
0x222c   : > { %4708 = vpow2.f32 %v4492_v9 }
0x2230   : > { %v4705_v60 = vpop.eup %4704 }
0x2231   : > { %v4707_v23 = vpop.eup %4706  ;;  %2833 = vrot.lane.b32.xlu2 %v4705_v60, %s4887_s0 }
0x2232   : > { %2835 = vrot.lane.b32.xlu0 %v4707_v23, %s4887_s0  ;;  %v4709_v15 = vpop.eup %4708 }
0x2233   : > { %v2789_v50 = vadd.f32 1.0, %v4709_v15 }
0x2235   : > { %4710 = vrcp.f32 %v2789_v50  ;;  %v2802_v0 = vand.u32 2147483648, %v2789_v50  ;;  %vm2796_vm5 = vweird.f32 %v2789_v50  ;;  %v2800_v32 = vand.u32 2147483647, %v2789_v50 }
0x2236   : > { %4712 = vpow2.f32 %v4493_v61 }
0x2237   : > { %v2803_v25 = vor.u32 1.1754944e-38, %v2802_v0  ;;  %vm2801_vm7 = vcmp.eq.f32.partialorder %v2800_v32, 8.507059e+37 }
0x223b   : > { %v4711_v53 = vpop.eup %4710 }
0x223c   : > { %v2792_v11 = vmul.f32 %v4711_v53, %v2789_v50  ;;  %v4713_v31 = vpop.eup %4712  ;;  %vm2797_vm4 = vweird.f32 %v4711_v53 }
0x223d   : > { %v2790_v36 = vadd.f32 1.0, %v4713_v31  ;;  %vm2798_vm6 = vmor %vm2796_vm5, %vm2797_vm4 }
0x223e   : > { %v2793_v28 = vsub.f32 1.0, %v2792_v11  ;;  %v2825_v11 = vrot.slane %v5709_v48, 7 }
0x223f   : > { %4714 = vrcp.f32 %v2790_v36  ;;  %v2817_v60 = vand.u32 2147483648, %v2790_v36  ;;  %vm2811_vm9 = vweird.f32 %v2790_v36  ;;  %v2815_v23 = vand.u32 2147483647, %v2790_v36 }
0x2240   : > { %v2794_v3 = vmul.f32 %v4711_v53, %v2793_v28 }
0x2241   : > { %v2818_v15 = vor.u32 1.1754944e-38, %v2817_v60  ;;  %vm2816_vm11 = vcmp.eq.f32.partialorder %v2815_v23, 8.507059e+37 }
0x2242   : > { %v2795_v30 = vadd.f32 %v4711_v53, %v2794_v3 }
0x2244   : > { %v2799_v37 = vsel %vm2798_vm6, %v4711_v53, %v2795_v30 }
0x2245   : > { %v2804_v55 = vsel %vm2801_vm7, %v2803_v25, %v2799_v37  ;;  %v4715_v34 = vpop.eup %4714 }
0x2246   : > { %v2807_v54 = vmul.f32 %v4715_v34, %v2790_v36  ;;  %vm2812_vm8 = vweird.f32 %v4715_v34  ;;  %v2829_v28 = vmul.f32 %v2825_v11, %v2804_v55  ;;  %v2826_v36 = vrot.slane %v5711_v16, 7 }
0x2247   : > { %vm2813_vm10 = vmor %vm2811_vm9, %vm2812_vm8 }
0x2248   : > { %v2808_v44 = vsub.f32 1.0, %v2807_v54 }
0x224a   : > { %v2809_v8 = vmul.f32 %v4715_v34, %v2808_v44 }
0x224c   : > { %v2810_v26 = vadd.f32 %v4715_v34, %v2809_v8 }
0x224e   : > { %v2814_v9 = vsel %vm2813_vm10, %v4715_v34, %v2810_v26 }
0x224f   : > { %v2819_v53 = vsel %vm2816_vm11, %v2818_v15, %v2814_v9 }
0x2250   : > { %v2830_v0 = vmul.f32 %v2826_v36, %v2819_v53 }
0x228b   : > { %v2834_v56 = vpop.permute.xlu2 %2833 }
0x228c   : > { %v2839_v57 = vmul.f32 %v2834_v56, %v2804_v55 }
0x228e   : > { %2843 = vrot.lane.b32.xlu1 %v2839_v57, %s6268_s2 }
0x22a4   : > { %v2836_v50 = vpop.permute.xlu0 %2835 }
0x22a5   : > { %v2840_v61 = vmul.f32 %v2836_v50, %v2819_v53 }
0x22a7   : > { %2845 = vrot.lane.b32.xlu0 %v2840_v61, %s6268_s2 }
0x2300   : > { %v2844_v3 = vpop.permute.xlu1 %2843 }
0x2301   : > { %v5794_v31 = vadd.f32 %v2844_v3, %v2829_v28 }
0x2303   : > { %4716 = vtanh.f32 %v5794_v31 }
0x2309   : > { %v4717_v30 = vpop.eup %4716 }
0x230a   : > { %2855 = vrot.lane.b32.xlu2 %v4717_v30, %s4887_s0 }
0x2319   : > { %v2846_v32 = vpop.permute.xlu0 %2845 }
0x231a   : > { %v5799_v37 = vadd.f32 %v2846_v32, %v2830_v0 }
0x231c   : > { %4718 = vtanh.f32 %v5799_v37 }
0x2322   : > { %v4719_v25 = vpop.eup %4718 }
0x2323   : > { %2857 = vrot.lane.b32.xlu0 %v4719_v25, %s4887_s0 }
0x2364   : > { %v2856_v48 = vpop.permute.xlu2 %2855 }
0x2365   : > { %v2861_v56 = vmul.f32 %v2856_v48, %v2804_v55  ;;  %v2880_v55 = vpop.f32.mrf.mxu2 }
0x2367   : > { %v2885_v54 = vrot.slane %v2861_v56, 4 }
0x2395   : > { %v2858_v57 = vpop.permute.xlu0 %2857 }
0x2396   : > { %v2862_v34 = vmul.f32 %v2858_v57, %v2819_v53 }
0x2398   : > { %v2886_v44 = vrot.slane %v2862_v34, 3 }
0x239a   : > { %v2887_v8 = vsel %vm932_vm1, %v2886_v44, %v2885_v54 }
0x239b   : > { %2888 = vrot.lane.b32.xlu2 %v2887_v8, %s6268_s2 }
0x23f5   : > { %v5805_v16 = vpop.permute.xlu2 %2888 }
0x23f6   : > { %4495 = vmatmul.msk.f32.vlgmr.msra.gmra.mxu3 %vm832_vm0, %v5805_v16 }
0x23f7   : > { %3170 = vmatpush.msra.mxu3 %v5516_v62 }
0x23f9   : > { %3171 = vmatpush.msra.mxu3 %v5522_v51 }
0x23fb   : > { %3172 = vmatpush.msra.mxu3 %v5528_v22 }
0x23fd   : > { %3173 = vmatpush.msra.mxu3 %v5534_v52 }
0x2479   : > { %v2909_v26 = vpop.f32.mrf.mxu3 }
0x247a   : > { %v2910_v60 = vadd.f32 %v2909_v26, %v2880_v55 }
0x247c   : > { %v2912_v23 = vadd.f32 %v5730_v5, %v2910_v60 }
0x247e   : > { %4720 = vtanh.f32 %v2912_v23  ;;  %v4496_v15 = vmul.f32 -1.442695, %v2912_v23 }
0x2480   : > { %4722 = vpow2.f32 %v4496_v15 }
0x2484   : > { %v4721_v9 = vpop.eup %4720 }
0x2485   : > { %2935 = vrot.lane.b32.xlu1 %v4721_v9, %s4887_s0 }
0x2486   : > { %v4723_v50 = vpop.eup %4722 }
0x2487   : > { %v2916_v53 = vadd.f32 1.0, %v4723_v50 }
0x2489   : > { %4724 = vrcp.f32 %v2916_v53  ;;  %v2928_v52 = vand.u32 2147483648, %v2916_v53  ;;  %vm2922_vm13 = vweird.f32 %v2916_v53  ;;  %v2926_v28 = vand.u32 2147483647, %v2916_v53 }
0x248b   : > { %v2929_v30 = vor.u32 1.1754944e-38, %v2928_v52  ;;  %vm2927_vm15 = vcmp.eq.f32.partialorder %v2926_v28, 8.507059e+37 }
0x248f   : > { %v4725_v62 = vpop.eup %4724 }
0x2490   : > { %v2918_v51 = vmul.f32 %v4725_v62, %v2916_v53  ;;  %vm2923_vm12 = vweird.f32 %v4725_v62 }
0x2491   : > { %vm2924_vm14 = vmor %vm2922_vm13, %vm2923_vm12 }
0x2492   : > { %v2919_v61 = vsub.f32 1.0, %v2918_v51 }
0x2494   : > { %v2920_v22 = vmul.f32 %v4725_v62, %v2919_v61 }
0x2496   : > { %v2921_v11 = vadd.f32 %v4725_v62, %v2920_v22 }
0x2498   : > { %v2925_v3 = vsel %vm2924_vm14, %v4725_v62, %v2921_v11 }
0x2499   : > { %v2930_v0 = vsel %vm2927_vm15, %v2929_v30, %v2925_v3 }
0x249a   : > { %v2933_v25 = vmul.f32 %v2930_v0, %v5736_v12 }
0x24f7   : > { %v2936_v36 = vpop.permute.xlu1 %2935 }
0x24f8   : > { %v2938_v32 = vmul.f32 %v2936_v36, %v2930_v0 }
0x24fa   : > { %2940 = vrot.lane.b32.xlu0 %v2938_v32, %s6268_s2 }
0x256c   : > { %v2941_v48 = vpop.permute.xlu0 %2940 }
0x256d   : > { %v5817_v56 = vadd.f32 %v2941_v48, %v2933_v25 }
0x256f   : > { %4726 = vtanh.f32 %v5817_v56 }
0x2575   : > { %v4727_v57 = vpop.eup %4726 }
0x2576   : > { %2946 = vrot.lane.b32.xlu2 %v4727_v57, %s4887_s0 }
0x25d0   : > { %v2947_v34 = vpop.permute.xlu2 %2946 }
0x25d1   : > { %v5821_v54 = vmul.f32 %v2947_v34, %v2930_v0 }
0x25d3   : > { %2962 = vrot.lane.b32.xlu1 %v5821_v54, %s6268_s2 }
0x2645   : > { %v2963_v44 = vpop.permute.xlu1 %2962 }
0x2646   : > { %4497 = vmatmul.msk.f32.vlgmr.msrb.gmra.mxu0 %vm832_vm0, %v2963_v44 }
0x2647   : > { %3277 = vmatpush.msrb.mxu0 %v5556_v27  ;;  %v5838_v27 = vld [vmem:[%s6279_s6 + $0x18] sm:$0xff] }
0x2649   : > { %3278 = vmatpush.msrb.mxu0 %v5562_v39 }
0x264b   : > { %3279 = vmatpush.msrb.mxu0 %v5568_v42 }
0x264d   : > { %3280 = vmatpush.msrb.mxu0 %v5574_v43 }
0x26c3   : > { %v2983_v12 = vpop.f32.mrf.mxu0 }
0x26c4   : > { %v2984_v8 = vadd.f32 %v5580_v45, %v2983_v12 }
0x26c6   : > { %v2987_v55 = vrot.slane %v2984_v8, 1  ;;  %4499 = vmatmul.msk.f32.vlgmr.msrb.gmra.mxu1 %vm832_vm0, %v2984_v8 }
0x26c7   : > { %3306 = vmatpush.msrb.mxu1 %v5587_v59 }
0x26c8   : > { %4501 = vmatmul.msk.f32.vlgmr.msrb.gmra.mxu2 %vm832_vm0, %v2987_v55 }
0x26c9   : > { %3307 = vmatpush.msrb.mxu1 %v5594_v49  ;;  %3380 = vmatpush.msrb.mxu2 %v5838_v27 }
0x26cb   : > { %3308 = vmatpush.msrb.mxu1 %v5601_v19  ;;  %3381 = vmatpush.msrb.mxu2 %v5607_v20 }
0x26cd   : > { %3309 = vmatpush.msrb.mxu1 %v5613_v63  ;;  %3382 = vmatpush.msrb.mxu2 %v5619_v6 }
0x26cf   : > { %3383 = vmatpush.msrb.mxu2 %v5625_v2 }
0x2743   : > { %v3007_v39 = vpop.f32.mrf.mxu1 }
0x2744   : > { %v3032_v42 = vmul.f32 0.17677669, %v3007_v39 }
0x2746   : > { %v3034_v43 = vsel %vm1010_vm2, %v3032_v42, -inf }
0x2747   : > { %3035 = vmax.xlane.f32.xlu0 %v3034_v43 }
0x274b   : > { %v3029_v45 = vpop.f32.mrf.mxu2 }
0x274c   : > { %v3033_v59 = vmul.f32 0.17677669, %v3029_v45 }
0x274e   : > { %v3037_v49 = vsel %vm1010_vm2, %v3033_v59, -inf }
0x274f   : > { %3038 = vmax.xlane.f32.xlu2 %v3037_v49 }
0x27ba   : > { %v3036_v26 = vpop.xlane.xlu0 %3035 }
0x27bb   : > { %v3040_v19 = vsub.f32 %v3032_v42, %v3036_v26 }
0x27bd   : > { %v3042_v60 = vmul.f32 1.442695, %v3040_v19 }
0x27bf   : > { %4728 = vpow2.f32 %v3042_v60 }
0x27c2   : > { %v3039_v20 = vpop.xlane.xlu2 %3038 }
0x27c3   : > { %v3041_v63 = vsub.f32 %v3033_v59, %v3039_v20 }
0x27c5   : > { %v4729_v23 = vpop.eup %4728  ;;  %v3044_v6 = vmul.f32 1.442695, %v3041_v63 }
0x27c6   : > { %v3046_v2 = vsel %vm1010_vm2, %v4729_v23, 0.0 }
0x27c7   : > { %4730 = vpow2.f32 %v3044_v6  ;;  %3047 = vadd.xlane.f32.xlu1 %v3046_v2 }
0x27cd   : > { %v4731_v9 = vpop.eup %4730 }
0x27ce   : > { %v3049_v15 = vsel %vm1010_vm2, %v4731_v9, 0.0 }
0x27cf   : > { %3050 = vadd.xlane.f32.xlu2 %v3049_v15 }
0x283a   : > { %v3048_v50 = vpop.xlane.xlu1 %3047 }
0x283b   : > { %4732 = vrcp.f32 %v3048_v50 }
0x2841   : > { %v4733_v53 = vpop.eup %4732 }
0x2842   : > { %v3054_v62 = vmul.f32 %v4733_v53, %v4729_v23  ;;  %v3051_v51 = vpop.xlane.xlu2 %3050 }
0x2843   : > { %4734 = vrcp.f32 %v3051_v51 }
0x2844   : > { %4502 = vmatmul.msk.f32.vlgmr.msrb.gmra.mxu3 %vm1033_vm3, %v3054_v62 }
0x2845   : > { %4513 = vmatpush.xpose.msk.msrb.mxu3 %vm832_vm0, %v5096_v21 }
0x2849   : > { %v4735_v61 = vpop.eup %4734 }
0x284a   : > { %v3055_v22 = vmul.f32 %v4735_v61, %v4731_v9 }
0x284c   : > { %4503 = vmatmul.msk.f32.vlgmr.msra.gmra.mxu0 %vm1033_vm3, %v3055_v22  ;;  %4506 = vmatmul.msk.f32.vlgmr.msra.gmra.mxu3 %vm832_vm0, %v5805_v16 }
0x284d   : > { %4515 = vmatpush.xpose.msk.msra.mxu0 %vm832_vm0, %v5102_v24  ;;  %3522 = vmatpush.msra.mxu3 %v5643_v58 }
0x284f   : > { %3523 = vmatpush.msra.mxu3 %v5649_v10 }
0x2851   : > { %3524 = vmatpush.msra.mxu3 %v5655_v29 }
0x2853   : > { %3525 = vmatpush.msra.mxu3 %v5661_v13 }
0x2854   : > { %4509 = vmatmul.msk.f32.vlgmr.msrb.gmra.mxu0 %vm832_vm0, %v2963_v44 }
0x2855   : > { %3545 = vmatpush.msrb.mxu0 %v5669_v35 }
0x2857   : > { %3546 = vmatpush.msrb.mxu0 %v5675_v17 }
0x2859   : > { %3547 = vmatpush.msrb.mxu0 %v5681_v38 }
0x285b   : > { %3548 = vmatpush.msrb.mxu0 %v5687_v18 }
0x28c7   : > { %v3076_v52 = vpop.f32.mrf.mxu3 }
0x28c9   : > { %v3099_v16 = vpop.f32.mrf.mxu0 }
0x28ca   : > { %v3104_v11 = vrot.slane %v3099_v16, 7  ;;  %v3227_v16 = vrot.slane %v5794_v31, 7 }
0x28cc   : > { %v3105_v58 = vsel %vm932_vm1, %v3104_v11, %v3076_v52 }
0x28cd   : > { %4504 = vmatmul.msk.f32.vlgmr.msra.gmra.mxu1 %vm832_vm0, %v3105_v58 }
0x28ce   : > { %3476 = vmatpush.msra.mxu1 %v5133_v41 }
0x28cf   : > { %v3175_v13 = vpop.f32.mrf.mxu3 }
0x28d0   : > { %v3179_v18 = vrot.slane %v3175_v13, 3  ;;  %v3180_v28 = vrot.slane %v3175_v13, 4 }
0x294a   : > { %v3125_v10 = vpop.f32.mrf.mxu1 }
0x294b   : > { %v3126_v29 = vadd.f32 %v5696_v7, %v3125_v10 }
0x294d   : > { %4505 = vmatmul.msk.f32.vlgmr.msra.gmra.mxu2 %vm832_vm0, %v3126_v29  ;;  %v3228_v29 = vrot.slane %v5799_v37, 7 }
0x294e   : > { %3499 = vmatpush.msra.mxu2 %v5136_v46 }
0x29d0   : > { %v3148_v35 = vpop.f32.mrf.mxu2 }
0x29d1   : > { %v3152_v17 = vrot.slane %v3148_v35, 3  ;;  %v3153_v38 = vrot.slane %v3148_v35, 4 }
0x29d3   : > { %v3156_v3 = vadd.f32 %v3152_v17, %v5317_v47  ;;  %v3157_v30 = vadd.f32 %v3153_v38, %v5314_v40 }
0x29d5   : > { %v3183_v36 = vadd.f32 %v3179_v18, %v3156_v3  ;;  %v3184_v0 = vadd.f32 %v3180_v28, %v3157_v30 }
0x29d7   : > { %4736 = vtanh.f32 %v3183_v36  ;;  %v4507_v25 = vmul.f32 -1.442695, %v3183_v36  ;;  %v4508_v48 = vmul.f32 -1.442695, %v3184_v0 }
0x29d8   : > { %4738 = vtanh.f32 %v3184_v0 }
0x29d9   : > { %4740 = vpow2.f32 %v4507_v25  ;;  %v5910_v25 = vld [vmem:[%s6253_s13 + $0x8] sm:$0xff] }
0x29da   : > { %4742 = vpow2.f32 %v4508_v48  ;;  %v5916_v48 = vld [vmem:[%s6253_s13] sm:$0xff] }
0x29dd   : > { %v4737_v32 = vpop.eup %4736 }
0x29de   : > { %v4739_v7 = vpop.eup %4738  ;;  %3235 = vrot.lane.b32.xlu0 %v4737_v32, %s4887_s0  ;;  %v5898_v32 = vld [vmem:[%s6253_s13 + $0x18] sm:$0xff] }
0x29df   : > { %3237 = vrot.lane.b32.xlu1 %v4739_v7, %s4887_s0  ;;  %v4741_v57 = vpop.eup %4740  ;;  %v5904_v7 = vld [vmem:[%s6253_s13 + $0x10] sm:$0xff] }
0x29e0   : > { %v4743_v34 = vpop.eup %4742  ;;  %v3191_v44 = vadd.f32 1.0, %v4741_v57  ;;  %v3282_v57 = vpop.f32.mrf.mxu0 }
0x29e1   : > { %v3192_v12 = vadd.f32 1.0, %v4743_v34 }
0x29e2   : > { %4744 = vrcp.f32 %v3191_v44  ;;  %v3204_v60 = vand.u32 2147483648, %v3191_v44  ;;  %vm3198_vm6 = vweird.f32 %v3191_v44  ;;  %v3202_v63 = vand.u32 2147483647, %v3191_v44 }
0x29e3   : > { %4746 = vrcp.f32 %v3192_v12  ;;  %v3219_v20 = vand.u32 2147483648, %v3192_v12  ;;  %vm3213_vm7 = vweird.f32 %v3192_v12  ;;  %v3217_v23 = vand.u32 2147483647, %v3192_v12 }
0x29e4   : > { %v3205_v9 = vor.u32 1.1754944e-38, %v3204_v60  ;;  %vm3203_vm10 = vcmp.eq.f32.partialorder %v3202_v63, 8.507059e+37 }
0x29e5   : > { %v3220_v15 = vor.u32 1.1754944e-38, %v3219_v20  ;;  %vm3218_vm11 = vcmp.eq.f32.partialorder %v3217_v23, 8.507059e+37 }
0x29e8   : > { %v4745_v8 = vpop.eup %4744 }
0x29e9   : > { %v4747_v55 = vpop.eup %4746  ;;  %v3194_v39 = vmul.f32 %v4745_v8, %v3191_v44  ;;  %vm3199_vm4 = vweird.f32 %v4745_v8 }
0x29ea   : > { %v3209_v42 = vmul.f32 %v4747_v55, %v3192_v12  ;;  %vm3214_vm5 = vweird.f32 %v4747_v55  ;;  %vm3200_vm8 = vmor %vm3198_vm6, %vm3199_vm4 }
0x29eb   : > { %v3195_v43 = vsub.f32 1.0, %v3194_v39  ;;  %vm3215_vm9 = vmor %vm3213_vm7, %vm3214_vm5 }
0x29ec   : > { %v3210_v45 = vsub.f32 1.0, %v3209_v42 }
0x29ed   : > { %v3196_v59 = vmul.f32 %v4745_v8, %v3195_v43 }
0x29ee   : > { %v3211_v49 = vmul.f32 %v4747_v55, %v3210_v45 }
0x29ef   : > { %v3197_v26 = vadd.f32 %v4745_v8, %v3196_v59 }
0x29f0   : > { %v3212_v19 = vadd.f32 %v4747_v55, %v3211_v49 }
0x29f1   : > { %v3201_v6 = vsel %vm3200_vm8, %v4745_v8, %v3197_v26 }
0x29f2   : > { %v3216_v2 = vsel %vm3215_vm9, %v4747_v55, %v3212_v19  ;;  %v3206_v53 = vsel %vm3203_vm10, %v3205_v9, %v3201_v6 }
0x29f3   : > { %v3221_v51 = vsel %vm3218_vm11, %v3220_v15, %v3216_v2  ;;  %v3231_v11 = vmul.f32 %v3227_v16, %v3206_v53  ;;  %v5956_v16 = vld [vmem:[%s6256_s16] sm:$0xff] }
0x29f4   : > { %v3232_v13 = vmul.f32 %v3228_v29, %v3221_v51 }
0x2a50   : > { %v3236_v50 = vpop.permute.xlu0 %3235 }
0x2a51   : > { %v3238_v62 = vpop.permute.xlu1 %3237  ;;  %v3241_v61 = vmul.f32 %v3236_v50, %v3206_v53 }
0x2a52   : > { %v3242_v22 = vmul.f32 %v3238_v62, %v3221_v51 }
0x2a53   : > { %3245 = vrot.lane.b32.xlu2 %v3241_v61, %s6268_s2  ;;  %v5944_v61 = vld [vmem:[%s6256_s16 + $0x10] sm:$0xff] }
0x2a54   : > { %3247 = vrot.lane.b32.xlu0 %v3242_v22, %s6268_s2  ;;  %v5950_v22 = vld [vmem:[%s6256_s16 + $0x8] sm:$0xff] }
0x2aad   : > { %v3246_v52 = vpop.permute.xlu2 %3245 }
0x2aae   : > { %v5880_v58 = vadd.f32 %v3246_v52, %v3231_v11  ;;  %v5962_v52 = vld [vmem:[%s6283_s24] ss:$0 sm:$0xff] }
0x2ab0   : > { %4748 = vtanh.f32 %v5880_v58 }
0x2ab6   : > { %v4749_v10 = vpop.eup %4748 }
0x2ab7   : > { %3257 = vrot.lane.b32.xlu1 %v4749_v10, %s4887_s0 }
0x2ac6   : > { %v3248_v35 = vpop.permute.xlu0 %3247 }
0x2ac7   : > { %v5885_v17 = vadd.f32 %v3248_v35, %v3232_v13  ;;  %v5969_v13 = vld [vmem:[%s6255_s15 + $0x18] sm:$0xff]  ;;  %v5976_v35 = vld [vmem:[%s6255_s15 + $0x10] sm:$0xff] }
0x2ac9   : > { %4750 = vtanh.f32 %v5885_v17 }
0x2acf   : > { %v4751_v38 = vpop.eup %4750 }
0x2ad0   : > { %3259 = vrot.lane.b32.xlu0 %v4751_v38, %s4887_s0  ;;  %v5983_v38 = vld [vmem:[%s6255_s15 + $0x8] sm:$0xff] }
0x2b29   : > { %v3258_v31 = vpop.permute.xlu1 %3257 }
0x2b2a   : > { %v3263_v18 = vmul.f32 %v3258_v31, %v3206_v53  ;;  %v4864_v31 = vld [vmem:[%s6279_s6 + $0x10] sm:$0xff] }
0x2b2c   : > { %v3287_v30 = vrot.slane %v3263_v18, 5  ;;  %v5992_v18 = vld [vmem:[%s6255_s15] sm:$0xff] }
0x2b42   : > { %v3260_v28 = vpop.permute.xlu0 %3259 }
0x2b43   : > { %v3264_v3 = vmul.f32 %v3260_v28, %v3221_v51  ;;  %v4867_v28 = vld [vmem:[%s6279_s6] sm:$0xff] }
0x2b45   : > { %v3288_v36 = vrot.slane %v3264_v3, 4 }
0x2b47   : > { %v3289_v0 = vsel %vm932_vm1, %v3288_v36, %v3287_v30 }
0x2b48   : > { %3290 = vrot.lane.b32.xlu2 %v3289_v0, %s6268_s2 }
0x2ba2   : > { %v5891_v37 = vpop.permute.xlu2 %3290 }
0x2ba3   : > { %4510 = vmatmul.msk.f32.vlgmr.msrb.gmra.mxu1 %vm832_vm0, %v5891_v37 }
0x2ba4   : > { %3572 = vmatpush.msrb.mxu1 %v5898_v32 }
0x2ba6   : > { %3573 = vmatpush.msrb.mxu1 %v5904_v7 }
0x2ba8   : > { %3574 = vmatpush.msrb.mxu1 %v5910_v25 }
0x2baa   : > { %3575 = vmatpush.msrb.mxu1 %v5916_v48 }
0x2c20   : > { %v3311_v34 = vpop.f32.mrf.mxu1 }
0x2c21   : > { %v3312_v44 = vadd.f32 %v3311_v34, %v3282_v57 }
0x2c23   : > { %v3314_v12 = vadd.f32 %v5730_v5, %v3312_v44 }
0x2c25   : > { %4752 = vtanh.f32 %v3314_v12  ;;  %v4511_v55 = vmul.f32 -1.442695, %v3314_v12 }
0x2c27   : > { %4754 = vpow2.f32 %v4511_v55 }
0x2c2b   : > { %v4753_v8 = vpop.eup %4752 }
0x2c2c   : > { %3337 = vrot.lane.b32.xlu1 %v4753_v8, %s4887_s0 }
0x2c2d   : > { %v4755_v39 = vpop.eup %4754 }
0x2c2e   : > { %v3318_v42 = vadd.f32 1.0, %v4755_v39 }
0x2c30   : > { %4756 = vrcp.f32 %v3318_v42  ;;  %v3330_v19 = vand.u32 2147483648, %v3318_v42  ;;  %vm3324_vm13 = vweird.f32 %v3318_v42  ;;  %v3328_v60 = vand.u32 2147483647, %v3318_v42 }
0x2c32   : > { %v3331_v20 = vor.u32 1.1754944e-38, %v3330_v19  ;;  %vm3329_vm15 = vcmp.eq.f32.partialorder %v3328_v60, 8.507059e+37 }
0x2c36   : > { %v4757_v43 = vpop.eup %4756 }
0x2c37   : > { %v3320_v45 = vmul.f32 %v4757_v43, %v3318_v42  ;;  %vm3325_vm12 = vweird.f32 %v4757_v43 }
0x2c38   : > { %vm3326_vm14 = vmor %vm3324_vm13, %vm3325_vm12 }
0x2c39   : > { %v3321_v59 = vsub.f32 1.0, %v3320_v45 }
0x2c3b   : > { %v3322_v49 = vmul.f32 %v4757_v43, %v3321_v59 }
0x2c3d   : > { %v3323_v26 = vadd.f32 %v4757_v43, %v3322_v49 }
0x2c3f   : > { %v3327_v5 = vsel %vm3326_vm14, %v4757_v43, %v3323_v26 }
0x2c40   : > { %v3332_v23 = vsel %vm3329_vm15, %v3331_v20, %v3327_v5 }
0x2c41   : > { %v3335_v2 = vmul.f32 %v3332_v23, %v5817_v56  ;;  %v5938_v56 = vld [vmem:[%s6256_s16 + $0x18] sm:$0xff] }
0x2c9e   : > { %v3338_v63 = vpop.permute.xlu1 %3337 }
0x2c9f   : > { %v3340_v6 = vmul.f32 %v3338_v63, %v3332_v23 }
0x2ca1   : > { %3342 = vrot.lane.b32.xlu0 %v3340_v6, %s6268_s2  ;;  %v4869_v6 = vld [vmem:[%s6252_s12 + $0x30] sm:$0xff] }
0x2d13   : > { %v3343_v9 = vpop.permute.xlu0 %3342 }
0x2d14   : > { %v5923_v15 = vadd.f32 %v3343_v9, %v3335_v2  ;;  %v4872_v2 = vld [vmem:[%s6250_s10 + $0x10] sm:$0xff]  ;;  %v4873_v9 = vld [vmem:[%s6252_s12 + $0x20] sm:$0xff] }
0x2d16   : > { %4758 = vtanh.f32 %v5923_v15 }
0x2d1c   : > { %v4759_v50 = vpop.eup %4758 }
0x2d1d   : > { %3348 = vrot.lane.b32.xlu2 %v4759_v50, %s4887_s0  ;;  %v4875_v50 = vld [vmem:[%s6250_s10] sm:$0xff] }
0x2d77   : > { %v3349_v53 = vpop.permute.xlu2 %3348 }
0x2d78   : > { %v5927_v62 = vmul.f32 %v3349_v53, %v3332_v23  ;;  %v4868_v23 = vld [vmem:[%s6252_s12 + $0x38] sm:$0xff] }
0x2d7a   : > { %3364 = vrot.lane.b32.xlu1 %v5927_v62, %s6268_s2  ;;  %s6285_s2 = smov 32  }
0x2dec   : > { %v5931_v51 = vpop.permute.xlu1 %3364 }
0x2ded   : > { %4512 = vmatmul.msk.f32.vlgmr.msrb.gmra.mxu2 %vm832_vm0, %v5931_v51 }
0x2dee   : > { %3679 = vmatpush.msrb.mxu2 %v5938_v56 }
0x2df0   : > { %3680 = vmatpush.msrb.mxu2 %v5944_v61 }
0x2df2   : > { %3681 = vmatpush.msrb.mxu2 %v5950_v22 }
0x2df4   : > { %3682 = vmatpush.msrb.mxu2 %v5956_v16 }
0x2e70   : > { %v3385_v11 = vpop.f32.mrf.mxu2 }
0x2e71   : > { %v3386_v10 = vadd.f32 %v5962_v52, %v3385_v11 }
0x2e73   : > { %v3389_v29 = vrot.slane %v3386_v10, 1  ;;  %4514 = vmatmul.msk.f32.vlgmr.msrb.gmra.mxu3 %vm832_vm0, %v3386_v10 }
0x2e74   : > { %3708 = vmatpush.msrb.mxu3 %v5969_v13 }
0x2e75   : > { %4516 = vmatmul.msk.f32.vlgmr.msra.gmra.mxu0 %vm832_vm0, %v3389_v29 }
0x2e76   : > { %3709 = vmatpush.msrb.mxu3 %v5976_v35  ;;  %3782 = vmatpush.msra.mxu0 %v5838_v27  ;;  %v4866_v27 = vld [vmem:[%s6279_s6 + $0x8] sm:$0xff] }
0x2e78   : > { %3710 = vmatpush.msrb.mxu3 %v5983_v38  ;;  %3783 = vmatpush.msra.mxu0 %v4864_v31  ;;  %v6045_v31 = vld [vmem:[%s6251_s11] ss:$0 sm:$0xff] }
0x2e7a   : > { %3711 = vmatpush.msrb.mxu3 %v5992_v18  ;;  %3784 = vmatpush.msra.mxu0 %v4866_v27 }
0x2e7c   : > { %3785 = vmatpush.msra.mxu0 %v4867_v28 }
0x2ef2   : > { %v3431_v3 = vpop.f32.mrf.mxu0 }
0x2ef3   : > { %v3435_v30 = vmul.f32 0.17677669, %v3431_v3 }
0x2ef5   : > { %v3439_v36 = vsel %vm1010_vm2, %v3435_v30, -inf }
0x2ef6   : > { %v3409_v0 = vpop.f32.mrf.mxu3  ;;  %3440 = vmax.xlane.f32.xlu0 %v3439_v36 }
0x2ef7   : > { %v3434_v57 = vmul.f32 0.17677669, %v3409_v0 }
0x2ef9   : > { %v3436_v34 = vsel %vm1010_vm2, %v3434_v57, -inf }
0x2efa   : > { %3437 = vmax.xlane.f32.xlu2 %v3436_v34 }
0x2f69   : > { %v3441_v44 = vpop.xlane.xlu0 %3440 }
0x2f6a   : > { %v3443_v12 = vsub.f32 %v3435_v30, %v3441_v44 }
0x2f6c   : > { %v3446_v8 = vmul.f32 1.442695, %v3443_v12 }
0x2f6d   : > { %v3438_v55 = vpop.xlane.xlu2 %3437 }
0x2f6e   : > { %4760 = vpow2.f32 %v3446_v8  ;;  %v3442_v39 = vsub.f32 %v3434_v57, %v3438_v55 }
0x2f70   : > { %v3444_v42 = vmul.f32 1.442695, %v3442_v39 }
0x2f72   : > { %4762 = vpow2.f32 %v3444_v42 }
0x2f74   : > { %v4761_v43 = vpop.eup %4760 }
0x2f75   : > { %v3451_v45 = vsel %vm1010_vm2, %v4761_v43, 0.0 }
0x2f76   : > { %3452 = vadd.xlane.f32.xlu1 %v3451_v45 }
0x2f78   : > { %v4763_v59 = vpop.eup %4762 }
0x2f79   : > { %v3448_v49 = vsel %vm1010_vm2, %v4763_v59, 0.0 }
0x2f7a   : > { %3449 = vadd.xlane.f32.xlu0 %v3448_v49 }
0x2fe9   : > { %v3453_v26 = vpop.xlane.xlu1 %3452 }
0x2fea   : > { %4764 = vrcp.f32 %v3453_v26 }
0x2fed   : > { %v3450_v19 = vpop.xlane.xlu0 %3449 }
0x2fee   : > { %4766 = vrcp.f32 %v3450_v19 }
0x2ff0   : > { %v4765_v60 = vpop.eup %4764 }
0x2ff1   : > { %v3457_v5 = vmul.f32 %v4765_v60, %v4761_v43 }
0x2ff3   : > { %4518 = vmatmul.msk.f32.vlgmr.msra.gmra.mxu2 %vm1033_vm3, %v3457_v5 }
0x2ff4   : > { %v4767_v20 = vpop.eup %4766  ;;  %4530 = vmatpush.xpose.msk.msra.mxu2 %vm832_vm0, %v5102_v24  ;;  %v4871_v24 = vld [vmem:[%s6252_s12 + $0x28] sm:$0xff] }
0x2ff5   : > { %v3456_v63 = vmul.f32 %v4767_v20, %v4763_v59 }
0x2ff7   : > { %4517 = vmatmul.msk.f32.vlgmr.msra.gmra.mxu1 %vm1033_vm3, %v3456_v63 }
0x2ff8   : > { %4528 = vmatpush.xpose.msk.msra.mxu1 %vm832_vm0, %v5096_v21  ;;  %v4870_v21 = vld [vmem:[%s6250_s10 + $0x18] sm:$0xff] }
0x2ffb   : > { %4524 = vmatmul.msk.f32.vlgmr.msrb.gmra.mxu2 %vm832_vm0, %v5931_v51 }
0x2ffc   : > { %3947 = vmatpush.msrb.mxu2 %v4868_v23 }
0x2ffe   : > { %3948 = vmatpush.msrb.mxu2 %v4869_v6 }
0x2fff   : > { %4521 = vmatmul.msk.f32.vlgmr.msrb.gmra.mxu1 %vm832_vm0, %v5891_v37  ;;  %v4874_v37 = vld [vmem:[%s6250_s10 + $0x8] sm:$0xff] }
0x3000   : > { %3924 = vmatpush.msrb.mxu1 %v4870_v21  ;;  %3949 = vmatpush.msrb.mxu2 %v4871_v24 }
0x3002   : > { %3925 = vmatpush.msrb.mxu1 %v4872_v2  ;;  %3950 = vmatpush.msrb.mxu2 %v4873_v9 }
0x3004   : > { %3926 = vmatpush.msrb.mxu1 %v4874_v37 }
0x3006   : > { %3927 = vmatpush.msrb.mxu1 %v4875_v50 }
0x3074   : > { %v3478_v11 = vpop.f32.mrf.mxu1 }
0x3076   : > { %v3501_v53 = vpop.f32.mrf.mxu2 }
0x3077   : > { %v3506_v51 = vrot.slane %v3501_v53, 7 }
0x3079   : > { %v3507_v10 = vsel %vm932_vm1, %v3506_v51, %v3478_v11 }
0x307a   : > { %4519 = vmatmul.msk.f32.vlgmr.msra.gmra.mxu3 %vm832_vm0, %v3507_v10 }
0x307b   : > { %3878 = vmatpush.msra.mxu3 %v5133_v41 }
0x307c   : > { %v3577_v28 = vpop.f32.mrf.mxu1 }
0x307d   : > { %v3581_v0 = vrot.slane %v3577_v28, 2  ;;  %v3582_v57 = vrot.slane %v3577_v28, 3 }
0x30fd   : > { %v3527_v29 = vpop.f32.mrf.mxu3 }
0x30fe   : > { %v3528_v27 = vadd.f32 %v6045_v31, %v3527_v29 }
0x3100   : > { %4520 = vmatmul.msk.f32.vlgmr.msrb.gmra.mxu0 %vm832_vm0, %v3528_v27 }
0x3101   : > { %3901 = vmatpush.msrb.mxu0 %v5136_v46 }
0x317d   : > { %v3550_v3 = vpop.f32.mrf.mxu0 }
0x317e   : > { %v3554_v30 = vrot.slane %v3550_v3, 2  ;;  %v3555_v36 = vrot.slane %v3550_v3, 3 }
0x3180   : > { %v3558_v41 = vadd.f32 %v3554_v30, %v5317_v47  ;;  %v3559_v34 = vadd.f32 %v3555_v36, %v5314_v40  ;;  %v3629_v36 = vrot.slane %v5880_v58, 7 }
0x3182   : > { %v3585_v44 = vadd.f32 %v3581_v0, %v3558_v41  ;;  %v3586_v12 = vadd.f32 %v3582_v57, %v3559_v34  ;;  %v3630_v0 = vrot.slane %v5885_v17, 7 }
0x3184   : > { %4768 = vtanh.f32 %v3585_v44  ;;  %v4522_v46 = vmul.f32 -1.442695, %v3585_v44  ;;  %v4523_v45 = vmul.f32 -1.442695, %v3586_v12 }
0x3185   : > { %4770 = vtanh.f32 %v3586_v12 }
0x3186   : > { %4772 = vpow2.f32 %v4522_v46 }
0x318a   : > { %v4769_v8 = vpop.eup %4768 }
0x318b   : > { %v4771_v55 = vpop.eup %4770  ;;  %3637 = vrot.lane.b32.xlu2 %v4769_v8, %s4887_s0 }
0x318c   : > { %3639 = vrot.lane.b32.xlu1 %v4771_v55, %s4887_s0  ;;  %v4773_v39 = vpop.eup %4772 }
0x318d   : > { %v3593_v42 = vadd.f32 1.0, %v4773_v39 }
0x318f   : > { %4774 = vrcp.f32 %v3593_v42  ;;  %v3606_v20 = vand.u32 2147483648, %v3593_v42  ;;  %vm3600_vm5 = vweird.f32 %v3593_v42  ;;  %v3604_v63 = vand.u32 2147483647, %v3593_v42 }
0x3190   : > { %4776 = vpow2.f32 %v4523_v45 }
0x3191   : > { %v3607_v6 = vor.u32 1.1754944e-38, %v3606_v20  ;;  %vm3605_vm7 = vcmp.eq.f32.partialorder %v3604_v63, 8.507059e+37 }
0x3195   : > { %v4775_v43 = vpop.eup %4774 }
0x3196   : > { %v3596_v59 = vmul.f32 %v4775_v43, %v3593_v42  ;;  %v4777_v19 = vpop.eup %4776  ;;  %vm3601_vm4 = vweird.f32 %v4775_v43 }
0x3197   : > { %v3594_v60 = vadd.f32 1.0, %v4777_v19  ;;  %vm3602_vm6 = vmor %vm3600_vm5, %vm3601_vm4 }
0x3198   : > { %v3597_v49 = vsub.f32 1.0, %v3596_v59 }
0x3199   : > { %4778 = vrcp.f32 %v3594_v60  ;;  %v3621_v11 = vand.u32 2147483648, %v3594_v60  ;;  %vm3615_vm9 = vweird.f32 %v3594_v60  ;;  %v3619_v10 = vand.u32 2147483647, %v3594_v60 }
0x319a   : > { %v3598_v26 = vmul.f32 %v4775_v43, %v3597_v49 }
0x319b   : > { %v3622_v27 = vor.u32 1.1754944e-38, %v3621_v11  ;;  %vm3620_vm11 = vcmp.eq.f32.partialorder %v3619_v10, 8.507059e+37 }
0x319c   : > { %v3599_v5 = vadd.f32 %v4775_v43, %v3598_v26  ;;  %v3684_v26 = vpop.f32.mrf.mxu2 }
0x319e   : > { %v3603_v23 = vsel %vm3602_vm6, %v4775_v43, %v3599_v5  ;;  %v6079_v5 = vld [vmem:[%s6257_s17] ss:$0 sm:$0xff] }
0x319f   : > { %v3608_v24 = vsel %vm3605_vm7, %v3607_v6, %v3603_v23  ;;  %v4779_v9 = vpop.eup %4778 }
0x31a0   : > { %v3611_v37 = vmul.f32 %v4779_v9, %v3594_v60  ;;  %vm3616_vm8 = vweird.f32 %v4779_v9  ;;  %v3633_v57 = vmul.f32 %v3629_v36, %v3608_v24 }
0x31a1   : > { %vm3617_vm10 = vmor %vm3615_vm9, %vm3616_vm8 }
0x31a2   : > { %v3612_v50 = vsub.f32 1.0, %v3611_v37 }
0x31a4   : > { %v3613_v53 = vmul.f32 %v4779_v9, %v3612_v50 }
0x31a6   : > { %v3614_v51 = vadd.f32 %v4779_v9, %v3613_v53 }
0x31a8   : > { %v3618_v29 = vsel %vm3617_vm10, %v4779_v9, %v3614_v51 }
0x31a9   : > { %v3623_v3 = vsel %vm3620_vm11, %v3622_v27, %v3618_v29 }
0x31aa   : > { %v3634_v41 = vmul.f32 %v3630_v0, %v3623_v3 }
0x31e5   : > { %v3638_v21 = vpop.permute.xlu2 %3637 }
0x31e6   : > { %v3643_v2 = vmul.f32 %v3638_v21, %v3608_v24 }
0x31e8   : > { %3647 = vrot.lane.b32.xlu0 %v3643_v2, %s6285_s2 }
0x31fe   : > { %v3640_v28 = vpop.permute.xlu1 %3639 }
0x31ff   : > { %v3644_v30 = vmul.f32 %v3640_v28, %v3623_v3 }
0x3201   : > { %3649 = vrot.lane.b32.xlu2 %v3644_v30, %s6285_s2 }
0x325a   : > { %v3648_v34 = vpop.permute.xlu0 %3647 }
0x325b   : > { %v3650_v44 = vpop.permute.xlu2 %3649  ;;  %v6058_v12 = vadd.f32 %v3648_v34, %v3633_v57 }
0x325c   : > { %v6060_v8 = vadd.f32 %v3650_v44, %v3634_v41 }
0x325d   : > { %4780 = vtanh.f32 %v6058_v12 }
0x325e   : > { %4782 = vtanh.f32 %v6060_v8 }
0x3263   : > { %v4781_v55 = vpop.eup %4780 }
0x3264   : > { %v4783_v46 = vpop.eup %4782  ;;  %3659 = vrot.lane.b32.xlu0 %v4781_v55, %s4887_s0 }
0x3265   : > { %3661 = vrot.lane.b32.xlu1 %v4783_v46, %s4887_s0 }
0x32d6   : > { %v3660_v58 = vpop.permute.xlu0 %3659 }
0x32d7   : > { %v3662_v17 = vpop.permute.xlu1 %3661  ;;  %v3665_v39 = vmul.f32 %v3660_v58, %v3608_v24 }
0x32d8   : > { %v3666_v42 = vmul.f32 %v3662_v17, %v3623_v3 }
0x32d9   : > { %v3689_v43 = vrot.slane %v3665_v39, 6 }
0x32da   : > { %v3690_v45 = vrot.slane %v3666_v42, 5 }
0x32dc   : > { %v3691_v59 = vsel %vm932_vm1, %v3690_v45, %v3689_v43 }
0x32dd   : > { %3692 = vrot.lane.b32.xlu2 %v3691_v59, %s6285_s2 }
0x3337   : > { %v6068_v49 = vpop.permute.xlu2 %3692 }
0x3338   : > { %4525 = vmatmul.msk.f32.vlgmr.msrb.gmra.mxu3 %vm832_vm0, %v6068_v49 }
0x3339   : > { %3974 = vmatpush.msrb.mxu3 %v5898_v32 }
0x333b   : > { %3975 = vmatpush.msrb.mxu3 %v5904_v7 }
0x333d   : > { %3976 = vmatpush.msrb.mxu3 %v5910_v25 }
0x333f   : > { %3977 = vmatpush.msrb.mxu3 %v5916_v48 }
0x33bb   : > { %v3713_v19 = vpop.f32.mrf.mxu3 }
0x33bc   : > { %v3714_v60 = vadd.f32 %v3713_v19, %v3684_v26 }
0x33be   : > { %v3716_v20 = vadd.f32 %v6079_v5, %v3714_v60 }
0x33c0   : > { %4784 = vtanh.f32 %v3716_v20  ;;  %v4526_v32 = vmul.f32 -1.442695, %v3716_v20 }
0x33c2   : > { %4786 = vpow2.f32 %v4526_v32 }
0x33c6   : > { %v4785_v63 = vpop.eup %4784 }
0x33c7   : > { %3739 = vrot.lane.b32.xlu0 %v4785_v63, %s4887_s0 }
0x33c8   : > { %v4787_v7 = vpop.eup %4786 }
0x33c9   : > { %v3720_v25 = vadd.f32 1.0, %v4787_v7 }
0x33cb   : > { %4788 = vrcp.f32 %v3720_v25  ;;  %v3732_v2 = vand.u32 2147483648, %v3720_v25  ;;  %vm3726_vm13 = vweird.f32 %v3720_v25  ;;  %v3730_v9 = vand.u32 2147483647, %v3720_v25 }
0x33cd   : > { %v3733_v50 = vor.u32 1.1754944e-38, %v3732_v2  ;;  %vm3731_vm15 = vcmp.eq.f32.partialorder %v3730_v9, 8.507059e+37 }
0x33d1   : > { %v4789_v48 = vpop.eup %4788 }
0x33d2   : > { %v3722_v23 = vmul.f32 %v4789_v48, %v3720_v25  ;;  %vm3727_vm12 = vweird.f32 %v4789_v48 }
0x33d3   : > { %vm3728_vm14 = vmor %vm3726_vm13, %vm3727_vm12  ;;  %vm1354_vm13 = vcmask 253952  }
0x33d4   : > { %v3723_v6 = vsub.f32 1.0, %v3722_v23 }
0x33d6   : > { %v3724_v21 = vmul.f32 %v4789_v48, %v3723_v6 }
0x33d8   : > { %v3725_v24 = vadd.f32 %v4789_v48, %v3724_v21 }
0x33da   : > { %v3729_v37 = vsel %vm3728_vm14, %v4789_v48, %v3725_v24  ;;  %vm4210_vm14 = vcmask 261127  }
0x33db   : > { %v3734_v51 = vsel %vm3731_vm15, %v3733_v50, %v3729_v37 }
0x33dc   : > { %v3737_v10 = vmul.f32 %v3734_v51, %v5923_v15 }
0x3439   : > { %v3740_v53 = vpop.permute.xlu0 %3739 }
0x343a   : > { %v3742_v11 = vmul.f32 %v3740_v53, %v3734_v51 }
0x343c   : > { %3744 = vrot.lane.b32.xlu1 %v3742_v11, %s6285_s2 }
0x34ae   : > { %v3745_v29 = vpop.permute.xlu1 %3744 }
0x34af   : > { %v6085_v27 = vadd.f32 %v3745_v29, %v3737_v10 }
0x34b1   : > { %4790 = vtanh.f32 %v6085_v27 }
0x34b7   : > { %v4791_v28 = vpop.eup %4790 }
0x34b8   : > { %3750 = vrot.lane.b32.xlu2 %v4791_v28, %s4887_s0 }
0x3512   : > { %v3751_v3 = vpop.permute.xlu2 %3750 }
0x3513   : > { %v6089_v30 = vmul.f32 %v3751_v3, %v3734_v51 }
0x3515   : > { %3766 = vrot.lane.b32.xlu0 %v6089_v30, %s6285_s2 }
0x3587   : > { %v3767_v36 = vpop.permute.xlu0 %3766 }
0x3588   : > { %4527 = vmatmul.msk.f32.vlgmr.msra.gmra.mxu0 %vm832_vm0, %v3767_v36 }
0x3589   : > { %4081 = vmatpush.msra.mxu0 %v5938_v56 }
0x358b   : > { %4082 = vmatpush.msra.mxu0 %v5944_v61 }
0x358d   : > { %4083 = vmatpush.msra.mxu0 %v5950_v22 }
0x358f   : > { %4084 = vmatpush.msra.mxu0 %v5956_v16 }
0x3605   : > { %v3787_v15 = vpop.f32.mrf.mxu0 }
0x3606   : > { %v3788_v0 = vadd.f32 %v5962_v52, %v3787_v15 }
0x3608   : > { %v3791_v57 = vrot.slane %v3788_v0, 1  ;;  %4529 = vmatmul.msk.f32.vlgmr.msra.gmra.mxu1 %vm832_vm0, %v3788_v0 }
0x3609   : > { %4110 = vmatpush.msra.mxu1 %v5969_v13 }
0x360a   : > { %4531 = vmatmul.msk.f32.vlgmr.msra.gmra.mxu2 %vm832_vm0, %v3791_v57 }
0x360b   : > { %4111 = vmatpush.msra.mxu1 %v5976_v35 }
0x360d   : > { %4112 = vmatpush.msra.mxu1 %v5983_v38 }
0x360f   : > { %4113 = vmatpush.msra.mxu1 %v5992_v18 }
0x3685   : > { %v3811_v56 = vpop.f32.mrf.mxu1 }
0x3686   : > { %v3836_v61 = vmul.f32 0.17677669, %v3811_v56 }
0x3688   : > { %v3838_v22 = vsel %vm1010_vm2, %v3836_v61, -inf }
0x3689   : > { %3839 = vmax.xlane.f32.xlu1 %v3838_v22 }
0x368d   : > { %v3833_v16 = vpop.f32.mrf.mxu2 }
0x368e   : > { %v3837_v52 = vmul.f32 0.17677669, %v3833_v16 }
0x3690   : > { %v3841_v41 = vsel %vm1010_vm2, %v3837_v52, -inf }
0x3691   : > { %3842 = vmax.xlane.f32.xlu2 %v3841_v41 }
0x36fc   : > { %v3840_v34 = vpop.xlane.xlu1 %3839 }
0x36fd   : > { %v3844_v13 = vsub.f32 %v3836_v61, %v3840_v34 }
0x36ff   : > { %v3846_v44 = vmul.f32 1.442695, %v3844_v13 }
0x3701   : > { %4792 = vpow2.f32 %v3846_v44 }
0x3704   : > { %v3843_v55 = vpop.xlane.xlu2 %3842 }
0x3705   : > { %v3845_v35 = vsub.f32 %v3837_v52, %v3843_v55 }
0x3707   : > { %v4793_v46 = vpop.eup %4792  ;;  %v3848_v38 = vmul.f32 1.442695, %v3845_v35 }
0x3708   : > { %v3850_v18 = vsel %vm1010_vm2, %v4793_v46, 0.0 }
0x3709   : > { %4794 = vpow2.f32 %v3848_v38  ;;  %3851 = vadd.xlane.f32.xlu0 %v3850_v18 }
0x370f   : > { %v4795_v58 = vpop.eup %4794 }
0x3710   : > { %v3853_v17 = vsel %vm1010_vm2, %v4795_v58, 0.0 }
0x3711   : > { %3854 = vadd.xlane.f32.xlu1 %v3853_v17 }
0x377c   : > { %v3852_v39 = vpop.xlane.xlu0 %3851 }
0x377d   : > { %4796 = vrcp.f32 %v3852_v39 }
0x3783   : > { %v4797_v42 = vpop.eup %4796 }
0x3784   : > { %v3858_v43 = vmul.f32 %v4797_v42, %v4793_v46  ;;  %v3855_v45 = vpop.xlane.xlu1 %3854  ;;  %v4031_v42 = vrot.slane %v6058_v12, 7 }
0x3785   : > { %4798 = vrcp.f32 %v3855_v45 }
0x3786   : > { %4532 = vmatmul.msk.f32.vlgmr.msra.gmra.mxu3 %vm1033_vm3, %v3858_v43 }
0x378b   : > { %v4799_v59 = vpop.eup %4798 }
0x378c   : > { %v3859_v26 = vmul.f32 %v4799_v59, %v4795_v58 }
0x378e   : > { %4533 = vmatmul.msk.f32.vlgmr.msrb.gmra.mxu0 %vm1033_vm3, %v3859_v26  ;;  %4536 = vmatmul.msk.f32.vlgmr.msrb.gmra.mxu3 %vm832_vm0, %v6068_v49 }
0x3796   : > { %4539 = vmatmul.msk.f32.vlgmr.msra.gmra.mxu0 %vm832_vm0, %v3767_v36 }
0x3809   : > { %v3880_v20 = vpop.f32.mrf.mxu3 }
0x380b   : > { %v3903_v19 = vpop.f32.mrf.mxu0 }
0x380c   : > { %v3908_v60 = vrot.slane %v3903_v19, 7  ;;  %v4032_v19 = vrot.slane %v6060_v8, 7 }
0x380e   : > { %v3909_v63 = vsel %vm932_vm1, %v3908_v60, %v3880_v20 }
0x380f   : > { %4534 = vmatmul.msk.f32.vlgmr.msrb.gmra.mxu1 %vm832_vm0, %v3909_v63 }
0x3811   : > { %v3979_v25 = vpop.f32.mrf.mxu3 }
0x3812   : > { %v3983_v21 = vrot.slane %v3979_v25, 1  ;;  %v3984_v49 = vrot.slane %v3979_v25, 2 }
0x388c   : > { %v3929_v32 = vpop.f32.mrf.mxu1 }
0x388d   : > { %v3930_v7 = vadd.f32 %v6045_v31, %v3929_v32 }
0x388f   : > { %4535 = vmatmul.msk.f32.vlgmr.msrb.gmra.mxu2 %vm832_vm0, %v3930_v7 }
0x3912   : > { %v3952_v48 = vpop.f32.mrf.mxu2 }
0x3913   : > { %v3956_v23 = vrot.slane %v3952_v48, 1  ;;  %v3957_v6 = vrot.slane %v3952_v48, 2 }
0x3915   : > { %v3960_v24 = vadd.f32 %v3956_v23, %v5317_v47  ;;  %v3961_v2 = vadd.f32 %v3957_v6, %v5314_v40 }
0x3917   : > { %v3987_v9 = vadd.f32 %v3983_v21, %v3960_v24  ;;  %v3988_v37 = vadd.f32 %v3984_v49, %v3961_v2  ;;  %v4086_v49 = vpop.f32.mrf.mxu0 }
0x3919   : > { %4800 = vtanh.f32 %v3987_v9  ;;  %v4537_v31 = vmul.f32 -1.442695, %v3987_v9  ;;  %v4538_v29 = vmul.f32 -1.442695, %v3988_v37 }
0x391a   : > { %4802 = vtanh.f32 %v3988_v37 }
0x391b   : > { %4804 = vpow2.f32 %v4537_v31  ;;  %v3756_v31 = vperm.slane %v6089_v30, 0 }
0x391f   : > { %v4801_v50 = vpop.eup %4800 }
0x3920   : > { %v4803_v53 = vpop.eup %4802  ;;  %4039 = vrot.lane.b32.xlu2 %v4801_v50, %s4887_s0  ;;  %v1346_v50 = vperm.slane %v5358_v33, 0 }
0x3921   : > { %4041 = vrot.lane.b32.xlu0 %v4803_v53, %s4887_s0  ;;  %v4805_v51 = vpop.eup %4804  ;;  %v2550_v53 = vperm.slane %v5740_v1, 0 }
0x3922   : > { %v3995_v11 = vadd.f32 1.0, %v4805_v51  ;;  %v1745_v51 = vrot.slane %v5439_v4, 1 }
0x3924   : > { %4806 = vrcp.f32 %v3995_v11  ;;  %v4008_v0 = vand.u32 2147483648, %v3995_v11  ;;  %vm4002_vm3 = vweird.f32 %v3995_v11  ;;  %v4006_v57 = vand.u32 2147483647, %v3995_v11 }
0x3925   : > { %4808 = vpow2.f32 %v4538_v29 }
0x3926   : > { %v4009_v61 = vor.u32 1.1754944e-38, %v4008_v0  ;;  %vm4007_vm5 = vcmp.eq.f32.partialorder %v4006_v57, 8.507059e+37 }
0x392a   : > { %v4807_v10 = vpop.eup %4806 }
0x392b   : > { %v3998_v47 = vmul.f32 %v4807_v10, %v3995_v11  ;;  %v4809_v3 = vpop.eup %4808  ;;  %vm4003_vm2 = vweird.f32 %v4807_v10  ;;  %v1747_v11 = vperm.slane %v1745_v51, 0 }
0x392c   : > { %v3996_v36 = vadd.f32 1.0, %v4809_v3  ;;  %vm4004_vm4 = vmor %vm4002_vm3, %vm4003_vm2 }
0x392d   : > { %v3999_v40 = vsub.f32 1.0, %v3998_v47 }
0x392e   : > { %4810 = vrcp.f32 %v3996_v36  ;;  %v4023_v35 = vand.u32 2147483648, %v3996_v36  ;;  %vm4017_vm7 = vweird.f32 %v3996_v36  ;;  %v4021_v46 = vand.u32 2147483647, %v3996_v36 }
0x392f   : > { %v4000_v28 = vmul.f32 %v4807_v10, %v3999_v40 }
0x3930   : > { %v4024_v18 = vor.u32 1.1754944e-38, %v4023_v35  ;;  %vm4022_vm9 = vcmp.eq.f32.partialorder %v4021_v46, 8.507059e+37  ;;  %v2147_v35 = vrot.slane %v5545_v14, 1 }
0x3931   : > { %v4001_v15 = vadd.f32 %v4807_v10, %v4000_v28 }
0x3933   : > { %v4005_v56 = vsel %vm4004_vm4, %v4807_v10, %v4001_v15 }
0x3934   : > { %v4010_v16 = vsel %vm4007_vm5, %v4009_v61, %v4005_v56  ;;  %v4811_v41 = vpop.eup %4810 }
0x3935   : > { %v4013_v34 = vmul.f32 %v4811_v41, %v3996_v36  ;;  %vm4018_vm6 = vweird.f32 %v4811_v41  ;;  %v4035_v43 = vmul.f32 %v4031_v42, %v4010_v16 }
0x3936   : > { %vm4019_vm8 = vmor %vm4017_vm7, %vm4018_vm6 }
0x3937   : > { %v4014_v13 = vsub.f32 1.0, %v4013_v34 }
0x3939   : > { %v4015_v44 = vmul.f32 %v4811_v41, %v4014_v13  ;;  %v1746_v13 = vperm.slane %v5439_v4, 0 }
0x393b   : > { %v4016_v55 = vadd.f32 %v4811_v41, %v4015_v44 }
0x393d   : > { %v4020_v38 = vsel %vm4019_vm8, %v4811_v41, %v4016_v55  ;;  %v2952_v55 = vperm.slane %v5821_v54, 0 }
0x393e   : > { %v4025_v17 = vsel %vm4022_vm9, %v4024_v18, %v4020_v38  ;;  %v2149_v38 = vperm.slane %v2147_v35, 0 }
0x393f   : > { %v4036_v60 = vmul.f32 %v4032_v19, %v4025_v17  ;;  %v3354_v19 = vperm.slane %v5927_v62, 0 }
0x397a   : > { %v4040_v22 = vpop.permute.xlu2 %4039 }
0x397b   : > { %v4045_v52 = vmul.f32 %v4040_v22, %v4010_v16 }
0x397d   : > { %4049 = vrot.lane.b32.xlu1 %v4045_v52, %s6285_s2 }
0x3993   : > { %v4042_v58 = vpop.permute.xlu0 %4041 }
0x3994   : > { %v4046_v39 = vmul.f32 %v4042_v58, %v4025_v17 }
0x3996   : > { %4051 = vrot.lane.b32.xlu0 %v4046_v39, %s6285_s2 }
0x39ef   : > { %v4050_v45 = vpop.permute.xlu1 %4049 }
0x39f0   : > { %v6125_v59 = vadd.f32 %v4050_v45, %v4035_v43  ;;  %v2148_v45 = vperm.slane %v5545_v14, 0  ;;  %v3755_v14 = vrot.slane %v6089_v30, 1 }
0x39f2   : > { %4812 = vtanh.f32 %v6125_v59 }
0x39f8   : > { %v4813_v26 = vpop.eup %4812 }
0x39f9   : > { %4061 = vrot.lane.b32.xlu2 %v4813_v26, %s4887_s0 }
0x3a08   : > { %v4052_v20 = vpop.permute.xlu0 %4051 }
0x3a09   : > { %v6130_v63 = vadd.f32 %v4052_v20, %v4036_v60  ;;  %v2549_v20 = vrot.slane %v5740_v1, 1  ;;  %v3353_v1 = vrot.slane %v5927_v62, 1 }
0x3a0b   : > { %4814 = vtanh.f32 %v6130_v63 }
0x3a11   : > { %v4815_v32 = vpop.eup %4814 }
0x3a12   : > { %4063 = vrot.lane.b32.xlu0 %v4815_v32, %s4887_s0  ;;  %v2551_v32 = vperm.slane %v2549_v20, 0 }
0x3a53   : > { %v4062_v12 = vpop.permute.xlu2 %4061 }
0x3a54   : > { %v6134_v7 = vmul.f32 %v4062_v12, %v4010_v16  ;;  %v3757_v12 = vperm.slane %v3755_v14, 0 }
0x3a56   : > { %v4091_v23 = vrot.slane %v6134_v7, 7 }
0x3a84   : > { %v4064_v25 = vpop.permute.xlu0 %4063 }
0x3a85   : > { %v6136_v48 = vmul.f32 %v4064_v25, %v4025_v17 }
0x3a87   : > { %v4092_v6 = vrot.slane %v6136_v48, 6 }
0x3a89   : > { %v4093_v8 = vsel %vm932_vm1, %v4092_v6, %v4091_v23 }
0x3a8a   : > { %4094 = vrot.lane.b32.xlu1 %v4093_v8, %s6285_s2 }
0x3afc   : > { %v4095_v21 = vpop.permute.xlu1 %4094 }
0x3afd   : > { %4540 = vmatmul.msk.f32.vlgmr.msra.gmra.mxu1 %vm832_vm0, %v4095_v21  ;;  %v3355_v21 = vperm.slane %v3353_v1, 0 }
0x3b7a   : > { %v4115_v24 = vpop.f32.mrf.mxu1 }
0x3b7b   : > { %v4116_v2 = vadd.f32 %v4115_v24, %v4086_v49 }
0x3b7d   : > { %v4118_v9 = vadd.f32 %v6079_v5, %v4116_v2  ;;  %v2951_v5 = vrot.slane %v5821_v54, 1 }
0x3b7f   : > { %4816 = vtanh.f32 %v4118_v9  ;;  %v2953_v10 = vperm.slane %v2951_v5, 0  ;;  %v4541_v29 = vmul.f32 -1.442695, %v4118_v9 }
0x3b81   : > { %4818 = vpow2.f32 %v4541_v29 }
0x3b85   : > { %v4817_v37 = vpop.eup %4816 }
0x3b86   : > { %4141 = vrot.lane.b32.xlu2 %v4817_v37, %s4887_s0 }
0x3b87   : > { %v4819_v47 = vpop.eup %4818 }
0x3b88   : > { %v4122_v40 = vadd.f32 1.0, %v4819_v47 }
0x3b8a   : > { %4820 = vrcp.f32 %v4122_v40  ;;  %v4134_v57 = vand.u32 2147483648, %v4122_v40  ;;  %vm4128_vm10 = vweird.f32 %v4122_v40  ;;  %v4132_v56 = vand.u32 2147483647, %v4122_v40 }
0x3b8c   : > { %v4135_v22 = vor.u32 1.1754944e-38, %v4134_v57  ;;  %vm4133_vm12 = vcmp.eq.f32.partialorder %v4132_v56, 8.507059e+37 }
0x3b8e   : > { %1348 = vrot.lane.b32.xlu2 %v1346_v50, %s6285_s2  ;;  %v824_v50 = vld [vmem:[%s6258_s18 + $0x10] sm:$0xff] }
0x3b90   : > { %v4821_v28 = vpop.eup %4820 }
0x3b91   : > { %v4124_v3 = vmul.f32 %v4821_v28, %v4122_v40  ;;  %vm4129_vm1 = vweird.f32 %v4821_v28 }
0x3b92   : > { %vm4130_vm11 = vmor %vm4128_vm10, %vm4129_vm1 }
0x3b93   : > { %v4125_v36 = vsub.f32 1.0, %v4124_v3 }
0x3b95   : > { %v4126_v15 = vmul.f32 %v4821_v28, %v4125_v36  ;;  %v4567_v36 = vld [vmem:[%s6259_s19] ss:$0 sm:$0xff] }
0x3b96   : > { %2552 = vrot.lane.b32.xlu2 %v2550_v53, %s6285_s2  ;;  %v823_v53 = vld [vmem:[%s6258_s18 + $0x8] sm:$0xff] }
0x3b97   : > { %v4127_v0 = vadd.f32 %v4821_v28, %v4126_v15 }
0x3b99   : > { %v4131_v61 = vsel %vm4130_vm11, %v4821_v28, %v4127_v0 }
0x3b9a   : > { %v4136_v52 = vsel %vm4133_vm12, %v4135_v22, %v4131_v61 }
0x3b9b   : > { %v4139_v58 = vmul.f32 %v4136_v52, %v6085_v27  ;;  %v1345_v27 = vrot.slane %v5358_v33, 1 }
0x3b9d   : > { %v1347_v60 = vperm.slane %v1345_v27, 0 }
0x3b9e   : > { %3758 = vrot.lane.b32.xlu2 %v3756_v31, %s6285_s2  ;;  %v822_v31 = vld [vmem:[%s6258_s18] sm:$0xff] }
0x3ba6   : > { %1750 = vrot.lane.b32.xlu2 %v1747_v11, %s6285_s2 }
0x3bae   : > { %2956 = vrot.lane.b32.xlu2 %v2953_v10, %s6285_s2 }
0x3be0   : > { %v4142_v16 = vpop.permute.xlu2 %4141 }
0x3be1   : > { %v4144_v41 = vmul.f32 %v4142_v16, %v4136_v52 }
0x3be3   : > { %4146 = vrot.lane.b32.xlu0 %v4144_v41, %s6285_s2 }
0x3be8   : > { %v1349_v34 = vpop.permute.xlu2 %1348 }
0x3be9   : > { %1355 = vst.msk [vmem:[#allocation2] sm:$0x1] %vm1354_vm13, %v1349_v34 }
0x3beb   : > { %1748 = vrot.lane.b32.xlu0 %v1746_v13, %s6285_s2 }
0x3bf0   : > { %v2553_v44 = vpop.permute.xlu2 %2552 }
0x3bf1   : > { %2558 = vst.msk [vmem:[#allocation2 + $0x3] sm:$0x1] %vm1354_vm13, %v2553_v44 }
0x3bf3   : > { %2954 = vrot.lane.b32.xlu0 %v2952_v55, %s6285_s2 }
0x3bf8   : > { %v3759_v46 = vpop.permute.xlu2 %3758 }
0x3bf9   : > { %3764 = vst.msk [vmem:[#allocation2 + $0x6] sm:$0x1] %vm1354_vm13, %v3759_v46 }
0x3bfb   : > { %2152 = vrot.lane.b32.xlu0 %v2149_v38, %s6285_s2 }
0x3c00   : > { %v1751_v18 = vpop.permute.xlu2 %1750 }
0x3c01   : > { %1755 = vst.msk [vmem:[#allocation2 + $0x9] sm:$0x1] %vm1354_vm13, %v1751_v18 }
0x3c08   : > { %v2957_v4 = vpop.permute.xlu2 %2956 }
0x3c09   : > { %2961 = vst.msk [vmem:[#allocation2 + $0xc] sm:$0x1] %vm1354_vm13, %v2957_v4 }
0x3c55   : > { %v4147_v17 = vpop.permute.xlu0 %4146 }
0x3c56   : > { %v4149_v54 = vadd.f32 %v4147_v17, %v4139_v58 }
0x3c58   : > { %4822 = vtanh.f32 %v4149_v54  ;;  %v4226_v49 = vrot.slane %v4149_v54, 1 }
0x3c5a   : > { %v4228_v24 = vperm.slane %v4226_v49, 0 }
0x3c5d   : > { %v1749_v39 = vpop.permute.xlu0 %1748 }
0x3c5e   : > { %v4823_v42 = vpop.eup %4822  ;;  %1754 = vst.msk [vmem:[#allocation2 + $0x1] sm:$0x1] %vm1354_vm13, %v1749_v39 }
0x3c5f   : > { %4152 = vrot.lane.b32.xlu1 %v4823_v42, %s4887_s0  ;;  %s4888_s0 = smov 96  }
0x3c65   : > { %v2955_v43 = vpop.permute.xlu0 %2954 }
0x3c66   : > { %2960 = vst.msk [vmem:[#allocation2 + $0x4] sm:$0x1] %vm1354_vm13, %v2955_v43 }
0x3c67   : > { %2150 = vrot.lane.b32.xlu1 %v2148_v45, %s6285_s2 }
0x3c6d   : > { %v2153_v26 = vpop.permute.xlu0 %2152 }
0x3c6e   : > { %2157 = vst.msk [vmem:[#allocation2 + $0xa] sm:$0x1] %vm1354_vm13, %v2153_v26 }
0x3c6f   : > { %3356 = vrot.lane.b32.xlu1 %v3354_v19, %s6285_s2 }
0x3c77   : > { %1350 = vrot.lane.b32.xlu1 %v1347_v60, %s6285_s2 }
0x3c7f   : > { %2554 = vrot.lane.b32.xlu1 %v2551_v32, %s6285_s2 }
0x3c87   : > { %3760 = vrot.lane.b32.xlu1 %v3757_v12, %s6285_s2 }
0x3c8f   : > { %4217 = vrot.lane.b32.xlu1 %v6125_v59, %s4888_s0  ;;  %v4227_v59 = vperm.slane %v4149_v54, 0 }
0x3c97   : > { %4219 = vrot.lane.b32.xlu1 %v6130_v63, %s4888_s0 }
0x3cd1   : > { %v4153_v25 = vpop.permute.xlu1 %4152 }
0x3cd2   : > { %v4155_v33 = vmul.f32 %v4153_v25, %v4136_v52 }
0x3cd4   : > { %v4157_v23 = vrot.slane %v4155_v33, 1  ;;  %v4158_v6 = vperm.slane %v4155_v33, 0 }
0x3cd6   : > { %v4159_v8 = vperm.slane %v4157_v23, 0  ;;  %4160 = vrot.lane.b32.xlu0 %v4158_v6, %s6285_s2 }
0x3cd8   : > { %4162 = vrot.lane.b32.xlu2 %v4159_v8, %s6285_s2 }
0x3cd9   : > { %v2151_v30 = vpop.permute.xlu1 %2150 }
0x3cda   : > { %2156 = vst.msk [vmem:[#allocation2 + $0x2] sm:$0x1] %vm1354_vm13, %v2151_v30 }
0x3cde   : > { %3358 = vrot.lane.b32.xlu0 %v3355_v21, %s6285_s2 }
0x3ce0   : > { %4229 = vrot.lane.b32.xlu2 %v4227_v59, %s4888_s0 }
0x3ce1   : > { %v3357_v63 = vpop.permute.xlu1 %3356 }
0x3ce2   : > { %3362 = vst.msk [vmem:[#allocation2 + $0x5] sm:$0x1] %vm1354_vm13, %v3357_v63 }
0x3ce6   : > { %4204 = vrot.lane.b32.xlu0 %v6134_v7, %s6285_s2 }
0x3ce8   : > { %4231 = vrot.lane.b32.xlu2 %v4228_v24, %s4888_s0 }
0x3ce9   : > { %v1351_v2 = vpop.permute.xlu1 %1350 }
0x3cea   : > { %1356 = vst.msk [vmem:[#allocation2 + $0x8] sm:$0x1] %vm1354_vm13, %v1351_v2 }
0x3cee   : > { %4206 = vrot.lane.b32.xlu0 %v6136_v48, %s6285_s2  ;;  %v825_v48 = vld [vmem:[%s6258_s18 + $0x18] sm:$0xff] }
0x3cef   : > { %4191 = vmatpush.msra.mxu2 %v825_v48 }
0x3cf1   : > { %v2555_v62 = vpop.permute.xlu1 %2554  ;;  %4192 = vmatpush.msra.mxu2 %v824_v50 }
0x3cf2   : > { %2559 = vst.msk [vmem:[#allocation2 + $0xb] sm:$0x1] %vm1354_vm13, %v2555_v62 }
0x3cf3   : > { %4193 = vmatpush.msra.mxu2 %v823_v53 }
0x3cf5   : > { %4194 = vmatpush.msra.mxu2 %v822_v31 }
0x3cf9   : > { %v3761_v9 = vpop.permute.xlu1 %3760 }
0x3cfa   : > { %3765 = vst.msk [vmem:[#allocation2 + $0xe] sm:$0x1] %vm1354_vm13, %v3761_v9 }
0x3d01   : > { %v4218_v7 = vpop.permute.xlu1 %4217 }
0x3d02   : > { %4223 = vst.msk [vmem:[%s778_s30 - $0x7] sm:$0x80] %vm4210_vm14, %v4218_v7 }
0x3d09   : > { %v4220_v37 = vpop.permute.xlu1 %4219 }
0x3d0a   : > { %4224 = vst.msk [vmem:[%s778_s30 - $0x5] sm:$0x80] %vm4210_vm14, %v4220_v37 }
0x3d32   : > { %v4163_v51 = vpop.permute.xlu2 %4162 }
0x3d33   : > { %4167 = vst.msk [vmem:[#allocation2 + $0xf] sm:$0x1] %vm1354_vm13, %v4163_v51 }
0x3d34   : > { %4214 = vst.msk [vmem:[%s772_s5 + $0x3] sm:$0x1] %vm1354_vm13, %v4163_v51 }
0x3d3a   : > { %v4230_v11 = vpop.permute.xlu2 %4229 }
0x3d3b   : > { %4235 = vst.msk [vmem:[%s778_s30 + $0x1] sm:$0x1] %vm1354_vm13, %v4230_v11 }
0x3d42   : > { %v4232_v5 = vpop.permute.xlu2 %4231 }
0x3d43   : > { %4236 = vst.msk [vmem:[%s778_s30 + $0x3] sm:$0x1] %vm1354_vm13, %v4232_v5 }
0x3d48   : > { %v4161_v10 = vpop.permute.xlu0 %4160 }
0x3d49   : > { %4166 = vst.msk [vmem:[#allocation2 + $0x7] sm:$0x1] %vm1354_vm13, %v4161_v10 }
0x3d4a   : > { %4213 = vst.msk [vmem:[%s772_s5 + $0x1] sm:$0x1] %vm1354_vm13, %v4161_v10 }
0x3d50   : > { %v3359_v29 = vpop.permute.xlu0 %3358  ;;  %v4168_v47 = vld [vmem:[#allocation2] sm:$0xff] }
0x3d51   : > { %3363 = vst.msk [vmem:[#allocation2 + $0xd] sm:$0x1] %vm1354_vm13, %v3359_v29  ;;  %4542 = vmatmul.msk.f32.vlgmr.msra.gmra.mxu2 %vm832_vm0, %v4168_v47 }
0x3d58   : > { %v4205_v40 = vpop.permute.xlu0 %4204  ;;  %v4169_v28 = vld [vmem:[#allocation2 + $0x8] sm:$0xff] }
0x3d59   : > { %4211 = vst.msk [vmem:[%s772_s5 - $0x7] sm:$0x80] %vm4210_vm14, %v4205_v40  ;;  %4543 = vmatmul.msk.f32.gmra.mxu2 %vm832_vm0, %v4169_v28 }
0x3d60   : > { %v4207_v3 = vpop.permute.xlu0 %4206 }
0x3d61   : > { %4212 = vst.msk [vmem:[%s772_s5 - $0x5] sm:$0x80] %vm4210_vm14, %v4207_v3 }
0x3dd4   : > { %v4196_v15 = vpop.f32.mrf.mxu2 }
0x3dd5   : > { %v4197_v0 = vadd.f32 %v4567_v36, %v4196_v15 }
0x3dd7   : > { %4202 = vst [vmem:[%s766_s28] sm:$0xff] %v4197_v0 }
0x3ddc   : > { %v4199_v57 = vpop.f32.mrf.mxu2 }
0x3ddd   : > { %v4200_v56 = vadd.f32 %v4567_v36, %v4199_v57 }
0x3ddf   : > { %4203 = vst [vmem:[%s766_s28 + $0x8] sm:$0xff] %v4200_v56 }
0x3de0 PF: > { %s6286_s2 = sld [smem:[#allocation3_spill]] }
0x3de6   : > { %s33_s3 = sadd.s32 1, %s6286_s2  }
0x3de7   : > { %p30_p4 = scmp.ge.s32.totalorder %s33_s3, 4  }
0x3de9   :  { %32 = sbr.rel (!%p30_p4) target bundleno = 8 (0x8), region = 163 }

</bundles_post_ra>
